<compile_context>
chip_gen: v7x
topology: tpu7x:2x2x1
jax: 0.10.0
libtpu: 0.0.40
codegen_flags: <defaults>
</compile_context>

<pallas_src>
import jax
import jax.numpy as jnp
import numpy as np
from jax.experimental import pallas as pl
from jax.experimental.pallas import tpu as pltpu

# Model hyper-parameters (module defaults, small enough for VMEM).
N_CHARS = 4
SEQ_LEN = 10
COND = 64
HID = 32
LIN = 16
EMB = 10

# Lane-dense padded widths (wrapper-side zero padding only).
XIN_P = 128          # padded 2*n_chars one-hot width
COND_P = 128
LIN_P = 128
EMB_P = 128
OUT_P = 128
OUT_DIM = SEQ_LEN * N_CHARS          # 40


# ----------------------------- in-kernel helpers -----------------------------
def _fused_bilstm_accumulate(get_xgate, whh_blk, wout_ref, acc, B, H, S):
    """Fused fwd+bwd LSTM recurrence with streaming output projection.

    Lane layouts:
      state h, c : (B, 2H)  = [fwd | bwd]; fwd is at time s, bwd at time S-1-s.
      gates g    : (B, 8H)  = [i_f,i_b, f_f,f_b, g_f,g_b, o_f,o_b], each H wide.
    get_xgate(s): (B, 8H) precomputed x @ W_ih (+ b_ih + b_hh) for step s.
    whh_blk     : (2H, 8H) block-diagonal recurrent weights in the same layout.
    wout_ref    : (S, 2H, OUT) per-step slices of the flattened output proj.
    Returns acc + flatten(bi-LSTM output) @ W_out   (PyTorch flatten layout).
    """
    h = jnp.zeros((B, 2 * H), jnp.float32)
    c = jnp.zeros((B, 2 * H), jnp.float32)
    for s in range(S):
        # Single recurrence matmul per step (both directions at once).
        g = get_xgate(s) + jnp.dot(h, whh_blk,
                                   preferred_element_type=jnp.float32)
        # Full-vreg activations, slice afterwards.
        sig = jax.nn.sigmoid(g)
        th = jnp.tanh(g)
        i_g = sig[:, 0:2 * H]
        f_g = sig[:, 2 * H:4 * H]
        g_g = th[:, 4 * H:6 * H]
        o_g = sig[:, 6 * H:8 * H]
        c = f_g * c + i_g * g_g
        h = o_g * jnp.tanh(c)
        # Streaming output projection (off the recurrence critical path).
        acc = acc + jnp.dot(h, wout_ref[s],
                            preferred_element_type=jnp.float32)
    return acc


# --------------------------------- the kernel --------------------------------
def cvae_forward_kernel(
    # data inputs
    x2_ref, c_ref, eps_ref,
    # encoder LSTM (packed) + latent linears (padded)
    e_wih_blk, e_whh_blk, e_b_blk, e_wout,
    lat_wc, lat_b, stats_w, stats_b,
    # decoder
    dlin_w, dlin_b,
    d_wih_blk, d_whh_blk, d_b_blk, d_wout,
    fin_wc, fin_b,
    # outputs (lane-dense, padded)
    dec_ref, zmean_ref, zlstd_ref,
):
    B = c_ref.shape[0]
    H = e_whh_blk.shape[0] // 2
    S = e_wout.shape[0]
    EP = zmean_ref.shape[1]
    cond = c_ref[...]                                      # (B, COND_P)

    # ---- encoder: hoisted input projection, one matmul for all steps/dirs ----
    # x2 rows are ordered s-major: row s*B + b = [x(b, s) | x(b, S-1-s)] (padded).
    xg_enc = (jnp.dot(x2_ref[...], e_wih_blk[...],
                      preferred_element_type=jnp.float32)
              + e_b_blk[...])                              # (S*B, 8H)

    # latent_linear = Linear(cat(flatten(enc), c)) realized as streaming accum.
    acc = (jnp.dot(cond, lat_wc[...], preferred_element_type=jnp.float32)
           + lat_b[...])                                   # (B, LIN_P)
    acc = _fused_bilstm_accumulate(
        lambda s: xg_enc[s * B:(s + 1) * B, :],
        e_whh_blk[...], e_wout, acc, B, H, S)
    hid = jnp.maximum(acc, 0.0)                            # ReLU; dropout = id

    # latent_mean and latent_log_std as one fused 256-lane matmul.
    stats = (jnp.dot(hid, stats_w[...], preferred_element_type=jnp.float32)
             + stats_b[...])                               # (B, 2*EMB_P)
    z_mean = stats[:, 0:EP]
    z_log_std = stats[:, EP:2 * EP]

    # ---- reparametrize: z = mu + exp(log_std) * eps (Normal.rsample) ----
    z = z_mean + jnp.exp(z_log_std) * eps_ref[...]

    # ---- decoder ----
    dh = jnp.maximum(
        jnp.dot(z, dlin_w[...], preferred_element_type=jnp.float32)
        + dlin_b[...], 0.0)                                # (B, EMB_P)
    # Decoder input is constant over time: one input-gate matmul, reused.
    xg_dec = (jnp.dot(dh, d_wih_blk[...], preferred_element_type=jnp.float32)
              + d_b_blk[...])                              # (B, 8H)

    acc_d = (jnp.dot(cond, fin_wc[...], preferred_element_type=jnp.float32)
             + fin_b[...])                                 # (B, OUT_P)
    acc_d = _fused_bilstm_accumulate(
        lambda s: xg_dec, d_whh_blk[...], d_wout, acc_d, B, H, S)

    dec_ref[...] = acc_d
    zmean_ref[...] = z_mean
    zlstd_ref[...] = z_log_std


# ------------------------- wrapper-side weight packing ------------------------
def _interleave_gates(w_f, w_b, hid):
    """(*,4H) fwd/bwd (gate order i,f,g,o) -> (*,8H) [i_f,i_b,f_f,f_b,...]."""
    cols = []
    for k in range(4):
        cols.append(w_f[:, k * hid:(k + 1) * hid])
        cols.append(w_b[:, k * hid:(k + 1) * hid])
    return jnp.concatenate(cols, axis=-1)


def _block_interleave(w_f, w_b, hid):
    """Block-diagonal gate-interleaved weight: (rows_f+rows_b, 8H)."""
    rf, rb = w_f.shape[0], w_b.shape[0]
    zf = jnp.zeros((rf, hid), w_f.dtype)
    zb = jnp.zeros((rb, hid), w_b.dtype)
    cols = []
    for k in range(4):
        cols.append(jnp.concatenate([w_f[:, k * hid:(k + 1) * hid], zb], axis=0))
        cols.append(jnp.concatenate([zf, w_b[:, k * hid:(k + 1) * hid]], axis=0))
    return jnp.concatenate(cols, axis=-1)


def _out_proj_steps(w, hid, seq, out_pad):
    """Pre-slice a (seq*2H, out) flatten-projection into per-fused-step pieces.

    Step s pairs the forward hidden at time s with the backward hidden at time
    seq-1-s, so W_step[s] = [w rows for h_f(s) ; w rows for h_b(seq-1-s)].
    Output is zero-padded to out_pad lanes: (seq, 2H, out_pad)."""
    out = w.shape[1]
    steps = []
    for s in range(seq):
        wf = w[2 * hid * s: 2 * hid * s + hid, :]
        tb = seq - 1 - s
        wb = w[2 * hid * tb + hid: 2 * hid * (tb + 1), :]
        steps.append(jnp.concatenate([wf, wb], axis=0))
    stacked = jnp.stack(steps, axis=0)
    return jnp.pad(stacked, ((0, 0), (0, 0), (0, out_pad - out)))


def _pad2(w, rows, cols):
    return jnp.pad(w, ((0, rows - w.shape[0]), (0, cols - w.shape[1])))


def pack_params(p):
    """Raw (PyTorch-layout) params -> kernel-layout params (all lane-padded)."""
    H = HID
    stats_w = jnp.concatenate(
        [_pad2(p['mean_w'], LIN_P, EMB_P), _pad2(p['lstd_w'], LIN_P, EMB_P)],
        axis=-1)                                                  # (128, 256)
    stats_b = jnp.concatenate(
        [_pad2(p['mean_b'], 1, EMB_P), _pad2(p['lstd_b'], 1, EMB_P)], axis=-1)
    return (
        # encoder LSTM
        _pad2(_block_interleave(p['e_wih_f'], p['e_wih_b'], H), XIN_P, 8 * H),
        _block_interleave(p['e_whh_f'], p['e_whh_b'], H),          # (2H, 8H)
        _interleave_gates(p['e_b_f'], p['e_b_b'], H),              # (1, 8H)
        _out_proj_steps(p['lat_wh'], H, SEQ_LEN, LIN_P),           # (S, 2H, 128)
        # latent linears (lane-padded)
        _pad2(p['lat_wc'], COND_P, LIN_P), _pad2(p['lat_b'], 1, LIN_P),
        stats_w, stats_b,
        # decoder
        _pad2(p['dlin_w'], EMB_P, EMB_P), _pad2(p['dlin_b'], 1, EMB_P),
        _pad2(_interleave_gates(p['d_wih_f'], p['d_wih_b'], H), EMB_P, 8 * H),
        _block_interleave(p['d_whh_f'], p['d_whh_b'], H),          # (2H, 8H)
        _interleave_gates(p['d_b_f'], p['d_b_b'], H),              # (1, 8H)
        _out_proj_steps(p['fin_wh'], H, SEQ_LEN, OUT_P),           # (S, 2H, 128)
        _pad2(p['fin_wc'], COND_P, OUT_P), _pad2(p['fin_b'], 1, OUT_P),
    )


# --------------------------------- wrapper ------------------------------------
@jax.jit
def cvae_forward(x_idx, c, eps, packed):
    """x_idx: (B, S) int32 in [0, N_CHARS); c: (B, COND); eps: (B, EMB)."""
    B = x_idx.shape[0]
    BP = ((B + 7) // 8) * 8                     # sublane-dense padded batch
    pad_b = BP - B

    x_idx_p = jnp.pad(x_idx, ((0, pad_b), (0, 0)))
    c_p = jnp.pad(c, ((0, pad_b), (0, COND_P - COND)))
    eps_p = jnp.pad(eps, ((0, pad_b), (0, EMB_P - EMB)))

    x1h = jax.nn.one_hot(x_idx_p, N_CHARS, dtype=jnp.float32)    # (BP, S, C) glue
    # Pair fwd time s with bwd time S-1-s; rows ordered s-major -> (S*BP, 2C).
    x2 = jnp.concatenate([x1h, x1h[:, ::-1, :]], axis=-1)
    x2 = jnp.transpose(x2, (1, 0, 2)).reshape(SEQ_LEN * BP, 2 * N_CHARS)
    x2 = jnp.pad(x2, ((0, 0), (0, XIN_P - 2 * N_CHARS)))

    inputs = (x2, c_p, eps_p) + tuple(packed)
    vmem = pl.BlockSpec(memory_space=pltpu.MemorySpace.VMEM)
    out_shapes = (
        jax.ShapeDtypeStruct((BP, OUT_P), jnp.float32),
        jax.ShapeDtypeStruct((BP, EMB_P), jnp.float32),
        jax.ShapeDtypeStruct((BP, EMB_P), jnp.float32),
    )
    dec_p, zm_p, zl_p = pl.pallas_call(
        cvae_forward_kernel,
        out_shape=out_shapes,
        in_specs=[vmem] * len(inputs),
        out_specs=(vmem, vmem, vmem),
    )(*inputs)
    # Slice away lane/sublane padding; .view(-1, seq_len, n_chars) reshape glue.
    dec = dec_p[:B, :OUT_DIM].reshape(B, SEQ_LEN, N_CHARS)
    return dec, zm_p[:B, :EMB], zl_p[:B, :EMB]


# --------------------------- params & pure-JAX reference ----------------------
def init_raw_params(key):
    """Deterministic xavier-normal-style init in natural (in,out) layout;
    LSTM biases combine b_ih + b_hh; gate order (i, f, g, o) like PyTorch."""
    keys = iter(jax.random.split(key, 64))

    def xavier(shape):
        std = (2.0 / (shape[0] + shape[1])) ** 0.5
        return jax.random.normal(next(keys), shape, jnp.float32) * std

    def bias(n):
        return jax.random.normal(next(keys), (1, n), jnp.float32) * 0.01

    H4 = 4 * HID
    flat = 2 * HID * SEQ_LEN
    return dict(
        e_wih_f=xavier((N_CHARS, H4)), e_whh_f=xavier((HID, H4)), e_b_f=bias(H4),
        e_wih_b=xavier((N_CHARS, H4)), e_whh_b=xavier((HID, H4)), e_b_b=bias(H4),
        lat_wh=xavier((flat, LIN)), lat_wc=xavier((COND, LIN)), lat_b=bias(LIN),
        mean_w=xavier((LIN, EMB)), mean_b=bias(EMB),
        lstd_w=xavier((LIN, EMB)), lstd_b=bias(EMB),
        dlin_w=xavier((EMB, EMB)), dlin_b=bias(EMB),
        d_wih_f=xavier((EMB, H4)), d_whh_f=xavier((HID, H4)), d_b_f=bias(H4),
        d_wih_b=xavier((EMB, H4)), d_whh_b=xavier((HID, H4)), d_b_b=bias(H4),
        fin_wh=xavier((flat, OUT_DIM)), fin_wc=xavier((COND, OUT_DIM)),
        fin_b=bias(OUT_DIM),
    )


def _lstm_ref(x, wih, whh, b, hid, reverse):
    B, S, _ = x.shape
    h = jnp.zeros((B, hid), jnp.float32)
    c = jnp.zeros((B, hid), jnp.float32)
    hs = [None] * S
    order = range(S - 1, -1, -1) if reverse else range(S)
    for t in order:
        g = x[:, t, :] @ wih + h @ whh + b
        i = jax.nn.sigmoid(g[:, :hid])
        f = jax.nn.sigmoid(g[:, hid:2 * hid])
        gg = jnp.tanh(g[:, 2 * hid:3 * hid])
        o = jax.nn.sigmoid(g[:, 3 * hid:])
        c = f * c + i * gg
        h = o * jnp.tanh(c)
        hs[t] = h
    return hs


def cvae_reference(x_idx, c, eps, p):
    """Straightforward pure-JAX forward (natural layout) for validation."""
    B = x_idx.shape[0]
    x1h = jax.nn.one_hot(x_idx, N_CHARS, dtype=jnp.float32)
    hf = _lstm_ref(x1h, p['e_wih_f'], p['e_whh_f'], p['e_b_f'], HID, False)
    hb = _lstm_ref(x1h, p['e_wih_b'], p['e_whh_b'], p['e_b_b'], HID, True)
    flat = jnp.concatenate(
        [jnp.concatenate([hf[t], hb[t]], 1) for t in range(SEQ_LEN)], 1)
    hid = jax.nn.relu(flat @ p['lat_wh'] + c @ p['lat_wc'] + p['lat_b'])
    z_mean = hid @ p['mean_w'] + p['mean_b']
    z_log_std = hid @ p['lstd_w'] + p['lstd_b']
    z = z_mean + jnp.exp(z_log_std) * eps
    dh = jax.nn.relu(z @ p['dlin_w'] + p['dlin_b'])
    x_dec = jnp.broadcast_to(dh[:, None, :], (B, SEQ_LEN, EMB))
    hf = _lstm_ref(x_dec, p['d_wih_f'], p['d_whh_f'], p['d_b_f'], HID, False)
    hb = _lstm_ref(x_dec, p['d_wih_b'], p['d_whh_b'], p['d_b_b'], HID, True)
    flat_d = jnp.concatenate(
        [jnp.concatenate([hf[t], hb[t]], 1) for t in range(SEQ_LEN)], 1)
    out = flat_d @ p['fin_wh'] + c @ p['fin_wc'] + p['fin_b']
    return out.reshape(B, SEQ_LEN, N_CHARS), z_mean, z_log_std


if __name__ == "__main__":
    key = jax.random.PRNGKey(0)
    kx, kc, ke, kp = jax.random.split(key, 4)

    B = 4
    x_idx = jax.random.randint(kx, (B, SEQ_LEN), 0, N_CHARS, dtype=jnp.int32)
    c = jax.random.normal(kc, (B, COND), jnp.float32)
    eps = jax.random.normal(ke, (B, EMB), jnp.float32)   # reparam noise
    raw = init_raw_params(kp)
    packed = pack_params(raw)

    dec, z_mean, z_log_std = cvae_forward(x_idx, c, eps, packed)
    jax.block_until_ready((dec, z_mean, z_log_std))

    assert dec.shape == (B, SEQ_LEN, N_CHARS)
    assert z_mean.shape == (B, EMB) and z_log_std.shape == (B, EMB)
    assert bool(jnp.isfinite(dec).all())
    assert bool(jnp.isfinite(z_mean).all()) and bool(jnp.isfinite(z_log_std).all())

    # Validate against a plain-JAX reference of the original formulation
    # (loose tolerance to absorb MXU/XLA matmul precision differences).
    dec_r, zm_r, zl_r = cvae_reference(x_idx, c, eps, raw)
    np.testing.assert_allclose(np.asarray(dec), np.asarray(dec_r),
                               rtol=2e-2, atol=2e-2)
    np.testing.assert_allclose(np.asarray(z_mean), np.asarray(zm_r),
                               rtol=2e-2, atol=2e-2)
    np.testing.assert_allclose(np.asarray(z_log_std), np.asarray(zl_r),
                               rtol=2e-2, atol=2e-2)

    print("KERNEL_OK")
</pallas_src>

<mosaic_0001>
module attributes {stable_mosaic.version = 11 : i64} {
  func.func @cvae_forward_kernel(%arg0: memref<80x128xf32, #tpu.memory_space<vmem>>, %arg1: memref<8x128xf32, #tpu.memory_space<vmem>>, %arg2: memref<8x128xf32, #tpu.memory_space<vmem>>, %arg3: memref<128x256xf32, #tpu.memory_space<vmem>>, %arg4: memref<64x256xf32, #tpu.memory_space<vmem>>, %arg5: memref<1x256xf32, #tpu.memory_space<vmem>>, %arg6: memref<10x64x128xf32, #tpu.memory_space<vmem>>, %arg7: memref<128x128xf32, #tpu.memory_space<vmem>>, %arg8: memref<1x128xf32, #tpu.memory_space<vmem>>, %arg9: memref<128x256xf32, #tpu.memory_space<vmem>>, %arg10: memref<1x256xf32, #tpu.memory_space<vmem>>, %arg11: memref<128x128xf32, #tpu.memory_space<vmem>>, %arg12: memref<1x128xf32, #tpu.memory_space<vmem>>, %arg13: memref<128x256xf32, #tpu.memory_space<vmem>>, %arg14: memref<64x256xf32, #tpu.memory_space<vmem>>, %arg15: memref<1x256xf32, #tpu.memory_space<vmem>>, %arg16: memref<10x64x128xf32, #tpu.memory_space<vmem>>, %arg17: memref<128x128xf32, #tpu.memory_space<vmem>>, %arg18: memref<1x128xf32, #tpu.memory_space<vmem>>, %arg19: memref<8x128xf32, #tpu.memory_space<vmem>>, %arg20: memref<8x128xf32, #tpu.memory_space<vmem>>, %arg21: memref<8x128xf32, #tpu.memory_space<vmem>>) attributes {dimension_semantics = [], scalar_prefetch = 0 : i64, scratch_operands = 0 : i64, tpu.core_type = #tpu.core_type<tc>} {
    %c0 = arith.constant 0 : index
    %c0_0 = arith.constant 0 : index
    %0 = vector.load %arg1[%c0, %c0_0] : memref<8x128xf32, #tpu.memory_space<vmem>>, vector<8x128xf32>
    %c0_1 = arith.constant 0 : index
    %c0_2 = arith.constant 0 : index
    %1 = vector.load %arg0[%c0_1, %c0_2] : memref<80x128xf32, #tpu.memory_space<vmem>>, vector<80x128xf32>
    %c0_3 = arith.constant 0 : index
    %c0_4 = arith.constant 0 : index
    %2 = vector.load %arg3[%c0_3, %c0_4] : memref<128x256xf32, #tpu.memory_space<vmem>>, vector<128x256xf32>
    %cst = arith.constant dense<0.000000e+00> : vector<80x256xf32>
    %3 = tpu.matmul %1, %2, %cst {dimension_numbers = #tpu.dot_dimension_numbers<[1], [0], [0], [1], [0, 0, 1, 1], [], []>} : vector<80x128xf32>, vector<128x256xf32>, vector<80x256xf32> -> vector<80x256xf32>
    %c0_5 = arith.constant 0 : index
    %c0_6 = arith.constant 0 : index
    %4 = vector.load %arg5[%c0_5, %c0_6] : memref<1x256xf32, #tpu.memory_space<vmem>>, vector<1x256xf32>
    %5 = vector.broadcast %4 : vector<1x256xf32> to vector<80x256xf32>
    %6 = arith.addf %3, %5 : vector<80x256xf32>
    %c0_7 = arith.constant 0 : index
    %c0_8 = arith.constant 0 : index
    %7 = vector.load %arg7[%c0_7, %c0_8] : memref<128x128xf32, #tpu.memory_space<vmem>>, vector<128x128xf32>
    %cst_9 = arith.constant dense<0.000000e+00> : vector<8x128xf32>
    %8 = tpu.matmul %0, %7, %cst_9 {dimension_numbers = #tpu.dot_dimension_numbers<[1], [0], [0], [1], [0, 0, 1, 1], [], []>} : vector<8x128xf32>, vector<128x128xf32>, vector<8x128xf32> -> vector<8x128xf32>
    %c0_10 = arith.constant 0 : index
    %c0_11 = arith.constant 0 : index
    %9 = vector.load %arg8[%c0_10, %c0_11] : memref<1x128xf32, #tpu.memory_space<vmem>>, vector<1x128xf32>
    %10 = vector.broadcast %9 : vector<1x128xf32> to vector<8x128xf32>
    %11 = arith.addf %8, %10 : vector<8x128xf32>
    %c0_12 = arith.constant 0 : index
    %c0_13 = arith.constant 0 : index
    %12 = vector.load %arg4[%c0_12, %c0_13] : memref<64x256xf32, #tpu.memory_space<vmem>>, vector<64x256xf32>
    %cst_14 = arith.constant 0.000000e+00 : f32
    %13 = vector.broadcast %cst_14 : f32 to vector<8x64xf32>
    %cst_15 = arith.constant 0.000000e+00 : f32
    %14 = vector.broadcast %cst_15 : f32 to vector<8x64xf32>
    %15 = vector.extract_strided_slice %6 {offsets = [0, 0], sizes = [8, 256], strides = [1, 1]} : vector<80x256xf32> to vector<8x256xf32>
    %cst_16 = arith.constant dense<0.000000e+00> : vector<8x256xf32>
    %16 = tpu.matmul %13, %12, %cst_16 {dimension_numbers = #tpu.dot_dimension_numbers<[1], [0], [0], [1], [0, 0, 1, 1], [], []>} : vector<8x64xf32>, vector<64x256xf32>, vector<8x256xf32> -> vector<8x256xf32>
    %17 = arith.addf %15, %16 : vector<8x256xf32>
    %18 = arith.negf %17 : vector<8x256xf32>
    %19 = math.exp %18 : vector<8x256xf32>
    %cst_17 = arith.constant 1.000000e+00 : f32
    %20 = vector.broadcast %cst_17 : f32 to vector<8x256xf32>
    %21 = arith.addf %20, %19 : vector<8x256xf32>
    %22 = arith.divf %20, %21 : vector<8x256xf32>
    %23 = math.tanh %17 : vector<8x256xf32>
    %24 = vector.extract_strided_slice %22 {offsets = [0, 0], sizes = [8, 64], strides = [1, 1]} : vector<8x256xf32> to vector<8x64xf32>
    %25 = vector.extract_strided_slice %22 {offsets = [0, 64], sizes = [8, 64], strides = [1, 1]} : vector<8x256xf32> to vector<8x64xf32>
    %26 = vector.extract_strided_slice %23 {offsets = [0, 128], sizes = [8, 64], strides = [1, 1]} : vector<8x256xf32> to vector<8x64xf32>
    %27 = vector.extract_strided_slice %22 {offsets = [0, 192], sizes = [8, 64], strides = [1, 1]} : vector<8x256xf32> to vector<8x64xf32>
    %28 = arith.mulf %25, %14 : vector<8x64xf32>
    %29 = arith.mulf %24, %26 : vector<8x64xf32>
    %30 = arith.addf %28, %29 : vector<8x64xf32>
    %31 = math.tanh %30 : vector<8x64xf32>
    %32 = arith.mulf %27, %31 : vector<8x64xf32>
    %c0_18 = arith.constant 0 : index
    %c0_19 = arith.constant 0 : index
    %c0_20 = arith.constant 0 : index
    %33 = vector.load %arg6[%c0_18, %c0_19, %c0_20] : memref<10x64x128xf32, #tpu.memory_space<vmem>>, vector<1x64x128xf32>
    %34 = vector.shape_cast %33 : vector<1x64x128xf32> to vector<64x128xf32>
    %cst_21 = arith.constant dense<0.000000e+00> : vector<8x128xf32>
    %35 = tpu.matmul %32, %34, %cst_21 {dimension_numbers = #tpu.dot_dimension_numbers<[1], [0], [0], [1], [0, 0, 1, 1], [], []>} : vector<8x64xf32>, vector<64x128xf32>, vector<8x128xf32> -> vector<8x128xf32>
    %36 = arith.addf %11, %35 : vector<8x128xf32>
    %37 = vector.extract_strided_slice %6 {offsets = [8, 0], sizes = [8, 256], strides = [1, 1]} : vector<80x256xf32> to vector<8x256xf32>
    %cst_22 = arith.constant dense<0.000000e+00> : vector<8x256xf32>
    %38 = tpu.matmul %32, %12, %cst_22 {dimension_numbers = #tpu.dot_dimension_numbers<[1], [0], [0], [1], [0, 0, 1, 1], [], []>} : vector<8x64xf32>, vector<64x256xf32>, vector<8x256xf32> -> vector<8x256xf32>
    %39 = arith.addf %37, %38 : vector<8x256xf32>
    %40 = arith.negf %39 : vector<8x256xf32>
    %41 = math.exp %40 : vector<8x256xf32>
    %cst_23 = arith.constant 1.000000e+00 : f32
    %42 = vector.broadcast %cst_23 : f32 to vector<8x256xf32>
    %43 = arith.addf %42, %41 : vector<8x256xf32>
    %44 = arith.divf %42, %43 : vector<8x256xf32>
    %45 = math.tanh %39 : vector<8x256xf32>
    %46 = vector.extract_strided_slice %44 {offsets = [0, 0], sizes = [8, 64], strides = [1, 1]} : vector<8x256xf32> to vector<8x64xf32>
    %47 = vector.extract_strided_slice %44 {offsets = [0, 64], sizes = [8, 64], strides = [1, 1]} : vector<8x256xf32> to vector<8x64xf32>
    %48 = vector.extract_strided_slice %45 {offsets = [0, 128], sizes = [8, 64], strides = [1, 1]} : vector<8x256xf32> to vector<8x64xf32>
    %49 = vector.extract_strided_slice %44 {offsets = [0, 192], sizes = [8, 64], strides = [1, 1]} : vector<8x256xf32> to vector<8x64xf32>
    %50 = arith.mulf %47, %30 : vector<8x64xf32>
    %51 = arith.mulf %46, %48 : vector<8x64xf32>
    %52 = arith.addf %50, %51 : vector<8x64xf32>
    %53 = math.tanh %52 : vector<8x64xf32>
    %54 = arith.mulf %49, %53 : vector<8x64xf32>
    %c1 = arith.constant 1 : index
    %c0_24 = arith.constant 0 : index
    %c0_25 = arith.constant 0 : index
    %55 = vector.load %arg6[%c1, %c0_24, %c0_25] : memref<10x64x128xf32, #tpu.memory_space<vmem>>, vector<1x64x128xf32>
    %56 = vector.shape_cast %55 : vector<1x64x128xf32> to vector<64x128xf32>
    %cst_26 = arith.constant dense<0.000000e+00> : vector<8x128xf32>
    %57 = tpu.matmul %54, %56, %cst_26 {dimension_numbers = #tpu.dot_dimension_numbers<[1], [0], [0], [1], [0, 0, 1, 1], [], []>} : vector<8x64xf32>, vector<64x128xf32>, vector<8x128xf32> -> vector<8x128xf32>
    %58 = arith.addf %36, %57 : vector<8x128xf32>
    %59 = vector.extract_strided_slice %6 {offsets = [16, 0], sizes = [8, 256], strides = [1, 1]} : vector<80x256xf32> to vector<8x256xf32>
    %cst_27 = arith.constant dense<0.000000e+00> : vector<8x256xf32>
    %60 = tpu.matmul %54, %12, %cst_27 {dimension_numbers = #tpu.dot_dimension_numbers<[1], [0], [0], [1], [0, 0, 1, 1], [], []>} : vector<8x64xf32>, vector<64x256xf32>, vector<8x256xf32> -> vector<8x256xf32>
    %61 = arith.addf %59, %60 : vector<8x256xf32>
    %62 = arith.negf %61 : vector<8x256xf32>
    %63 = math.exp %62 : vector<8x256xf32>
    %cst_28 = arith.constant 1.000000e+00 : f32
    %64 = vector.broadcast %cst_28 : f32 to vector<8x256xf32>
    %65 = arith.addf %64, %63 : vector<8x256xf32>
    %66 = arith.divf %64, %65 : vector<8x256xf32>
    %67 = math.tanh %61 : vector<8x256xf32>
    %68 = vector.extract_strided_slice %66 {offsets = [0, 0], sizes = [8, 64], strides = [1, 1]} : vector<8x256xf32> to vector<8x64xf32>
    %69 = vector.extract_strided_slice %66 {offsets = [0, 64], sizes = [8, 64], strides = [1, 1]} : vector<8x256xf32> to vector<8x64xf32>
    %70 = vector.extract_strided_slice %67 {offsets = [0, 128], sizes = [8, 64], strides = [1, 1]} : vector<8x256xf32> to vector<8x64xf32>
    %71 = vector.extract_strided_slice %66 {offsets = [0, 192], sizes = [8, 64], strides = [1, 1]} : vector<8x256xf32> to vector<8x64xf32>
    %72 = arith.mulf %69, %52 : vector<8x64xf32>
    %73 = arith.mulf %68, %70 : vector<8x64xf32>
    %74 = arith.addf %72, %73 : vector<8x64xf32>
    %75 = math.tanh %74 : vector<8x64xf32>
    %76 = arith.mulf %71, %75 : vector<8x64xf32>
    %c2 = arith.constant 2 : index
    %c0_29 = arith.constant 0 : index
    %c0_30 = arith.constant 0 : index
    %77 = vector.load %arg6[%c2, %c0_29, %c0_30] : memref<10x64x128xf32, #tpu.memory_space<vmem>>, vector<1x64x128xf32>
    %78 = vector.shape_cast %77 : vector<1x64x128xf32> to vector<64x128xf32>
    %cst_31 = arith.constant dense<0.000000e+00> : vector<8x128xf32>
    %79 = tpu.matmul %76, %78, %cst_31 {dimension_numbers = #tpu.dot_dimension_numbers<[1], [0], [0], [1], [0, 0, 1, 1], [], []>} : vector<8x64xf32>, vector<64x128xf32>, vector<8x128xf32> -> vector<8x128xf32>
    %80 = arith.addf %58, %79 : vector<8x128xf32>
    %81 = vector.extract_strided_slice %6 {offsets = [24, 0], sizes = [8, 256], strides = [1, 1]} : vector<80x256xf32> to vector<8x256xf32>
    %cst_32 = arith.constant dense<0.000000e+00> : vector<8x256xf32>
    %82 = tpu.matmul %76, %12, %cst_32 {dimension_numbers = #tpu.dot_dimension_numbers<[1], [0], [0], [1], [0, 0, 1, 1], [], []>} : vector<8x64xf32>, vector<64x256xf32>, vector<8x256xf32> -> vector<8x256xf32>
    %83 = arith.addf %81, %82 : vector<8x256xf32>
    %84 = arith.negf %83 : vector<8x256xf32>
    %85 = math.exp %84 : vector<8x256xf32>
    %cst_33 = arith.constant 1.000000e+00 : f32
    %86 = vector.broadcast %cst_33 : f32 to vector<8x256xf32>
    %87 = arith.addf %86, %85 : vector<8x256xf32>
    %88 = arith.divf %86, %87 : vector<8x256xf32>
    %89 = math.tanh %83 : vector<8x256xf32>
    %90 = vector.extract_strided_slice %88 {offsets = [0, 0], sizes = [8, 64], strides = [1, 1]} : vector<8x256xf32> to vector<8x64xf32>
    %91 = vector.extract_strided_slice %88 {offsets = [0, 64], sizes = [8, 64], strides = [1, 1]} : vector<8x256xf32> to vector<8x64xf32>
    %92 = vector.extract_strided_slice %89 {offsets = [0, 128], sizes = [8, 64], strides = [1, 1]} : vector<8x256xf32> to vector<8x64xf32>
    %93 = vector.extract_strided_slice %88 {offsets = [0, 192], sizes = [8, 64], strides = [1, 1]} : vector<8x256xf32> to vector<8x64xf32>
    %94 = arith.mulf %91, %74 : vector<8x64xf32>
    %95 = arith.mulf %90, %92 : vector<8x64xf32>
    %96 = arith.addf %94, %95 : vector<8x64xf32>
    %97 = math.tanh %96 : vector<8x64xf32>
    %98 = arith.mulf %93, %97 : vector<8x64xf32>
    %c3 = arith.constant 3 : index
    %c0_34 = arith.constant 0 : index
    %c0_35 = arith.constant 0 : index
    %99 = vector.load %arg6[%c3, %c0_34, %c0_35] : memref<10x64x128xf32, #tpu.memory_space<vmem>>, vector<1x64x128xf32>
    %100 = vector.shape_cast %99 : vector<1x64x128xf32> to vector<64x128xf32>
    %cst_36 = arith.constant dense<0.000000e+00> : vector<8x128xf32>
    %101 = tpu.matmul %98, %100, %cst_36 {dimension_numbers = #tpu.dot_dimension_numbers<[1], [0], [0], [1], [0, 0, 1, 1], [], []>} : vector<8x64xf32>, vector<64x128xf32>, vector<8x128xf32> -> vector<8x128xf32>
    %102 = arith.addf %80, %101 : vector<8x128xf32>
    %103 = vector.extract_strided_slice %6 {offsets = [32, 0], sizes = [8, 256], strides = [1, 1]} : vector<80x256xf32> to vector<8x256xf32>
    %cst_37 = arith.constant dense<0.000000e+00> : vector<8x256xf32>
    %104 = tpu.matmul %98, %12, %cst_37 {dimension_numbers = #tpu.dot_dimension_numbers<[1], [0], [0], [1], [0, 0, 1, 1], [], []>} : vector<8x64xf32>, vector<64x256xf32>, vector<8x256xf32> -> vector<8x256xf32>
    %105 = arith.addf %103, %104 : vector<8x256xf32>
    %106 = arith.negf %105 : vector<8x256xf32>
    %107 = math.exp %106 : vector<8x256xf32>
    %cst_38 = arith.constant 1.000000e+00 : f32
    %108 = vector.broadcast %cst_38 : f32 to vector<8x256xf32>
    %109 = arith.addf %108, %107 : vector<8x256xf32>
    %110 = arith.divf %108, %109 : vector<8x256xf32>
    %111 = math.tanh %105 : vector<8x256xf32>
    %112 = vector.extract_strided_slice %110 {offsets = [0, 0], sizes = [8, 64], strides = [1, 1]} : vector<8x256xf32> to vector<8x64xf32>
    %113 = vector.extract_strided_slice %110 {offsets = [0, 64], sizes = [8, 64], strides = [1, 1]} : vector<8x256xf32> to vector<8x64xf32>
    %114 = vector.extract_strided_slice %111 {offsets = [0, 128], sizes = [8, 64], strides = [1, 1]} : vector<8x256xf32> to vector<8x64xf32>
    %115 = vector.extract_strided_slice %110 {offsets = [0, 192], sizes = [8, 64], strides = [1, 1]} : vector<8x256xf32> to vector<8x64xf32>
    %116 = arith.mulf %113, %96 : vector<8x64xf32>
    %117 = arith.mulf %112, %114 : vector<8x64xf32>
    %118 = arith.addf %116, %117 : vector<8x64xf32>
    %119 = math.tanh %118 : vector<8x64xf32>
    %120 = arith.mulf %115, %119 : vector<8x64xf32>
    %c4 = arith.constant 4 : index
    %c0_39 = arith.constant 0 : index
    %c0_40 = arith.constant 0 : index
    %121 = vector.load %arg6[%c4, %c0_39, %c0_40] : memref<10x64x128xf32, #tpu.memory_space<vmem>>, vector<1x64x128xf32>
    %122 = vector.shape_cast %121 : vector<1x64x128xf32> to vector<64x128xf32>
    %cst_41 = arith.constant dense<0.000000e+00> : vector<8x128xf32>
    %123 = tpu.matmul %120, %122, %cst_41 {dimension_numbers = #tpu.dot_dimension_numbers<[1], [0], [0], [1], [0, 0, 1, 1], [], []>} : vector<8x64xf32>, vector<64x128xf32>, vector<8x128xf32> -> vector<8x128xf32>
    %124 = arith.addf %102, %123 : vector<8x128xf32>
    %125 = vector.extract_strided_slice %6 {offsets = [40, 0], sizes = [8, 256], strides = [1, 1]} : vector<80x256xf32> to vector<8x256xf32>
    %cst_42 = arith.constant dense<0.000000e+00> : vector<8x256xf32>
    %126 = tpu.matmul %120, %12, %cst_42 {dimension_numbers = #tpu.dot_dimension_numbers<[1], [0], [0], [1], [0, 0, 1, 1], [], []>} : vector<8x64xf32>, vector<64x256xf32>, vector<8x256xf32> -> vector<8x256xf32>
    %127 = arith.addf %125, %126 : vector<8x256xf32>
    %128 = arith.negf %127 : vector<8x256xf32>
    %129 = math.exp %128 : vector<8x256xf32>
    %cst_43 = arith.constant 1.000000e+00 : f32
    %130 = vector.broadcast %cst_43 : f32 to vector<8x256xf32>
    %131 = arith.addf %130, %129 : vector<8x256xf32>
    %132 = arith.divf %130, %131 : vector<8x256xf32>
    %133 = math.tanh %127 : vector<8x256xf32>
    %134 = vector.extract_strided_slice %132 {offsets = [0, 0], sizes = [8, 64], strides = [1, 1]} : vector<8x256xf32> to vector<8x64xf32>
    %135 = vector.extract_strided_slice %132 {offsets = [0, 64], sizes = [8, 64], strides = [1, 1]} : vector<8x256xf32> to vector<8x64xf32>
    %136 = vector.extract_strided_slice %133 {offsets = [0, 128], sizes = [8, 64], strides = [1, 1]} : vector<8x256xf32> to vector<8x64xf32>
    %137 = vector.extract_strided_slice %132 {offsets = [0, 192], sizes = [8, 64], strides = [1, 1]} : vector<8x256xf32> to vector<8x64xf32>
    %138 = arith.mulf %135, %118 : vector<8x64xf32>
    %139 = arith.mulf %134, %136 : vector<8x64xf32>
    %140 = arith.addf %138, %139 : vector<8x64xf32>
    %141 = math.tanh %140 : vector<8x64xf32>
    %142 = arith.mulf %137, %141 : vector<8x64xf32>
    %c5 = arith.constant 5 : index
    %c0_44 = arith.constant 0 : index
    %c0_45 = arith.constant 0 : index
    %143 = vector.load %arg6[%c5, %c0_44, %c0_45] : memref<10x64x128xf32, #tpu.memory_space<vmem>>, vector<1x64x128xf32>
    %144 = vector.shape_cast %143 : vector<1x64x128xf32> to vector<64x128xf32>
    %cst_46 = arith.constant dense<0.000000e+00> : vector<8x128xf32>
    %145 = tpu.matmul %142, %144, %cst_46 {dimension_numbers = #tpu.dot_dimension_numbers<[1], [0], [0], [1], [0, 0, 1, 1], [], []>} : vector<8x64xf32>, vector<64x128xf32>, vector<8x128xf32> -> vector<8x128xf32>
    %146 = arith.addf %124, %145 : vector<8x128xf32>
    %147 = vector.extract_strided_slice %6 {offsets = [48, 0], sizes = [8, 256], strides = [1, 1]} : vector<80x256xf32> to vector<8x256xf32>
    %cst_47 = arith.constant dense<0.000000e+00> : vector<8x256xf32>
    %148 = tpu.matmul %142, %12, %cst_47 {dimension_numbers = #tpu.dot_dimension_numbers<[1], [0], [0], [1], [0, 0, 1, 1], [], []>} : vector<8x64xf32>, vector<64x256xf32>, vector<8x256xf32> -> vector<8x256xf32>
    %149 = arith.addf %147, %148 : vector<8x256xf32>
    %150 = arith.negf %149 : vector<8x256xf32>
    %151 = math.exp %150 : vector<8x256xf32>
    %cst_48 = arith.constant 1.000000e+00 : f32
    %152 = vector.broadcast %cst_48 : f32 to vector<8x256xf32>
    %153 = arith.addf %152, %151 : vector<8x256xf32>
    %154 = arith.divf %152, %153 : vector<8x256xf32>
    %155 = math.tanh %149 : vector<8x256xf32>
    %156 = vector.extract_strided_slice %154 {offsets = [0, 0], sizes = [8, 64], strides = [1, 1]} : vector<8x256xf32> to vector<8x64xf32>
    %157 = vector.extract_strided_slice %154 {offsets = [0, 64], sizes = [8, 64], strides = [1, 1]} : vector<8x256xf32> to vector<8x64xf32>
    %158 = vector.extract_strided_slice %155 {offsets = [0, 128], sizes = [8, 64], strides = [1, 1]} : vector<8x256xf32> to vector<8x64xf32>
    %159 = vector.extract_strided_slice %154 {offsets = [0, 192], sizes = [8, 64], strides = [1, 1]} : vector<8x256xf32> to vector<8x64xf32>
    %160 = arith.mulf %157, %140 : vector<8x64xf32>
    %161 = arith.mulf %156, %158 : vector<8x64xf32>
    %162 = arith.addf %160, %161 : vector<8x64xf32>
    %163 = math.tanh %162 : vector<8x64xf32>
    %164 = arith.mulf %159, %163 : vector<8x64xf32>
    %c6 = arith.constant 6 : index
    %c0_49 = arith.constant 0 : index
    %c0_50 = arith.constant 0 : index
    %165 = vector.load %arg6[%c6, %c0_49, %c0_50] : memref<10x64x128xf32, #tpu.memory_space<vmem>>, vector<1x64x128xf32>
    %166 = vector.shape_cast %165 : vector<1x64x128xf32> to vector<64x128xf32>
    %cst_51 = arith.constant dense<0.000000e+00> : vector<8x128xf32>
    %167 = tpu.matmul %164, %166, %cst_51 {dimension_numbers = #tpu.dot_dimension_numbers<[1], [0], [0], [1], [0, 0, 1, 1], [], []>} : vector<8x64xf32>, vector<64x128xf32>, vector<8x128xf32> -> vector<8x128xf32>
    %168 = arith.addf %146, %167 : vector<8x128xf32>
    %169 = vector.extract_strided_slice %6 {offsets = [56, 0], sizes = [8, 256], strides = [1, 1]} : vector<80x256xf32> to vector<8x256xf32>
    %cst_52 = arith.constant dense<0.000000e+00> : vector<8x256xf32>
    %170 = tpu.matmul %164, %12, %cst_52 {dimension_numbers = #tpu.dot_dimension_numbers<[1], [0], [0], [1], [0, 0, 1, 1], [], []>} : vector<8x64xf32>, vector<64x256xf32>, vector<8x256xf32> -> vector<8x256xf32>
    %171 = arith.addf %169, %170 : vector<8x256xf32>
    %172 = arith.negf %171 : vector<8x256xf32>
    %173 = math.exp %172 : vector<8x256xf32>
    %cst_53 = arith.constant 1.000000e+00 : f32
    %174 = vector.broadcast %cst_53 : f32 to vector<8x256xf32>
    %175 = arith.addf %174, %173 : vector<8x256xf32>
    %176 = arith.divf %174, %175 : vector<8x256xf32>
    %177 = math.tanh %171 : vector<8x256xf32>
    %178 = vector.extract_strided_slice %176 {offsets = [0, 0], sizes = [8, 64], strides = [1, 1]} : vector<8x256xf32> to vector<8x64xf32>
    %179 = vector.extract_strided_slice %176 {offsets = [0, 64], sizes = [8, 64], strides = [1, 1]} : vector<8x256xf32> to vector<8x64xf32>
    %180 = vector.extract_strided_slice %177 {offsets = [0, 128], sizes = [8, 64], strides = [1, 1]} : vector<8x256xf32> to vector<8x64xf32>
    %181 = vector.extract_strided_slice %176 {offsets = [0, 192], sizes = [8, 64], strides = [1, 1]} : vector<8x256xf32> to vector<8x64xf32>
    %182 = arith.mulf %179, %162 : vector<8x64xf32>
    %183 = arith.mulf %178, %180 : vector<8x64xf32>
    %184 = arith.addf %182, %183 : vector<8x64xf32>
    %185 = math.tanh %184 : vector<8x64xf32>
    %186 = arith.mulf %181, %185 : vector<8x64xf32>
    %c7 = arith.constant 7 : index
    %c0_54 = arith.constant 0 : index
    %c0_55 = arith.constant 0 : index
    %187 = vector.load %arg6[%c7, %c0_54, %c0_55] : memref<10x64x128xf32, #tpu.memory_space<vmem>>, vector<1x64x128xf32>
    %188 = vector.shape_cast %187 : vector<1x64x128xf32> to vector<64x128xf32>
    %cst_56 = arith.constant dense<0.000000e+00> : vector<8x128xf32>
    %189 = tpu.matmul %186, %188, %cst_56 {dimension_numbers = #tpu.dot_dimension_numbers<[1], [0], [0], [1], [0, 0, 1, 1], [], []>} : vector<8x64xf32>, vector<64x128xf32>, vector<8x128xf32> -> vector<8x128xf32>
    %190 = arith.addf %168, %189 : vector<8x128xf32>
    %191 = vector.extract_strided_slice %6 {offsets = [64, 0], sizes = [8, 256], strides = [1, 1]} : vector<80x256xf32> to vector<8x256xf32>
    %cst_57 = arith.constant dense<0.000000e+00> : vector<8x256xf32>
    %192 = tpu.matmul %186, %12, %cst_57 {dimension_numbers = #tpu.dot_dimension_numbers<[1], [0], [0], [1], [0, 0, 1, 1], [], []>} : vector<8x64xf32>, vector<64x256xf32>, vector<8x256xf32> -> vector<8x256xf32>
    %193 = arith.addf %191, %192 : vector<8x256xf32>
    %194 = arith.negf %193 : vector<8x256xf32>
    %195 = math.exp %194 : vector<8x256xf32>
    %cst_58 = arith.constant 1.000000e+00 : f32
    %196 = vector.broadcast %cst_58 : f32 to vector<8x256xf32>
    %197 = arith.addf %196, %195 : vector<8x256xf32>
    %198 = arith.divf %196, %197 : vector<8x256xf32>
    %199 = math.tanh %193 : vector<8x256xf32>
    %200 = vector.extract_strided_slice %198 {offsets = [0, 0], sizes = [8, 64], strides = [1, 1]} : vector<8x256xf32> to vector<8x64xf32>
    %201 = vector.extract_strided_slice %198 {offsets = [0, 64], sizes = [8, 64], strides = [1, 1]} : vector<8x256xf32> to vector<8x64xf32>
    %202 = vector.extract_strided_slice %199 {offsets = [0, 128], sizes = [8, 64], strides = [1, 1]} : vector<8x256xf32> to vector<8x64xf32>
    %203 = vector.extract_strided_slice %198 {offsets = [0, 192], sizes = [8, 64], strides = [1, 1]} : vector<8x256xf32> to vector<8x64xf32>
    %204 = arith.mulf %201, %184 : vector<8x64xf32>
    %205 = arith.mulf %200, %202 : vector<8x64xf32>
    %206 = arith.addf %204, %205 : vector<8x64xf32>
    %207 = math.tanh %206 : vector<8x64xf32>
    %208 = arith.mulf %203, %207 : vector<8x64xf32>
    %c8 = arith.constant 8 : index
    %c0_59 = arith.constant 0 : index
    %c0_60 = arith.constant 0 : index
    %209 = vector.load %arg6[%c8, %c0_59, %c0_60] : memref<10x64x128xf32, #tpu.memory_space<vmem>>, vector<1x64x128xf32>
    %210 = vector.shape_cast %209 : vector<1x64x128xf32> to vector<64x128xf32>
    %cst_61 = arith.constant dense<0.000000e+00> : vector<8x128xf32>
    %211 = tpu.matmul %208, %210, %cst_61 {dimension_numbers = #tpu.dot_dimension_numbers<[1], [0], [0], [1], [0, 0, 1, 1], [], []>} : vector<8x64xf32>, vector<64x128xf32>, vector<8x128xf32> -> vector<8x128xf32>
    %212 = arith.addf %190, %211 : vector<8x128xf32>
    %213 = vector.extract_strided_slice %6 {offsets = [72, 0], sizes = [8, 256], strides = [1, 1]} : vector<80x256xf32> to vector<8x256xf32>
    %cst_62 = arith.constant dense<0.000000e+00> : vector<8x256xf32>
    %214 = tpu.matmul %208, %12, %cst_62 {dimension_numbers = #tpu.dot_dimension_numbers<[1], [0], [0], [1], [0, 0, 1, 1], [], []>} : vector<8x64xf32>, vector<64x256xf32>, vector<8x256xf32> -> vector<8x256xf32>
    %215 = arith.addf %213, %214 : vector<8x256xf32>
    %216 = arith.negf %215 : vector<8x256xf32>
    %217 = math.exp %216 : vector<8x256xf32>
    %cst_63 = arith.constant 1.000000e+00 : f32
    %218 = vector.broadcast %cst_63 : f32 to vector<8x256xf32>
    %219 = arith.addf %218, %217 : vector<8x256xf32>
    %220 = arith.divf %218, %219 : vector<8x256xf32>
    %221 = math.tanh %215 : vector<8x256xf32>
    %222 = vector.extract_strided_slice %220 {offsets = [0, 0], sizes = [8, 64], strides = [1, 1]} : vector<8x256xf32> to vector<8x64xf32>
    %223 = vector.extract_strided_slice %220 {offsets = [0, 64], sizes = [8, 64], strides = [1, 1]} : vector<8x256xf32> to vector<8x64xf32>
    %224 = vector.extract_strided_slice %221 {offsets = [0, 128], sizes = [8, 64], strides = [1, 1]} : vector<8x256xf32> to vector<8x64xf32>
    %225 = vector.extract_strided_slice %220 {offsets = [0, 192], sizes = [8, 64], strides = [1, 1]} : vector<8x256xf32> to vector<8x64xf32>
    %226 = arith.mulf %223, %206 : vector<8x64xf32>
    %227 = arith.mulf %222, %224 : vector<8x64xf32>
    %228 = arith.addf %226, %227 : vector<8x64xf32>
    %229 = math.tanh %228 : vector<8x64xf32>
    %230 = arith.mulf %225, %229 : vector<8x64xf32>
    %c9 = arith.constant 9 : index
    %c0_64 = arith.constant 0 : index
    %c0_65 = arith.constant 0 : index
    %231 = vector.load %arg6[%c9, %c0_64, %c0_65] : memref<10x64x128xf32, #tpu.memory_space<vmem>>, vector<1x64x128xf32>
    %232 = vector.shape_cast %231 : vector<1x64x128xf32> to vector<64x128xf32>
    %cst_66 = arith.constant dense<0.000000e+00> : vector<8x128xf32>
    %233 = tpu.matmul %230, %232, %cst_66 {dimension_numbers = #tpu.dot_dimension_numbers<[1], [0], [0], [1], [0, 0, 1, 1], [], []>} : vector<8x64xf32>, vector<64x128xf32>, vector<8x128xf32> -> vector<8x128xf32>
    %234 = arith.addf %212, %233 : vector<8x128xf32>
    %cst_67 = arith.constant 0.000000e+00 : f32
    %235 = vector.broadcast %cst_67 : f32 to vector<8x128xf32>
    %236 = arith.maximumf %234, %235 : vector<8x128xf32>
    %c0_68 = arith.constant 0 : index
    %c0_69 = arith.constant 0 : index
    %237 = vector.load %arg9[%c0_68, %c0_69] : memref<128x256xf32, #tpu.memory_space<vmem>>, vector<128x256xf32>
    %cst_70 = arith.constant dense<0.000000e+00> : vector<8x256xf32>
    %238 = tpu.matmul %236, %237, %cst_70 {dimension_numbers = #tpu.dot_dimension_numbers<[1], [0], [0], [1], [0, 0, 1, 1], [], []>} : vector<8x128xf32>, vector<128x256xf32>, vector<8x256xf32> -> vector<8x256xf32>
    %c0_71 = arith.constant 0 : index
    %c0_72 = arith.constant 0 : index
    %239 = vector.load %arg10[%c0_71, %c0_72] : memref<1x256xf32, #tpu.memory_space<vmem>>, vector<1x256xf32>
    %240 = vector.broadcast %239 : vector<1x256xf32> to vector<8x256xf32>
    %241 = arith.addf %238, %240 : vector<8x256xf32>
    %242 = vector.extract_strided_slice %241 {offsets = [0, 0], sizes = [8, 128], strides = [1, 1]} : vector<8x256xf32> to vector<8x128xf32>
    %243 = vector.extract_strided_slice %241 {offsets = [0, 128], sizes = [8, 128], strides = [1, 1]} : vector<8x256xf32> to vector<8x128xf32>
    %244 = math.exp %243 : vector<8x128xf32>
    %c0_73 = arith.constant 0 : index
    %c0_74 = arith.constant 0 : index
    %245 = vector.load %arg2[%c0_73, %c0_74] : memref<8x128xf32, #tpu.memory_space<vmem>>, vector<8x128xf32>
    %246 = arith.mulf %244, %245 : vector<8x128xf32>
    %247 = arith.addf %242, %246 : vector<8x128xf32>
    %c0_75 = arith.constant 0 : index
    %c0_76 = arith.constant 0 : index
    %248 = vector.load %arg11[%c0_75, %c0_76] : memref<128x128xf32, #tpu.memory_space<vmem>>, vector<128x128xf32>
    %cst_77 = arith.constant dense<0.000000e+00> : vector<8x128xf32>
    %249 = tpu.matmul %247, %248, %cst_77 {dimension_numbers = #tpu.dot_dimension_numbers<[1], [0], [0], [1], [0, 0, 1, 1], [], []>} : vector<8x128xf32>, vector<128x128xf32>, vector<8x128xf32> -> vector<8x128xf32>
    %c0_78 = arith.constant 0 : index
    %c0_79 = arith.constant 0 : index
    %250 = vector.load %arg12[%c0_78, %c0_79] : memref<1x128xf32, #tpu.memory_space<vmem>>, vector<1x128xf32>
    %251 = vector.broadcast %250 : vector<1x128xf32> to vector<8x128xf32>
    %252 = arith.addf %249, %251 : vector<8x128xf32>
    %cst_80 = arith.constant 0.000000e+00 : f32
    %253 = vector.broadcast %cst_80 : f32 to vector<8x128xf32>
    %254 = arith.maximumf %252, %253 : vector<8x128xf32>
    %c0_81 = arith.constant 0 : index
    %c0_82 = arith.constant 0 : index
    %255 = vector.load %arg13[%c0_81, %c0_82] : memref<128x256xf32, #tpu.memory_space<vmem>>, vector<128x256xf32>
    %cst_83 = arith.constant dense<0.000000e+00> : vector<8x256xf32>
    %256 = tpu.matmul %254, %255, %cst_83 {dimension_numbers = #tpu.dot_dimension_numbers<[1], [0], [0], [1], [0, 0, 1, 1], [], []>} : vector<8x128xf32>, vector<128x256xf32>, vector<8x256xf32> -> vector<8x256xf32>
    %c0_84 = arith.constant 0 : index
    %c0_85 = arith.constant 0 : index
    %257 = vector.load %arg15[%c0_84, %c0_85] : memref<1x256xf32, #tpu.memory_space<vmem>>, vector<1x256xf32>
    %258 = vector.broadcast %257 : vector<1x256xf32> to vector<8x256xf32>
    %259 = arith.addf %256, %258 : vector<8x256xf32>
    %c0_86 = arith.constant 0 : index
    %c0_87 = arith.constant 0 : index
    %260 = vector.load %arg17[%c0_86, %c0_87] : memref<128x128xf32, #tpu.memory_space<vmem>>, vector<128x128xf32>
    %cst_88 = arith.constant dense<0.000000e+00> : vector<8x128xf32>
    %261 = tpu.matmul %0, %260, %cst_88 {dimension_numbers = #tpu.dot_dimension_numbers<[1], [0], [0], [1], [0, 0, 1, 1], [], []>} : vector<8x128xf32>, vector<128x128xf32>, vector<8x128xf32> -> vector<8x128xf32>
    %c0_89 = arith.constant 0 : index
    %c0_90 = arith.constant 0 : index
    %262 = vector.load %arg18[%c0_89, %c0_90] : memref<1x128xf32, #tpu.memory_space<vmem>>, vector<1x128xf32>
    %263 = vector.broadcast %262 : vector<1x128xf32> to vector<8x128xf32>
    %264 = arith.addf %261, %263 : vector<8x128xf32>
    %c0_91 = arith.constant 0 : index
    %c0_92 = arith.constant 0 : index
    %265 = vector.load %arg14[%c0_91, %c0_92] : memref<64x256xf32, #tpu.memory_space<vmem>>, vector<64x256xf32>
    %cst_93 = arith.constant 0.000000e+00 : f32
    %266 = vector.broadcast %cst_93 : f32 to vector<8x64xf32>
    %cst_94 = arith.constant 0.000000e+00 : f32
    %267 = vector.broadcast %cst_94 : f32 to vector<8x64xf32>
    %cst_95 = arith.constant dense<0.000000e+00> : vector<8x256xf32>
    %268 = tpu.matmul %266, %265, %cst_95 {dimension_numbers = #tpu.dot_dimension_numbers<[1], [0], [0], [1], [0, 0, 1, 1], [], []>} : vector<8x64xf32>, vector<64x256xf32>, vector<8x256xf32> -> vector<8x256xf32>
    %269 = arith.addf %259, %268 : vector<8x256xf32>
    %270 = arith.negf %269 : vector<8x256xf32>
    %271 = math.exp %270 : vector<8x256xf32>
    %cst_96 = arith.constant 1.000000e+00 : f32
    %272 = vector.broadcast %cst_96 : f32 to vector<8x256xf32>
    %273 = arith.addf %272, %271 : vector<8x256xf32>
    %274 = arith.divf %272, %273 : vector<8x256xf32>
    %275 = math.tanh %269 : vector<8x256xf32>
    %276 = vector.extract_strided_slice %274 {offsets = [0, 0], sizes = [8, 64], strides = [1, 1]} : vector<8x256xf32> to vector<8x64xf32>
    %277 = vector.extract_strided_slice %274 {offsets = [0, 64], sizes = [8, 64], strides = [1, 1]} : vector<8x256xf32> to vector<8x64xf32>
    %278 = vector.extract_strided_slice %275 {offsets = [0, 128], sizes = [8, 64], strides = [1, 1]} : vector<8x256xf32> to vector<8x64xf32>
    %279 = vector.extract_strided_slice %274 {offsets = [0, 192], sizes = [8, 64], strides = [1, 1]} : vector<8x256xf32> to vector<8x64xf32>
    %280 = arith.mulf %277, %267 : vector<8x64xf32>
    %281 = arith.mulf %276, %278 : vector<8x64xf32>
    %282 = arith.addf %280, %281 : vector<8x64xf32>
    %283 = math.tanh %282 : vector<8x64xf32>
    %284 = arith.mulf %279, %283 : vector<8x64xf32>
    %c0_97 = arith.constant 0 : index
    %c0_98 = arith.constant 0 : index
    %c0_99 = arith.constant 0 : index
    %285 = vector.load %arg16[%c0_97, %c0_98, %c0_99] : memref<10x64x128xf32, #tpu.memory_space<vmem>>, vector<1x64x128xf32>
    %286 = vector.shape_cast %285 : vector<1x64x128xf32> to vector<64x128xf32>
    %cst_100 = arith.constant dense<0.000000e+00> : vector<8x128xf32>
    %287 = tpu.matmul %284, %286, %cst_100 {dimension_numbers = #tpu.dot_dimension_numbers<[1], [0], [0], [1], [0, 0, 1, 1], [], []>} : vector<8x64xf32>, vector<64x128xf32>, vector<8x128xf32> -> vector<8x128xf32>
    %288 = arith.addf %264, %287 : vector<8x128xf32>
    %cst_101 = arith.constant dense<0.000000e+00> : vector<8x256xf32>
    %289 = tpu.matmul %284, %265, %cst_101 {dimension_numbers = #tpu.dot_dimension_numbers<[1], [0], [0], [1], [0, 0, 1, 1], [], []>} : vector<8x64xf32>, vector<64x256xf32>, vector<8x256xf32> -> vector<8x256xf32>
    %290 = arith.addf %259, %289 : vector<8x256xf32>
    %291 = arith.negf %290 : vector<8x256xf32>
    %292 = math.exp %291 : vector<8x256xf32>
    %cst_102 = arith.constant 1.000000e+00 : f32
    %293 = vector.broadcast %cst_102 : f32 to vector<8x256xf32>
    %294 = arith.addf %293, %292 : vector<8x256xf32>
    %295 = arith.divf %293, %294 : vector<8x256xf32>
    %296 = math.tanh %290 : vector<8x256xf32>
    %297 = vector.extract_strided_slice %295 {offsets = [0, 0], sizes = [8, 64], strides = [1, 1]} : vector<8x256xf32> to vector<8x64xf32>
    %298 = vector.extract_strided_slice %295 {offsets = [0, 64], sizes = [8, 64], strides = [1, 1]} : vector<8x256xf32> to vector<8x64xf32>
    %299 = vector.extract_strided_slice %296 {offsets = [0, 128], sizes = [8, 64], strides = [1, 1]} : vector<8x256xf32> to vector<8x64xf32>
    %300 = vector.extract_strided_slice %295 {offsets = [0, 192], sizes = [8, 64], strides = [1, 1]} : vector<8x256xf32> to vector<8x64xf32>
    %301 = arith.mulf %298, %282 : vector<8x64xf32>
    %302 = arith.mulf %297, %299 : vector<8x64xf32>
    %303 = arith.addf %301, %302 : vector<8x64xf32>
    %304 = math.tanh %303 : vector<8x64xf32>
    %305 = arith.mulf %300, %304 : vector<8x64xf32>
    %c1_103 = arith.constant 1 : index
    %c0_104 = arith.constant 0 : index
    %c0_105 = arith.constant 0 : index
    %306 = vector.load %arg16[%c1_103, %c0_104, %c0_105] : memref<10x64x128xf32, #tpu.memory_space<vmem>>, vector<1x64x128xf32>
    %307 = vector.shape_cast %306 : vector<1x64x128xf32> to vector<64x128xf32>
    %cst_106 = arith.constant dense<0.000000e+00> : vector<8x128xf32>
    %308 = tpu.matmul %305, %307, %cst_106 {dimension_numbers = #tpu.dot_dimension_numbers<[1], [0], [0], [1], [0, 0, 1, 1], [], []>} : vector<8x64xf32>, vector<64x128xf32>, vector<8x128xf32> -> vector<8x128xf32>
    %309 = arith.addf %288, %308 : vector<8x128xf32>
    %cst_107 = arith.constant dense<0.000000e+00> : vector<8x256xf32>
    %310 = tpu.matmul %305, %265, %cst_107 {dimension_numbers = #tpu.dot_dimension_numbers<[1], [0], [0], [1], [0, 0, 1, 1], [], []>} : vector<8x64xf32>, vector<64x256xf32>, vector<8x256xf32> -> vector<8x256xf32>
    %311 = arith.addf %259, %310 : vector<8x256xf32>
    %312 = arith.negf %311 : vector<8x256xf32>
    %313 = math.exp %312 : vector<8x256xf32>
    %cst_108 = arith.constant 1.000000e+00 : f32
    %314 = vector.broadcast %cst_108 : f32 to vector<8x256xf32>
    %315 = arith.addf %314, %313 : vector<8x256xf32>
    %316 = arith.divf %314, %315 : vector<8x256xf32>
    %317 = math.tanh %311 : vector<8x256xf32>
    %318 = vector.extract_strided_slice %316 {offsets = [0, 0], sizes = [8, 64], strides = [1, 1]} : vector<8x256xf32> to vector<8x64xf32>
    %319 = vector.extract_strided_slice %316 {offsets = [0, 64], sizes = [8, 64], strides = [1, 1]} : vector<8x256xf32> to vector<8x64xf32>
    %320 = vector.extract_strided_slice %317 {offsets = [0, 128], sizes = [8, 64], strides = [1, 1]} : vector<8x256xf32> to vector<8x64xf32>
    %321 = vector.extract_strided_slice %316 {offsets = [0, 192], sizes = [8, 64], strides = [1, 1]} : vector<8x256xf32> to vector<8x64xf32>
    %322 = arith.mulf %319, %303 : vector<8x64xf32>
    %323 = arith.mulf %318, %320 : vector<8x64xf32>
    %324 = arith.addf %322, %323 : vector<8x64xf32>
    %325 = math.tanh %324 : vector<8x64xf32>
    %326 = arith.mulf %321, %325 : vector<8x64xf32>
    %c2_109 = arith.constant 2 : index
    %c0_110 = arith.constant 0 : index
    %c0_111 = arith.constant 0 : index
    %327 = vector.load %arg16[%c2_109, %c0_110, %c0_111] : memref<10x64x128xf32, #tpu.memory_space<vmem>>, vector<1x64x128xf32>
    %328 = vector.shape_cast %327 : vector<1x64x128xf32> to vector<64x128xf32>
    %cst_112 = arith.constant dense<0.000000e+00> : vector<8x128xf32>
    %329 = tpu.matmul %326, %328, %cst_112 {dimension_numbers = #tpu.dot_dimension_numbers<[1], [0], [0], [1], [0, 0, 1, 1], [], []>} : vector<8x64xf32>, vector<64x128xf32>, vector<8x128xf32> -> vector<8x128xf32>
    %330 = arith.addf %309, %329 : vector<8x128xf32>
    %cst_113 = arith.constant dense<0.000000e+00> : vector<8x256xf32>
    %331 = tpu.matmul %326, %265, %cst_113 {dimension_numbers = #tpu.dot_dimension_numbers<[1], [0], [0], [1], [0, 0, 1, 1], [], []>} : vector<8x64xf32>, vector<64x256xf32>, vector<8x256xf32> -> vector<8x256xf32>
    %332 = arith.addf %259, %331 : vector<8x256xf32>
    %333 = arith.negf %332 : vector<8x256xf32>
    %334 = math.exp %333 : vector<8x256xf32>
    %cst_114 = arith.constant 1.000000e+00 : f32
    %335 = vector.broadcast %cst_114 : f32 to vector<8x256xf32>
    %336 = arith.addf %335, %334 : vector<8x256xf32>
    %337 = arith.divf %335, %336 : vector<8x256xf32>
    %338 = math.tanh %332 : vector<8x256xf32>
    %339 = vector.extract_strided_slice %337 {offsets = [0, 0], sizes = [8, 64], strides = [1, 1]} : vector<8x256xf32> to vector<8x64xf32>
    %340 = vector.extract_strided_slice %337 {offsets = [0, 64], sizes = [8, 64], strides = [1, 1]} : vector<8x256xf32> to vector<8x64xf32>
    %341 = vector.extract_strided_slice %338 {offsets = [0, 128], sizes = [8, 64], strides = [1, 1]} : vector<8x256xf32> to vector<8x64xf32>
    %342 = vector.extract_strided_slice %337 {offsets = [0, 192], sizes = [8, 64], strides = [1, 1]} : vector<8x256xf32> to vector<8x64xf32>
    %343 = arith.mulf %340, %324 : vector<8x64xf32>
    %344 = arith.mulf %339, %341 : vector<8x64xf32>
    %345 = arith.addf %343, %344 : vector<8x64xf32>
    %346 = math.tanh %345 : vector<8x64xf32>
    %347 = arith.mulf %342, %346 : vector<8x64xf32>
    %c3_115 = arith.constant 3 : index
    %c0_116 = arith.constant 0 : index
    %c0_117 = arith.constant 0 : index
    %348 = vector.load %arg16[%c3_115, %c0_116, %c0_117] : memref<10x64x128xf32, #tpu.memory_space<vmem>>, vector<1x64x128xf32>
    %349 = vector.shape_cast %348 : vector<1x64x128xf32> to vector<64x128xf32>
    %cst_118 = arith.constant dense<0.000000e+00> : vector<8x128xf32>
    %350 = tpu.matmul %347, %349, %cst_118 {dimension_numbers = #tpu.dot_dimension_numbers<[1], [0], [0], [1], [0, 0, 1, 1], [], []>} : vector<8x64xf32>, vector<64x128xf32>, vector<8x128xf32> -> vector<8x128xf32>
    %351 = arith.addf %330, %350 : vector<8x128xf32>
    %cst_119 = arith.constant dense<0.000000e+00> : vector<8x256xf32>
    %352 = tpu.matmul %347, %265, %cst_119 {dimension_numbers = #tpu.dot_dimension_numbers<[1], [0], [0], [1], [0, 0, 1, 1], [], []>} : vector<8x64xf32>, vector<64x256xf32>, vector<8x256xf32> -> vector<8x256xf32>
    %353 = arith.addf %259, %352 : vector<8x256xf32>
    %354 = arith.negf %353 : vector<8x256xf32>
    %355 = math.exp %354 : vector<8x256xf32>
    %cst_120 = arith.constant 1.000000e+00 : f32
    %356 = vector.broadcast %cst_120 : f32 to vector<8x256xf32>
    %357 = arith.addf %356, %355 : vector<8x256xf32>
    %358 = arith.divf %356, %357 : vector<8x256xf32>
    %359 = math.tanh %353 : vector<8x256xf32>
    %360 = vector.extract_strided_slice %358 {offsets = [0, 0], sizes = [8, 64], strides = [1, 1]} : vector<8x256xf32> to vector<8x64xf32>
    %361 = vector.extract_strided_slice %358 {offsets = [0, 64], sizes = [8, 64], strides = [1, 1]} : vector<8x256xf32> to vector<8x64xf32>
    %362 = vector.extract_strided_slice %359 {offsets = [0, 128], sizes = [8, 64], strides = [1, 1]} : vector<8x256xf32> to vector<8x64xf32>
    %363 = vector.extract_strided_slice %358 {offsets = [0, 192], sizes = [8, 64], strides = [1, 1]} : vector<8x256xf32> to vector<8x64xf32>
    %364 = arith.mulf %361, %345 : vector<8x64xf32>
    %365 = arith.mulf %360, %362 : vector<8x64xf32>
    %366 = arith.addf %364, %365 : vector<8x64xf32>
    %367 = math.tanh %366 : vector<8x64xf32>
    %368 = arith.mulf %363, %367 : vector<8x64xf32>
    %c4_121 = arith.constant 4 : index
    %c0_122 = arith.constant 0 : index
    %c0_123 = arith.constant 0 : index
    %369 = vector.load %arg16[%c4_121, %c0_122, %c0_123] : memref<10x64x128xf32, #tpu.memory_space<vmem>>, vector<1x64x128xf32>
    %370 = vector.shape_cast %369 : vector<1x64x128xf32> to vector<64x128xf32>
    %cst_124 = arith.constant dense<0.000000e+00> : vector<8x128xf32>
    %371 = tpu.matmul %368, %370, %cst_124 {dimension_numbers = #tpu.dot_dimension_numbers<[1], [0], [0], [1], [0, 0, 1, 1], [], []>} : vector<8x64xf32>, vector<64x128xf32>, vector<8x128xf32> -> vector<8x128xf32>
    %372 = arith.addf %351, %371 : vector<8x128xf32>
    %cst_125 = arith.constant dense<0.000000e+00> : vector<8x256xf32>
    %373 = tpu.matmul %368, %265, %cst_125 {dimension_numbers = #tpu.dot_dimension_numbers<[1], [0], [0], [1], [0, 0, 1, 1], [], []>} : vector<8x64xf32>, vector<64x256xf32>, vector<8x256xf32> -> vector<8x256xf32>
    %374 = arith.addf %259, %373 : vector<8x256xf32>
    %375 = arith.negf %374 : vector<8x256xf32>
    %376 = math.exp %375 : vector<8x256xf32>
    %cst_126 = arith.constant 1.000000e+00 : f32
    %377 = vector.broadcast %cst_126 : f32 to vector<8x256xf32>
    %378 = arith.addf %377, %376 : vector<8x256xf32>
    %379 = arith.divf %377, %378 : vector<8x256xf32>
    %380 = math.tanh %374 : vector<8x256xf32>
    %381 = vector.extract_strided_slice %379 {offsets = [0, 0], sizes = [8, 64], strides = [1, 1]} : vector<8x256xf32> to vector<8x64xf32>
    %382 = vector.extract_strided_slice %379 {offsets = [0, 64], sizes = [8, 64], strides = [1, 1]} : vector<8x256xf32> to vector<8x64xf32>
    %383 = vector.extract_strided_slice %380 {offsets = [0, 128], sizes = [8, 64], strides = [1, 1]} : vector<8x256xf32> to vector<8x64xf32>
    %384 = vector.extract_strided_slice %379 {offsets = [0, 192], sizes = [8, 64], strides = [1, 1]} : vector<8x256xf32> to vector<8x64xf32>
    %385 = arith.mulf %382, %366 : vector<8x64xf32>
    %386 = arith.mulf %381, %383 : vector<8x64xf32>
    %387 = arith.addf %385, %386 : vector<8x64xf32>
    %388 = math.tanh %387 : vector<8x64xf32>
    %389 = arith.mulf %384, %388 : vector<8x64xf32>
    %c5_127 = arith.constant 5 : index
    %c0_128 = arith.constant 0 : index
    %c0_129 = arith.constant 0 : index
    %390 = vector.load %arg16[%c5_127, %c0_128, %c0_129] : memref<10x64x128xf32, #tpu.memory_space<vmem>>, vector<1x64x128xf32>
    %391 = vector.shape_cast %390 : vector<1x64x128xf32> to vector<64x128xf32>
    %cst_130 = arith.constant dense<0.000000e+00> : vector<8x128xf32>
    %392 = tpu.matmul %389, %391, %cst_130 {dimension_numbers = #tpu.dot_dimension_numbers<[1], [0], [0], [1], [0, 0, 1, 1], [], []>} : vector<8x64xf32>, vector<64x128xf32>, vector<8x128xf32> -> vector<8x128xf32>
    %393 = arith.addf %372, %392 : vector<8x128xf32>
    %cst_131 = arith.constant dense<0.000000e+00> : vector<8x256xf32>
    %394 = tpu.matmul %389, %265, %cst_131 {dimension_numbers = #tpu.dot_dimension_numbers<[1], [0], [0], [1], [0, 0, 1, 1], [], []>} : vector<8x64xf32>, vector<64x256xf32>, vector<8x256xf32> -> vector<8x256xf32>
    %395 = arith.addf %259, %394 : vector<8x256xf32>
    %396 = arith.negf %395 : vector<8x256xf32>
    %397 = math.exp %396 : vector<8x256xf32>
    %cst_132 = arith.constant 1.000000e+00 : f32
    %398 = vector.broadcast %cst_132 : f32 to vector<8x256xf32>
    %399 = arith.addf %398, %397 : vector<8x256xf32>
    %400 = arith.divf %398, %399 : vector<8x256xf32>
    %401 = math.tanh %395 : vector<8x256xf32>
    %402 = vector.extract_strided_slice %400 {offsets = [0, 0], sizes = [8, 64], strides = [1, 1]} : vector<8x256xf32> to vector<8x64xf32>
    %403 = vector.extract_strided_slice %400 {offsets = [0, 64], sizes = [8, 64], strides = [1, 1]} : vector<8x256xf32> to vector<8x64xf32>
    %404 = vector.extract_strided_slice %401 {offsets = [0, 128], sizes = [8, 64], strides = [1, 1]} : vector<8x256xf32> to vector<8x64xf32>
    %405 = vector.extract_strided_slice %400 {offsets = [0, 192], sizes = [8, 64], strides = [1, 1]} : vector<8x256xf32> to vector<8x64xf32>
    %406 = arith.mulf %403, %387 : vector<8x64xf32>
    %407 = arith.mulf %402, %404 : vector<8x64xf32>
    %408 = arith.addf %406, %407 : vector<8x64xf32>
    %409 = math.tanh %408 : vector<8x64xf32>
    %410 = arith.mulf %405, %409 : vector<8x64xf32>
    %c6_133 = arith.constant 6 : index
    %c0_134 = arith.constant 0 : index
    %c0_135 = arith.constant 0 : index
    %411 = vector.load %arg16[%c6_133, %c0_134, %c0_135] : memref<10x64x128xf32, #tpu.memory_space<vmem>>, vector<1x64x128xf32>
    %412 = vector.shape_cast %411 : vector<1x64x128xf32> to vector<64x128xf32>
    %cst_136 = arith.constant dense<0.000000e+00> : vector<8x128xf32>
    %413 = tpu.matmul %410, %412, %cst_136 {dimension_numbers = #tpu.dot_dimension_numbers<[1], [0], [0], [1], [0, 0, 1, 1], [], []>} : vector<8x64xf32>, vector<64x128xf32>, vector<8x128xf32> -> vector<8x128xf32>
    %414 = arith.addf %393, %413 : vector<8x128xf32>
    %cst_137 = arith.constant dense<0.000000e+00> : vector<8x256xf32>
    %415 = tpu.matmul %410, %265, %cst_137 {dimension_numbers = #tpu.dot_dimension_numbers<[1], [0], [0], [1], [0, 0, 1, 1], [], []>} : vector<8x64xf32>, vector<64x256xf32>, vector<8x256xf32> -> vector<8x256xf32>
    %416 = arith.addf %259, %415 : vector<8x256xf32>
    %417 = arith.negf %416 : vector<8x256xf32>
    %418 = math.exp %417 : vector<8x256xf32>
    %cst_138 = arith.constant 1.000000e+00 : f32
    %419 = vector.broadcast %cst_138 : f32 to vector<8x256xf32>
    %420 = arith.addf %419, %418 : vector<8x256xf32>
    %421 = arith.divf %419, %420 : vector<8x256xf32>
    %422 = math.tanh %416 : vector<8x256xf32>
    %423 = vector.extract_strided_slice %421 {offsets = [0, 0], sizes = [8, 64], strides = [1, 1]} : vector<8x256xf32> to vector<8x64xf32>
    %424 = vector.extract_strided_slice %421 {offsets = [0, 64], sizes = [8, 64], strides = [1, 1]} : vector<8x256xf32> to vector<8x64xf32>
    %425 = vector.extract_strided_slice %422 {offsets = [0, 128], sizes = [8, 64], strides = [1, 1]} : vector<8x256xf32> to vector<8x64xf32>
    %426 = vector.extract_strided_slice %421 {offsets = [0, 192], sizes = [8, 64], strides = [1, 1]} : vector<8x256xf32> to vector<8x64xf32>
    %427 = arith.mulf %424, %408 : vector<8x64xf32>
    %428 = arith.mulf %423, %425 : vector<8x64xf32>
    %429 = arith.addf %427, %428 : vector<8x64xf32>
    %430 = math.tanh %429 : vector<8x64xf32>
    %431 = arith.mulf %426, %430 : vector<8x64xf32>
    %c7_139 = arith.constant 7 : index
    %c0_140 = arith.constant 0 : index
    %c0_141 = arith.constant 0 : index
    %432 = vector.load %arg16[%c7_139, %c0_140, %c0_141] : memref<10x64x128xf32, #tpu.memory_space<vmem>>, vector<1x64x128xf32>
    %433 = vector.shape_cast %432 : vector<1x64x128xf32> to vector<64x128xf32>
    %cst_142 = arith.constant dense<0.000000e+00> : vector<8x128xf32>
    %434 = tpu.matmul %431, %433, %cst_142 {dimension_numbers = #tpu.dot_dimension_numbers<[1], [0], [0], [1], [0, 0, 1, 1], [], []>} : vector<8x64xf32>, vector<64x128xf32>, vector<8x128xf32> -> vector<8x128xf32>
    %435 = arith.addf %414, %434 : vector<8x128xf32>
    %cst_143 = arith.constant dense<0.000000e+00> : vector<8x256xf32>
    %436 = tpu.matmul %431, %265, %cst_143 {dimension_numbers = #tpu.dot_dimension_numbers<[1], [0], [0], [1], [0, 0, 1, 1], [], []>} : vector<8x64xf32>, vector<64x256xf32>, vector<8x256xf32> -> vector<8x256xf32>
    %437 = arith.addf %259, %436 : vector<8x256xf32>
    %438 = arith.negf %437 : vector<8x256xf32>
    %439 = math.exp %438 : vector<8x256xf32>
    %cst_144 = arith.constant 1.000000e+00 : f32
    %440 = vector.broadcast %cst_144 : f32 to vector<8x256xf32>
    %441 = arith.addf %440, %439 : vector<8x256xf32>
    %442 = arith.divf %440, %441 : vector<8x256xf32>
    %443 = math.tanh %437 : vector<8x256xf32>
    %444 = vector.extract_strided_slice %442 {offsets = [0, 0], sizes = [8, 64], strides = [1, 1]} : vector<8x256xf32> to vector<8x64xf32>
    %445 = vector.extract_strided_slice %442 {offsets = [0, 64], sizes = [8, 64], strides = [1, 1]} : vector<8x256xf32> to vector<8x64xf32>
    %446 = vector.extract_strided_slice %443 {offsets = [0, 128], sizes = [8, 64], strides = [1, 1]} : vector<8x256xf32> to vector<8x64xf32>
    %447 = vector.extract_strided_slice %442 {offsets = [0, 192], sizes = [8, 64], strides = [1, 1]} : vector<8x256xf32> to vector<8x64xf32>
    %448 = arith.mulf %445, %429 : vector<8x64xf32>
    %449 = arith.mulf %444, %446 : vector<8x64xf32>
    %450 = arith.addf %448, %449 : vector<8x64xf32>
    %451 = math.tanh %450 : vector<8x64xf32>
    %452 = arith.mulf %447, %451 : vector<8x64xf32>
    %c8_145 = arith.constant 8 : index
    %c0_146 = arith.constant 0 : index
    %c0_147 = arith.constant 0 : index
    %453 = vector.load %arg16[%c8_145, %c0_146, %c0_147] : memref<10x64x128xf32, #tpu.memory_space<vmem>>, vector<1x64x128xf32>
    %454 = vector.shape_cast %453 : vector<1x64x128xf32> to vector<64x128xf32>
    %cst_148 = arith.constant dense<0.000000e+00> : vector<8x128xf32>
    %455 = tpu.matmul %452, %454, %cst_148 {dimension_numbers = #tpu.dot_dimension_numbers<[1], [0], [0], [1], [0, 0, 1, 1], [], []>} : vector<8x64xf32>, vector<64x128xf32>, vector<8x128xf32> -> vector<8x128xf32>
    %456 = arith.addf %435, %455 : vector<8x128xf32>
    %cst_149 = arith.constant dense<0.000000e+00> : vector<8x256xf32>
    %457 = tpu.matmul %452, %265, %cst_149 {dimension_numbers = #tpu.dot_dimension_numbers<[1], [0], [0], [1], [0, 0, 1, 1], [], []>} : vector<8x64xf32>, vector<64x256xf32>, vector<8x256xf32> -> vector<8x256xf32>
    %458 = arith.addf %259, %457 : vector<8x256xf32>
    %459 = arith.negf %458 : vector<8x256xf32>
    %460 = math.exp %459 : vector<8x256xf32>
    %cst_150 = arith.constant 1.000000e+00 : f32
    %461 = vector.broadcast %cst_150 : f32 to vector<8x256xf32>
    %462 = arith.addf %461, %460 : vector<8x256xf32>
    %463 = arith.divf %461, %462 : vector<8x256xf32>
    %464 = math.tanh %458 : vector<8x256xf32>
    %465 = vector.extract_strided_slice %463 {offsets = [0, 0], sizes = [8, 64], strides = [1, 1]} : vector<8x256xf32> to vector<8x64xf32>
    %466 = vector.extract_strided_slice %463 {offsets = [0, 64], sizes = [8, 64], strides = [1, 1]} : vector<8x256xf32> to vector<8x64xf32>
    %467 = vector.extract_strided_slice %464 {offsets = [0, 128], sizes = [8, 64], strides = [1, 1]} : vector<8x256xf32> to vector<8x64xf32>
    %468 = vector.extract_strided_slice %463 {offsets = [0, 192], sizes = [8, 64], strides = [1, 1]} : vector<8x256xf32> to vector<8x64xf32>
    %469 = arith.mulf %466, %450 : vector<8x64xf32>
    %470 = arith.mulf %465, %467 : vector<8x64xf32>
    %471 = arith.addf %469, %470 : vector<8x64xf32>
    %472 = math.tanh %471 : vector<8x64xf32>
    %473 = arith.mulf %468, %472 : vector<8x64xf32>
    %c9_151 = arith.constant 9 : index
    %c0_152 = arith.constant 0 : index
    %c0_153 = arith.constant 0 : index
    %474 = vector.load %arg16[%c9_151, %c0_152, %c0_153] : memref<10x64x128xf32, #tpu.memory_space<vmem>>, vector<1x64x128xf32>
    %475 = vector.shape_cast %474 : vector<1x64x128xf32> to vector<64x128xf32>
    %cst_154 = arith.constant dense<0.000000e+00> : vector<8x128xf32>
    %476 = tpu.matmul %473, %475, %cst_154 {dimension_numbers = #tpu.dot_dimension_numbers<[1], [0], [0], [1], [0, 0, 1, 1], [], []>} : vector<8x64xf32>, vector<64x128xf32>, vector<8x128xf32> -> vector<8x128xf32>
    %477 = arith.addf %456, %476 : vector<8x128xf32>
    %c0_155 = arith.constant 0 : index
    %c0_156 = arith.constant 0 : index
    %478 = vector.load %arg19[%c0_155, %c0_156] : memref<8x128xf32, #tpu.memory_space<vmem>>, vector<8x128xf32>
    tpu.vector_store %arg19[%c0_155, %c0_156], %477 {strides = array<i32>} : memref<8x128xf32, #tpu.memory_space<vmem>>, vector<8x128xf32>,
    %c0_157 = arith.constant 0 : index
    %c0_158 = arith.constant 0 : index
    %479 = vector.load %arg20[%c0_157, %c0_158] : memref<8x128xf32, #tpu.memory_space<vmem>>, vector<8x128xf32>
    tpu.vector_store %arg20[%c0_157, %c0_158], %242 {strides = array<i32>} : memref<8x128xf32, #tpu.memory_space<vmem>>, vector<8x128xf32>,
    %c0_159 = arith.constant 0 : index
    %c0_160 = arith.constant 0 : index
    %480 = vector.load %arg21[%c0_159, %c0_160] : memref<8x128xf32, #tpu.memory_space<vmem>>, vector<8x128xf32>
    tpu.vector_store %arg21[%c0_159, %c0_160], %243 {strides = array<i32>} : memref<8x128xf32, #tpu.memory_space<vmem>>, vector<8x128xf32>,
    return
  }
}

</mosaic_0001>

<bundles_post_ra>
// kernel: cvae_forward.1
= control target key start
LH: loop header
LB: loop body
LE: loop exit
PB: predicated region body
PF: predicated region fallthrough
CT: control target
= control target key end

     0   :  { %s8024_s0 = inlined_call_operand.vmem [shape: f32[80,128], index: 0, kind: input, shape index: {}]   ;;  %s8025_s1 = inlined_call_operand.vmem [shape: f32[8,128], index: 1, kind: input, shape index: {}]   ;;  %s8026_s2 = inlined_call_operand.vmem [shape: f32[8,128], index: 2, kind: input, shape index: {}]   ;;  %s8027_s3 = inlined_call_operand.hbm [shape: f32[128,256], index: 3, kind: input, shape index: {}]   ;;  %s8028_s4 = inlined_call_operand.hbm [shape: f32[64,256], index: 4, kind: input, shape index: {}]   ;;  %s8029_s5 = inlined_call_operand.hbm [shape: f32[1,256], index: 5, kind: input, shape index: {}]   ;;  %s8030_s6 = inlined_call_operand.vmem [shape: f32[10,64,128], index: 6, kind: input, shape index: {}]   ;;  %s8031_s7 = inlined_call_operand.hbm [shape: f32[128,128], index: 7, kind: input, shape index: {}]   ;;  %s8032_s8 = inlined_call_operand.vmem [shape: f32[1,128], index: 8, kind: input, shape index: {}]   ;;  %s8033_s9 = inlined_call_operand.hbm [shape: f32[128,256], index: 9, kind: input, shape index: {}]   ;;  %s8034_s10 = inlined_call_operand.hbm [shape: f32[1,256], index: 10, kind: input, shape index: {}]   ;;  %s8035_s11 = inlined_call_operand.hbm [shape: f32[128,128], index: 11, kind: input, shape index: {}]   ;;  %s8036_s12 = inlined_call_operand.hbm [shape: f32[1,128], index: 12, kind: input, shape index: {}]   ;;  %s8037_s13 = inlined_call_operand.hbm [shape: f32[128,256], index: 13, kind: input, shape index: {}]   ;;  %s8038_s14 = inlined_call_operand.vmem [shape: f32[64,256], index: 14, kind: input, shape index: {}]   ;;  %s8039_s15 = inlined_call_operand.hbm [shape: f32[1,256], index: 15, kind: input, shape index: {}]   ;;  %s8040_s16 = inlined_call_operand.hbm [shape: f32[10,64,128], index: 16, kind: input, shape index: {}]   ;;  %s8041_s17 = inlined_call_operand.hbm [shape: f32[128,128], index: 17, kind: input, shape index: {}]   ;;  %s8042_s18 = inlined_call_operand.hbm [shape: f32[1,128], index: 18, kind: input, shape index: {}]   ;;  %s8043_s19 = inlined_call_operand.vmem [shape: f32[8,128], index: 19, kind: output, shape index: {0}]   ;;  %s8044_s20 = inlined_call_operand.vmem [shape: f32[8,128], index: 20, kind: output, shape index: {1}]   ;;  %s8045_s21 = inlined_call_operand.vmem [shape: f32[8,128], index: 21, kind: output, shape index: {2}]  }
   0x1   :  { %8055 = sst [smem:[#allocation29_spill]] %s8024_s0 }
   0x2   :  { %8056 = sst [smem:[#allocation30_spill]] %s8025_s1 }
   0x3   :  { %8057 = sst [smem:[#allocation31_spill]] %s8026_s2 }
   0x4   :  { %8058 = sst [smem:[#allocation32_spill]] %s8027_s3 }
   0x5   :  { %8059 = sst [smem:[#allocation33_spill]] %s8028_s4 }
   0x6   :  { %8060 = sst [smem:[#allocation34_spill]] %s8029_s5 }
   0x7   :  { %8061 = sst [smem:[#allocation35_spill]] %s8043_s19 }
   0x8   :  { %27 = vsyncpa [#allocation3], 0 }
   0x9   :  { %28 = vsyncpa [#allocation5], 0 }
   0xa   :  { %29 = vsyncpa [#allocation8], 0 }
   0xb   :  { %30 = vsyncpa [#allocation11], 0 }
   0xc   :  { %31 = vsyncpa [#allocation14], 0 }
   0xd   :  { %32 = vsyncpa [#allocation17], 0 }
   0xe   :  { %33 = vsyncpa [#allocation20], 0  ;;  %s6826_s2 = smov [#allocation4]   ;;  %s6827_s26 = smov [#allocation7]  }
   0xf   :  { %s57_s25 = sshll.u32 %s6826_s2, 4  ;;  %s81_s27 = sshll.u32 %s6827_s26, 4  ;;  %s58_s25 = int_to_ptr.vmem [resolvable:$true] %s57_s25  ;;  %s6957_s27 = int_to_ptr.vmem [resolvable:$true] %s81_s27 }
  0x10   :  { %s8062_s29 = sld [smem:[#allocation33_spill]] }
  0x16   :  { %s6526_s0 = scalar_lea.hbm %s8062_s29, 2048 }
  0x17   :  { %p6527_p0 = scmp.ne.s32.totalorder %s8062_s29, %s6526_s0  ;;  %p6530_p1 = scmp.lt.u32.totalorder %s6526_s0, %s8062_s29 }
  0x19   :  { %p6532_p2 = pnand %p6530_p1, %p6527_p0 }
  0x1b   :  { %6535 = shalt.err (!%p6532_p2)
}
  0x1c   :  { %s6536_s23 = scalar_lea.vmem %s58_s25, 2048  ;;  %p6541_p4 = scmp.lt.s32.totalorder %s58_s25, %s58_s25 }
  0x1d   :  { %p6537_p3 = scmp.ne.s32.totalorder %s58_s25, %s6536_s23  ;;  %p6542_p5 = scmp.lt.s32.totalorder %s6536_s23, %s6536_s23 }
  0x1f   :  { %p6543_p6 = por %p6542_p5, %p6541_p4 }
  0x21   :  { %p6544_p7 = pnand %p6543_p6, %p6537_p3 }
  0x23   :  { %6547 = shalt.err (!%p6544_p7)
}
  0x24   :  { %s8051_s1 = smov 256   ;;  %s8053_s24 = smov 16  }
  0x25   :  { %63 = dma.hbm_to_vmem [thread:$0]  %s8062_s29, 2048, %s58_s25, [#allocation5], %s8051_s1, %s8051_s1, %s8053_s24  }
  0x26   :  { %s6548_s0 = scalar_lea.hbm %s8031_s7, 2048 }
  0x27   :  { %p6549_p8 = scmp.ne.s32.totalorder %s8031_s7, %s6548_s0  ;;  %p6552_p9 = scmp.lt.u32.totalorder %s6548_s0, %s8031_s7 }
  0x29   :  { %p6554_p10 = pnand %p6552_p9, %p6549_p8 }
  0x2b   :  { %6557 = shalt.err (!%p6554_p10)
}
  0x2c   :  { %s6558_s23 = scalar_lea.vmem %s6957_s27, 2048  ;;  %p6563_p12 = scmp.lt.s32.totalorder %s6957_s27, %s6957_s27 }
  0x2d   :  { %p6559_p11 = scmp.ne.s32.totalorder %s6957_s27, %s6558_s23  ;;  %p6564_p13 = scmp.lt.s32.totalorder %s6558_s23, %s6558_s23 }
  0x2f   :  { %p6565_p0 = por %p6564_p13, %p6563_p12 }
  0x31   :  { %p6566_p1 = pnand %p6565_p0, %p6559_p11 }
  0x33   :  { %6569 = shalt.err (!%p6566_p1)
}
  0x34   :  { %s6830_s25 = smov 128   ;;  %s6831_s29 = smov 8  }
  0x35   :  { %87 = dma.hbm_to_vmem [thread:$0]  %s8031_s7, 2048, %s6957_s27, [#allocation8], %s6830_s25, %s6830_s25, %s6831_s29  }
  0x36   :  { %s6832_s3 = smov [#allocation10]   ;;  %s6833_s0 = smov [#allocation13]  }
  0x37   :  { %s108_s28 = sshll.u32 %s6832_s3, 4  ;;  %s130_s4 = sshll.u32 %s6833_s0, 4  ;;  %s109_s28 = int_to_ptr.vmem [resolvable:$true] %s108_s28  ;;  %s131_s4 = int_to_ptr.vmem [resolvable:$true] %s130_s4 }
  0x38   :  { %s6570_s22 = scalar_lea.hbm %s8034_s10, 32 }
  0x39   :  { %p6571_p2 = scmp.ne.s32.totalorder %s8034_s10, %s6570_s22  ;;  %p6574_p3 = scmp.lt.u32.totalorder %s6570_s22, %s8034_s10 }
  0x3b   :  { %p6576_p4 = pnand %p6574_p3, %p6571_p2 }
  0x3d   :  { %6579 = shalt.err (!%p6576_p4)
}
  0x3e   :  { %s6580_s7 = scalar_lea.vmem %s109_s28, 32  ;;  %p6585_p6 = scmp.lt.s32.totalorder %s109_s28, %s109_s28 }
  0x3f   :  { %p6581_p5 = scmp.ne.s32.totalorder %s109_s28, %s6580_s7  ;;  %p6586_p7 = scmp.lt.s32.totalorder %s6580_s7, %s6580_s7 }
  0x41   :  { %p6587_p8 = por %p6586_p7, %p6585_p6 }
  0x43   :  { %p6588_p9 = pnand %p6587_p8, %p6581_p5 }
  0x45   :  { %6591 = shalt.err (!%p6588_p9)
}
  0x46   :  { %111 = dma.hbm_to_vmem [thread:$0]  %s8034_s10, 32, %s109_s28, [#allocation11]  }
  0x47   :  { %s6592_s3 = scalar_lea.hbm %s8036_s12, 16 }
  0x48   :  { %p6593_p10 = scmp.ne.s32.totalorder %s8036_s12, %s6592_s3  ;;  %p6596_p11 = scmp.lt.u32.totalorder %s6592_s3, %s8036_s12 }
  0x4a   :  { %p6598_p12 = pnand %p6596_p11, %p6593_p10 }
  0x4c   :  { %6601 = shalt.err (!%p6598_p12)
}
  0x4d   :  { %s6602_s5 = scalar_lea.vmem %s131_s4, 16  ;;  %s6606_s22 = scalar_lea.vmem %s131_s4, 32 }
  0x4e   :  { %p6603_p13 = scmp.ne.s32.totalorder %s131_s4, %s6602_s5  ;;  %p6607_p0 = scmp.lt.s32.totalorder %s131_s4, %s131_s4 }
  0x4f   :  { %p6608_p1 = scmp.lt.s32.totalorder %s6606_s22, %s6602_s5 }
  0x51   :  { %p6609_p2 = por %p6608_p1, %p6607_p0 }
  0x53   :  { %p6610_p3 = pnand %p6609_p2, %p6603_p13 }
  0x55   :  { %6613 = shalt.err (!%p6610_p3)
}
  0x56   :  { %133 = dma.hbm_to_vmem [thread:$0]  %s8036_s12, 16, %s131_s4, [#allocation14]  }
  0x57   :  { %s6834_s23 = smov [#allocation16]   ;;  %s6835_s27 = smov [#allocation19]  }
  0x58   :  { %s154_s7 = sshll.u32 %s6834_s23, 4  ;;  %s175_s2 = sshll.u32 %s6835_s27, 4  ;;  %s155_s7 = int_to_ptr.vmem [resolvable:$true] %s154_s7  ;;  %s7018_s2 = int_to_ptr.vmem [resolvable:$true] %s175_s2 }
  0x59   :  { %s6614_s3 = scalar_lea.hbm %s8039_s15, 32 }
  0x5a   :  { %p6615_p4 = scmp.ne.s32.totalorder %s8039_s15, %s6614_s3  ;;  %p6618_p5 = scmp.lt.u32.totalorder %s6614_s3, %s8039_s15 }
  0x5c   :  { %p6620_p6 = pnand %p6618_p5, %p6615_p4 }
  0x5e   :  { %6623 = shalt.err (!%p6620_p6)
}
  0x5f   :  { %s6624_s12 = scalar_lea.vmem %s155_s7, 32  ;;  %p6629_p8 = scmp.lt.s32.totalorder %s155_s7, %s155_s7 }
  0x60   :  { %p6625_p7 = scmp.ne.s32.totalorder %s155_s7, %s6624_s12  ;;  %p6630_p9 = scmp.lt.s32.totalorder %s6624_s12, %s6624_s12 }
  0x62   :  { %p6631_p10 = por %p6630_p9, %p6629_p8 }
  0x64   :  { %p6632_p11 = pnand %p6631_p10, %p6625_p7 }
  0x66   :  { %6635 = shalt.err (!%p6632_p11)
}
  0x67   :  { %157 = dma.hbm_to_vmem [thread:$0]  %s8039_s15, 32, %s155_s7, [#allocation17]  }
  0x68   :  { %s6636_s28 = scalar_lea.hbm %s8041_s17, 2048 }
  0x69   :  { %p6637_p12 = scmp.ne.s32.totalorder %s8041_s17, %s6636_s28  ;;  %p6640_p13 = scmp.lt.u32.totalorder %s6636_s28, %s8041_s17 }
  0x6b   :  { %p6642_p0 = pnand %p6640_p13, %p6637_p12 }
  0x6d   :  { %6645 = shalt.err (!%p6642_p0)
}
  0x6e   :  { %s6646_s3 = scalar_lea.vmem %s7018_s2, 2048  ;;  %p6651_p2 = scmp.lt.s32.totalorder %s7018_s2, %s7018_s2 }
  0x6f   :  { %p6647_p1 = scmp.ne.s32.totalorder %s7018_s2, %s6646_s3  ;;  %p6652_p3 = scmp.lt.s32.totalorder %s6646_s3, %s6646_s3 }
  0x71   :  { %p6653_p4 = por %p6652_p3, %p6651_p2 }
  0x73   :  { %p6654_p5 = pnand %p6653_p4, %p6647_p1 }
  0x75   :  { %6657 = shalt.err (!%p6654_p5)
}
  0x76   :  { %181 = dma.hbm_to_vmem [thread:$0]  %s8041_s17, 2048, %s7018_s2, [#allocation20], %s6830_s25, %s6830_s25, %s6831_s29  }
  0x77   :  { %s6836_s0 = smov [#allocation2]   ;;  %s6837_s24 = smov [#allocation6]  }
  0x78   :  { %s45_s19 = sshll.u32 %s6836_s0, 4  ;;  %s70_s30 = sshll.u32 %s6837_s24, 4  ;;  %s46_s19 = int_to_ptr.vmem [resolvable:$true] %s45_s19  ;;  %s71_s30 = int_to_ptr.vmem [resolvable:$true] %s70_s30 }
  0x79   :  { %s8063_s5 = sld [smem:[#allocation32_spill]] }
  0x7f   :  { %s6658_s22 = scalar_lea.hbm %s8063_s5, 4096 }
  0x80   :  { %p6659_p6 = scmp.ne.s32.totalorder %s8063_s5, %s6658_s22  ;;  %p6662_p7 = scmp.lt.u32.totalorder %s6658_s22, %s8063_s5 }
  0x82   :  { %p6664_p8 = pnand %p6662_p7, %p6659_p6 }
  0x84   :  { %6667 = shalt.err (!%p6664_p8)
}
  0x85   :  { %s6668_s17 = scalar_lea.vmem %s46_s19, 4096  ;;  %p6673_p10 = scmp.lt.s32.totalorder %s46_s19, %s46_s19 }
  0x86   :  { %p6669_p9 = scmp.ne.s32.totalorder %s46_s19, %s6668_s17  ;;  %p6674_p11 = scmp.lt.s32.totalorder %s6668_s17, %s6668_s17 }
  0x88   :  { %p6675_p12 = por %p6674_p11, %p6673_p10 }
  0x8a   :  { %p6676_p13 = pnand %p6675_p12, %p6669_p9 }
  0x8c   :  { %6679 = shalt.err (!%p6676_p13)
}
  0x8d   :  { %s8064_s2 = smov 16   ;;  %s8065_s26 = smov 256  }
  0x8e   :  { %51 = dma.hbm_to_vmem [thread:$0]  %s8063_s5, 4096, %s46_s19, [#allocation3], %s8065_s26, %s8065_s26, %s8064_s2  }
  0x8f   :  { %s8066_s0 = sld [smem:[#allocation34_spill]] }
  0x95   :  { %s6680_s24 = scalar_lea.hbm %s8066_s0, 32 }
  0x96   :  { %p6681_p0 = scmp.ne.s32.totalorder %s8066_s0, %s6680_s24  ;;  %p6684_p1 = scmp.lt.u32.totalorder %s6680_s24, %s8066_s0 }
  0x98   :  { %p6686_p2 = pnand %p6684_p1, %p6681_p0 }
  0x9a   :  { %6689 = shalt.err (!%p6686_p2)
}
  0x9b   :  { %s6690_s28 = scalar_lea.vmem %s71_s30, 32  ;;  %p6695_p4 = scmp.lt.s32.totalorder %s71_s30, %s71_s30 }
  0x9c   :  { %p6691_p3 = scmp.ne.s32.totalorder %s71_s30, %s6690_s28  ;;  %p6696_p5 = scmp.lt.s32.totalorder %s6690_s28, %s6690_s28 }
  0x9e   :  { %p6697_p6 = por %p6696_p5, %p6695_p4 }
  0xa0   :  { %p6698_p7 = pnand %p6697_p6, %p6691_p3 }
  0xa2   :  { %6701 = shalt.err (!%p6698_p7)
}
  0xa3   :  { %73 = dma.hbm_to_vmem [thread:$0]  %s8066_s0, 32, %s71_s30, [#allocation5]  }
  0xa4   :  { %s6838_s23 = smov [#allocation9]   ;;  %s6839_s17 = smov [#allocation12]  }
  0xa5   :  { %s95_s27 = sshll.u32 %s6838_s23, 4  ;;  %s117_s1 = sshll.u32 %s6839_s17, 4  ;;  %s96_s27 = int_to_ptr.vmem [resolvable:$true] %s95_s27  ;;  %s7079_s1 = int_to_ptr.vmem [resolvable:$true] %s117_s1 }
  0xa6   :  { %s6702_s7 = scalar_lea.hbm %s8033_s9, 4096 }
  0xa7   :  { %p6703_p8 = scmp.ne.s32.totalorder %s8033_s9, %s6702_s7  ;;  %p6706_p9 = scmp.lt.u32.totalorder %s6702_s7, %s8033_s9 }
  0xa9   :  { %p6708_p10 = pnand %p6706_p9, %p6703_p8 }
  0xab   :  { %6711 = shalt.err (!%p6708_p10)
}
  0xac   :  { %s6712_s30 = scalar_lea.vmem %s96_s27, 4096  ;;  %p6717_p12 = scmp.lt.s32.totalorder %s96_s27, %s96_s27 }
  0xad   :  { %p6713_p11 = scmp.ne.s32.totalorder %s96_s27, %s6712_s30  ;;  %p6718_p13 = scmp.lt.s32.totalorder %s6712_s30, %s6712_s30 }
  0xaf   :  { %p6719_p0 = por %p6718_p13, %p6717_p12 }
  0xb1   :  { %p6720_p1 = pnand %p6719_p0, %p6713_p11 }
  0xb3   :  { %6723 = shalt.err (!%p6720_p1)
}
  0xb4   :  { %101 = dma.hbm_to_vmem [thread:$0]  %s8033_s9, 4096, %s96_s27, [#allocation8], %s8065_s26, %s8065_s26, %s8064_s2  }
  0xb5   :  { %s6724_s5 = scalar_lea.hbm %s8035_s11, 2048 }
  0xb6   :  { %p6725_p2 = scmp.ne.s32.totalorder %s8035_s11, %s6724_s5  ;;  %p6728_p3 = scmp.lt.u32.totalorder %s6724_s5, %s8035_s11 }
  0xb8   :  { %p6730_p4 = pnand %p6728_p3, %p6725_p2 }
  0xba   :  { %6733 = shalt.err (!%p6730_p4)
}
  0xbb   :  { %s6734_s7 = scalar_lea.vmem %s7079_s1, 2048  ;;  %p6739_p6 = scmp.lt.s32.totalorder %s7079_s1, %s7079_s1 }
  0xbc   :  { %p6735_p5 = scmp.ne.s32.totalorder %s7079_s1, %s6734_s7  ;;  %p6740_p7 = scmp.lt.s32.totalorder %s6734_s7, %s6734_s7 }
  0xbe   :  { %p6741_p8 = por %p6740_p7, %p6739_p6 }
  0xc0   :  { %p6742_p9 = pnand %p6741_p8, %p6735_p5 }
  0xc2   :  { %6745 = shalt.err (!%p6742_p9)
}
  0xc3   :  { %123 = dma.hbm_to_vmem [thread:$0]  %s8035_s11, 2048, %s7079_s1, [#allocation11], %s6830_s25, %s6830_s25, %s6831_s29  }
  0xc4   :  { %s6840_s24 = smov [#allocation15]   ;;  %s6841_s4 = smov [#allocation18]  }
  0xc5   :  { %s139_s12 = sshll.u32 %s6840_s24, 4  ;;  %s163_s22 = sshll.u32 %s6841_s4, 4  ;;  %s140_s12 = int_to_ptr.vmem [resolvable:$true] %s139_s12  ;;  %s7116_s22 = int_to_ptr.vmem [resolvable:$true] %s163_s22 }
  0xc6   :  { %s6746_s10 = scalar_lea.hbm %s8037_s13, 4096 }
  0xc7   :  { %p6747_p10 = scmp.ne.s32.totalorder %s8037_s13, %s6746_s10  ;;  %p6750_p11 = scmp.lt.u32.totalorder %s6746_s10, %s8037_s13 }
  0xc9   :  { %p6752_p12 = pnand %p6750_p11, %p6747_p10 }
  0xcb   :  { %6755 = shalt.err (!%p6752_p12)
}
  0xcc   :  { %s6756_s11 = scalar_lea.vmem %s140_s12, 4096  ;;  %p6761_p0 = scmp.lt.s32.totalorder %s140_s12, %s140_s12 }
  0xcd   :  { %p6757_p13 = scmp.ne.s32.totalorder %s140_s12, %s6756_s11  ;;  %p6762_p1 = scmp.lt.s32.totalorder %s6756_s11, %s6756_s11 }
  0xcf   :  { %p6763_p2 = por %p6762_p1, %p6761_p0 }
  0xd1   :  { %p6764_p3 = pnand %p6763_p2, %p6757_p13 }
  0xd3   :  { %6767 = shalt.err (!%p6764_p3)
}
  0xd4   :  { %145 = dma.hbm_to_vmem [thread:$0]  %s8037_s13, 4096, %s140_s12, [#allocation14], %s8065_s26, %s8065_s26, %s8064_s2  }
  0xd5   :  { %s6768_s7 = scalar_lea.hbm %s8040_s16, 10240 }
  0xd6   :  { %p6769_p4 = scmp.ne.s32.totalorder %s8040_s16, %s6768_s7  ;;  %p6772_p5 = scmp.lt.u32.totalorder %s6768_s7, %s8040_s16 }
  0xd8   :  { %p6774_p6 = pnand %p6772_p5, %p6769_p4 }
  0xda   :  { %6777 = shalt.err (!%p6774_p6)
}
  0xdb   :  { %s6778_s30 = scalar_lea.vmem %s7116_s22, 10240  ;;  %p6783_p8 = scmp.lt.s32.totalorder %s7116_s22, %s7116_s22 }
  0xdc   :  { %p6779_p7 = scmp.ne.s32.totalorder %s7116_s22, %s6778_s30  ;;  %p6784_p9 = scmp.lt.s32.totalorder %s6778_s30, %s6778_s30 }
  0xde   :  { %p6785_p10 = por %p6784_p9, %p6783_p8 }
  0xe0   :  { %p6786_p11 = pnand %p6785_p10, %p6779_p7 }
  0xe2   :  { %6789 = shalt.err (!%p6786_p11)
}
  0xe3   :  { %169 = dma.hbm_to_vmem [thread:$0]  %s8040_s16, 10240, %s7116_s22, [#allocation17], %s6830_s25, %s6830_s25, %s6831_s29  }
  0xe4   :  { %s6842_s26 = smov [#allocation21]   ;;  %s6790_s28 = scalar_lea.hbm %s8042_s18, 16 }
  0xe5   :  { %s188_s12 = sshll.u32 %s6842_s26, 4  ;;  %p6791_p12 = scmp.ne.s32.totalorder %s8042_s18, %s6790_s28  ;;  %s189_s12 = int_to_ptr.vmem [resolvable:$true] %s188_s12 }
  0xe6   :  { %p6794_p13 = scmp.lt.u32.totalorder %s6790_s28, %s8042_s18 }
  0xe8   :  { %p6796_p0 = pnand %p6794_p13, %p6791_p12 }
  0xea   :  { %6799 = shalt.err (!%p6796_p0)
}
  0xeb   :  { %s6800_s1 = scalar_lea.vmem %s189_s12, 16  ;;  %s6804_s16 = scalar_lea.vmem %s189_s12, 32 }
  0xec   :  { %p6801_p1 = scmp.ne.s32.totalorder %s189_s12, %s6800_s1  ;;  %p6805_p2 = scmp.lt.s32.totalorder %s189_s12, %s189_s12 }
  0xed   :  { %p6806_p3 = scmp.lt.s32.totalorder %s6804_s16, %s6800_s1 }
  0xef   :  { %p6807_p4 = por %p6806_p3, %p6805_p2 }
  0xf1   :  { %p6808_p5 = pnand %p6807_p4, %p6801_p1 }
  0xf3   :  { %6811 = shalt.err (!%p6808_p5)
}
  0xf4   :  { %191 = dma.hbm_to_vmem [thread:$0]  %s8042_s18, 16, %s189_s12, [#allocation20]  }
  0xf5   :  { %6812 = dma.done.wait [#allocation3], 4096  }
  0xf6   :  { %6813 = vsyncadd [#allocation3], 4294963200 }
  0xf7   :  { %6814 = dma.done.wait [#allocation5], 2080  }
  0xf8   :  { %6815 = vsyncadd [#allocation5], 4294965216 }
  0xf9   :  { %6816 = dma.done.wait [#allocation8], 6144  }
  0xfa   :  { %6817 = vsyncadd [#allocation8], 4294961152 }
  0xfb   :  { %6818 = dma.done.wait [#allocation11], 2080  }
  0xfc   :  { %6819 = vsyncadd [#allocation11], 4294965216 }
  0xfd   :  { %6820 = dma.done.wait [#allocation14], 4112  }
  0xfe   :  { %6821 = vsyncadd [#allocation14], 4294963184 }
  0xff   :  { %6822 = dma.done.wait [#allocation17], 10272  }
 0x100   :  { %6823 = vsyncadd [#allocation17], 4294957024 }
 0x101   :  { %6824 = dma.done.wait [#allocation20], 2064  }
 0x102   :  { %6825 = vsyncadd [#allocation20], 4294965232  ;;  %v6843_v0 = vmov 0.0|0.0   ;;  %vm6844_vm0 = vmmov 0   ;;  %v6845_v1 = vmov 0.0   ;;  %v411_v2 = vld [vmem:[#allocation7] sm:$0xff] }
 0x103   :  { %5484 = vmatprep.subr.bf16.mxu1 %v6843_v0  ;;  %4999 = vmatprep.mubr.msk.f32.mxu1 %vm6844_vm0, %v6845_v1  ;;  %v412_v3 = vld [vmem:[#allocation7 + $0x8] sm:$0xff]  ;;  %v413_v4 = vld [vmem:[#allocation7 + $0x10] sm:$0xff]  ;;  %v414_v6 = vld [vmem:[#allocation7 + $0x18] sm:$0xff]  ;;  %s8067_s17 = sld [smem:[#allocation30_spill]]  ;;  %s8068_s7 = sld [smem:[#allocation29_spill]]  ;;  %vm520_vm1 = vcmask 523264  }
 0x104   :  { %350 = vmatprep.mubr.f32.mxu0 %v6845_v1  ;;  %v5485_v5 = vpack.c.bf16 %v412_v3, %v411_v2  ;;  %v243_v7 = vld [vmem:[#allocation2 + $0x8] sm:$0xff]  ;;  %v245_v8 = vld [vmem:[#allocation2 + $0x18] sm:$0xff]  ;;  %v5488_v9 = vpack.c.bf16 %v414_v6, %v413_v4  ;;  %v242_v12 = vld [vmem:[#allocation2] sm:$0xff]  ;;  %s6846_s9 = smov 64   ;;  %s8069_s16 = sld [smem:[#allocation31_spill]] }
 0x105   :  { %v415_v10 = vld [vmem:[#allocation7 + $0x20] sm:$0xff]  ;;  %v5452_v11 = vpack.c.bf16 %v245_v8, %v243_v7  ;;  %v244_v13 = vld [vmem:[#allocation2 + $0x10] sm:$0xff]  ;;  %v249_v17 = vld [vmem:[#allocation2 + $0x38] sm:$0xff]  ;;  %s8070_s3 = sld [smem:[#allocation35_spill]] }
 0x106   :  { %5486 = vmatpush3.bf16.msra.mxu1 %v5485_v5  ;;  %v416_v14 = vld [vmem:[#allocation7 + $0x28] sm:$0xff]  ;;  %v5454_v15 = vpack.c.bf16 %v244_v13, %v242_v12  ;;  %v246_v19 = vld [vmem:[#allocation2 + $0x20] sm:$0xff]  ;;  %v253_v23 = vld [vmem:[#allocation2 + $0x58] sm:$0xff] }
 0x107   :  { %5487 = vmatprep.subr.bf16.mxu1 %v6843_v0  ;;  %v247_v16 = vld [vmem:[#allocation2 + $0x28] sm:$0xff]  ;;  %5453 = vmatprep.subr.bf16.mxu0 %v5452_v11  ;;  %v248_v20 = vld [vmem:[#allocation2 + $0x30] sm:$0xff]  ;;  %v5491_v24 = vpack.c.bf16 %v416_v14, %v415_v10  ;;  %v250_v27 = vld [vmem:[#allocation2 + $0x40] sm:$0xff] }
 0x108   :  { %v5456_v18 = vpack.c.bf16 %v249_v17, %v247_v16  ;;  %5455 = vmatpush1.bf16.msra.mxu0 %v5454_v15  ;;  %v5458_v21 = vpack.c.bf16 %v248_v20, %v246_v19  ;;  %v251_v22 = vld [vmem:[#allocation2 + $0x48] sm:$0xff]  ;;  %v417_v25 = vld [vmem:[#allocation7 + $0x30] sm:$0xff]  ;;  %v418_v29 = vld [vmem:[#allocation7 + $0x38] sm:$0xff] }
 0x109   :  { %v5460_v26 = vpack.c.bf16 %v253_v23, %v251_v22  ;;  %v252_v28 = vld [vmem:[#allocation2 + $0x50] sm:$0xff]  ;;  %v255_v30 = vld [vmem:[#allocation2 + $0x68] sm:$0xff]  ;;  %v257_v31 = vld [vmem:[#allocation2 + $0x78] sm:$0xff]  ;;  %v5494_v33 = vpack.c.bf16 %v418_v29, %v417_v25 }
 0x10a   :  { %5489 = vmatpush3.bf16.msra.mxu1 %v5488_v9  ;;  %5457 = vmatprep.subr.bf16.mxu0 %v5456_v18  ;;  %v5462_v32 = vpack.c.bf16 %v252_v28, %v250_v27  ;;  %v419_v34 = vld [vmem:[#allocation7 + $0x40] sm:$0xff]  ;;  %v5464_v35 = vpack.c.bf16 %v257_v31, %v255_v30  ;;  %v256_v37 = vld [vmem:[#allocation2 + $0x70] sm:$0xff]  ;;  %v261_v40 = vld [vmem:[#allocation2 + $0x98] sm:$0xff] }
 0x10b   :  { %5490 = vmatprep.subr.bf16.mxu1 %v6843_v0  ;;  %v254_v36 = vld [vmem:[#allocation2 + $0x60] sm:$0xff]  ;;  %v420_v38 = vld [vmem:[#allocation7 + $0x48] sm:$0xff]  ;;  %v421_v43 = vld [vmem:[#allocation7 + $0x50] sm:$0xff] }
 0x10c   :  { %5459 = vmatpush1.bf16.msra.mxu0 %v5458_v21  ;;  %v259_v39 = vld [vmem:[#allocation2 + $0x88] sm:$0xff]  ;;  %v5466_v41 = vpack.c.bf16 %v256_v37, %v254_v36  ;;  %v5497_v42 = vpack.c.bf16 %v420_v38, %v419_v34  ;;  %v258_v45 = vld [vmem:[#allocation2 + $0x80] sm:$0xff]  ;;  %v260_v46 = vld [vmem:[#allocation2 + $0x90] sm:$0xff]  ;;  %v276_v38 = vlaneseq }
 0x10d   :  { %5461 = vmatprep.subr.bf16.mxu0 %v5460_v26  ;;  %v5468_v44 = vpack.c.bf16 %v261_v40, %v259_v39  ;;  %v422_v47 = vld [vmem:[#allocation7 + $0x58] sm:$0xff]  ;;  %v263_v48 = vld [vmem:[#allocation2 + $0xa8] sm:$0xff]  ;;  %v5470_v50 = vpack.c.bf16 %v260_v46, %v258_v45  ;;  %v264_v55 = vld [vmem:[#allocation2 + $0xb0] sm:$0xff] }
 0x10e   :  { %5492 = vmatpush3.bf16.msra.mxu1 %v5491_v24  ;;  %v265_v49 = vld [vmem:[#allocation2 + $0xb8] sm:$0xff]  ;;  %v5500_v51 = vpack.c.bf16 %v422_v47, %v421_v43  ;;  %v423_v52 = vld [vmem:[#allocation7 + $0x60] sm:$0xff]  ;;  %v424_v56 = vld [vmem:[#allocation7 + $0x68] sm:$0xff]  ;;  %v277_v39 = vshrl.u32 %v276_v38, 7 }
 0x10f   :  { %5493 = vmatprep.subr.bf16.mxu1 %v6843_v0  ;;  %v5472_v53 = vpack.c.bf16 %v265_v49, %v263_v48  ;;  %v262_v54 = vld [vmem:[#allocation2 + $0xa0] sm:$0xff]  ;;  %v267_v57 = vld [vmem:[#allocation2 + $0xc8] sm:$0xff]  ;;  %v269_v58 = vld [vmem:[#allocation2 + $0xd8] sm:$0xff]  ;;  %v5503_v60 = vpack.c.bf16 %v424_v56, %v423_v52 }
 0x110   :  { %5463 = vmatpush1.bf16.msra.mxu0 %v5462_v32  ;;  %v5474_v59 = vpack.c.bf16 %v264_v55, %v262_v54  ;;  %v425_v61 = vld [vmem:[#allocation7 + $0x70] sm:$0xff]  ;;  %v5476_v62 = vpack.c.bf16 %v269_v58, %v267_v57  ;;  %v266_v63 = vld [vmem:[#allocation2 + $0xc0] sm:$0xff]  ;;  %v271_v4 = vld [vmem:[#allocation2 + $0xe8] sm:$0xff] }
 0x111   :  { %5465 = vmatprep.subr.bf16.mxu0 %v5464_v35  ;;  %v268_v2 = vld [vmem:[#allocation2 + $0xd0] sm:$0xff]  ;;  %v426_v3 = vld [vmem:[#allocation7 + $0x78] sm:$0xff]  ;;  %v505_v6 = vld [vmem:[#allocation4 + $0x8] sm:$0xff] }
 0x112   :  { %5495 = vmatpush3.bf16.msra.mxu1 %v5494_v33  ;;  %v273_v5 = vld [vmem:[#allocation2 + $0xf8] sm:$0xff]  ;;  %v5478_v8 = vpack.c.bf16 %v268_v2, %v266_v63  ;;  %v5506_v9 = vpack.c.bf16 %v426_v3, %v425_v61  ;;  %v270_v11 = vld [vmem:[#allocation2 + $0xe0] sm:$0xff]  ;;  %v272_v12 = vld [vmem:[#allocation2 + $0xf0] sm:$0xff] }
 0x113   :  { %5496 = vmatprep.subr.bf16.mxu1 %v6843_v0  ;;  %v507_v7 = vld [vmem:[#allocation4 + $0x18] sm:$0xff]  ;;  %v5480_v10 = vpack.c.bf16 %v273_v5, %v271_v4  ;;  %v504_v14 = vld [vmem:[#allocation4] sm:$0xff]  ;;  %v506_v15 = vld [vmem:[#allocation4 + $0x10] sm:$0xff]  ;;  %v5482_v18 = vpack.c.bf16 %v272_v12, %v270_v11 }
 0x114   :  { %5467 = vmatpush1.bf16.msra.mxu0 %v5466_v41  ;;  %v7176_v13 = vpack.c.bf16 %v507_v7, %v505_v6  ;;  %v509_v16 = vld [vmem:[#allocation4 + $0x28] sm:$0xff]  ;;  %v511_v17 = vld [vmem:[#allocation4 + $0x38] sm:$0xff]  ;;  %v231_v19 = vld [vmem:[%s8067_s17] sm:$0xff]  ;;  %v7181_v20 = vpack.c.bf16 %v506_v15, %v504_v14 }
 0x115   :  { %5469 = vmatprep.subr.bf16.mxu0 %v5468_v44  ;;  %v7184_v21 = vpack.c.bf16 %v511_v17, %v509_v16  ;;  %v508_v22 = vld [vmem:[#allocation4 + $0x20] sm:$0xff]  ;;  %v510_v23 = vld [vmem:[#allocation4 + $0x30] sm:$0xff]  ;;  %v513_v24 = vld [vmem:[#allocation4 + $0x48] sm:$0xff]  ;;  %v7223_v44 = vsub.s32 1, %v277_v39 }
 0x116   :  { %5498 = vmatpush3.bf16.msra.mxu1 %v5497_v42  ;;  %v515_v25 = vld [vmem:[#allocation4 + $0x58] sm:$0xff]  ;;  %v232_v26 = vld [vmem:[%s8068_s7] sm:$0xff]  ;;  %v7190_v27 = vpack.c.bf16 %v510_v23, %v508_v22  ;;  %v514_v30 = vld [vmem:[#allocation4 + $0x50] sm:$0xff]  ;;  %v7221_v42 = vsub.s32 0, %v277_v39 }
 0x117   :  { %5499 = vmatprep.subr.bf16.mxu1 %v6843_v0  ;;  %v7194_v28 = vpack.c.bf16 %v515_v25, %v513_v24  ;;  %v512_v29 = vld [vmem:[#allocation4 + $0x40] sm:$0xff]  ;;  %v517_v31 = vld [vmem:[#allocation4 + $0x68] sm:$0xff]  ;;  %v519_v32 = vld [vmem:[#allocation4 + $0x78] sm:$0xff] }
 0x118   :  { %5471 = vmatpush1.bf16.msra.mxu0 %v5470_v50  ;;  %v7200_v33 = vpack.c.bf16 %v514_v30, %v512_v29  ;;  %v7204_v34 = vpack.c.bf16 %v519_v32, %v517_v31  ;;  %v516_v35 = vld [vmem:[#allocation4 + $0x60] sm:$0xff]  ;;  %v518_v36 = vld [vmem:[#allocation4 + $0x70] sm:$0xff]  ;;  %v622_v3 = vld [vmem:[%s8030_s6 + $0x18] sm:$0xff] }
 0x119   :  { %5473 = vmatprep.subr.bf16.mxu0 %v5472_v53  ;;  %v7208_v37 = vpack.c.bf16 %v518_v36, %v516_v35  ;;  %v274_v43 = vld [vmem:[#allocation6] sm:$0x3]  ;;  %v621_v2 = vld [vmem:[%s8030_s6 + $0x10] sm:$0xff]  ;;  %v235_v5 = vld [vmem:[%s8068_s7 + $0x18] sm:$0xff] }
 0x11a   :  { %5501 = vmatpush3.bf16.msra.mxu1 %v5500_v51  ;;  %v7226_v45 = vrot.slane %v274_v43, %v7221_v42  ;;  %v7229_v46 = vrot.slane %v274_v43, %v7223_v44  ;;  %v619_v61 = vld [vmem:[%s8030_s6] sm:$0xff]  ;;  %v5528_v4 = vpack.c.bf16 %v622_v3, %v621_v2  ;;  %v624_v7 = vld [vmem:[%s8030_s6 + $0x28] sm:$0xff]  ;;  %v626_v11 = vld [vmem:[%s8030_s6 + $0x38] sm:$0xff] }
 0x11b   :  { %5502 = vmatprep.subr.bf16.mxu1 %v6843_v0  ;;  %v623_v6 = vld [vmem:[%s8030_s6 + $0x20] sm:$0xff]  ;;  %v237_v14 = vld [vmem:[%s8068_s7 + $0x28] sm:$0xff]  ;;  %v238_v15 = vld [vmem:[%s8068_s7 + $0x30] sm:$0xff] }
 0x11c   :  { %5475 = vmatpush1.bf16.msra.mxu0 %v5474_v59  ;;  %v233_v59 = vld [vmem:[%s8068_s7 + $0x8] sm:$0xff]  ;;  %v239_v16 = vld [vmem:[%s8068_s7 + $0x38] sm:$0xff]  ;;  %v240_v17 = vld [vmem:[%s8068_s7 + $0x40] sm:$0xff] }
 0x11d   :  { %5477 = vmatprep.subr.bf16.mxu0 %v5476_v62  ;;  %v620_v62 = vld [vmem:[%s8030_s6 + $0x8] sm:$0xff] }
 0x11e   :  { %5504 = vmatpush3.bf16.msra.mxu1 %v5503_v60  ;;  %v234_v60 = vld [vmem:[%s8068_s7 + $0x10] sm:$0xff]  ;;  %v5525_v63 = vpack.c.bf16 %v620_v62, %v619_v61 }
 0x11f   :  { %5505 = vmatprep.subr.bf16.mxu1 %v6843_v0 }
 0x120   :  { %5479 = vmatpush1.bf16.msra.mxu0 %v5478_v8  ;;  %v5531_v8 = vpack.c.bf16 %v624_v7, %v623_v6 }
 0x121   :  { %5481 = vmatprep.subr.bf16.mxu0 %v5480_v10  ;;  %v625_v10 = vld [vmem:[%s8030_s6 + $0x30] sm:$0xff] }
 0x122   :  { %5507 = vmatpush3.bf16.msra.mxu1 %v5506_v9  ;;  %v236_v9 = vld [vmem:[%s8068_s7 + $0x20] sm:$0xff]  ;;  %v5534_v12 = vpack.c.bf16 %v626_v11, %v625_v10 }
 0x123   :  { %5509 = vmatprep.subr.bf16.mxu1 %v7176_v13 }
 0x124   :  { %5483 = vmatpush1.bf16.msra.mxu0 %v5482_v18  ;;  %v241_v18 = vld [vmem:[%s8068_s7 + $0x48] sm:$0xff] }
 0x125   :  { %5000 = vmatmul.mubr.f32.vlgmr.msra.gmra.mrb[0].mxu1 %v231_v19  ;;  %5537 = vmatprep.subr.bf16.mxu0 %v7176_v13 }
 0x126   :  { %5511 = vmatpush1.bf16.msra.mxu1 %v7181_v20  ;;  %588 = vmatprep.mubr.f32.mxu1 %v6845_v1 }
 0x127   :  { %5513 = vmatprep.subr.bf16.mxu1 %v7184_v21  ;;  %351 = vmatmul.mubr.f32.vlgmr.msra.gmra.mrb[0].mxu0 %v232_v26 }
 0x128   :  { %5539 = vmatpush1.bf16.msra.mxu0 %v7181_v20  ;;  %356 = vmatprep.mubr.f32.mxu0 %v6845_v1 }
 0x129   :  { %5541 = vmatprep.subr.bf16.mxu0 %v7184_v21 }
 0x12a   :  { %5515 = vmatpush1.bf16.msra.mxu1 %v7190_v27 }
 0x12b   :  { %5517 = vmatprep.subr.bf16.mxu1 %v7194_v28  ;;  %357 = vmatmul.mubr.f32.gmra.mrb[2].mxu0 %v233_v59  ;;  %v4596_v59 = vld [vmem:[%s8030_s6 + $0x70] sm:$0xff] }
 0x12c   :  { %5543 = vmatpush1.bf16.msra.mxu0 %v7190_v27  ;;  %362 = vmatprep.mubr.f32.mxu0 %v6845_v1 }
 0x12d   :  { %5545 = vmatprep.subr.bf16.mxu0 %v7194_v28 }
 0x12e   :  { %5519 = vmatpush1.bf16.msra.mxu1 %v7200_v33 }
 0x12f   :  { %5521 = vmatprep.subr.bf16.mxu1 %v7204_v34  ;;  %363 = vmatmul.mubr.f32.gmra.mrb[4].mxu0 %v234_v60  ;;  %v4597_v60 = vld [vmem:[%s8030_s6 + $0x78] sm:$0xff] }
 0x130   :  { %5547 = vmatpush1.bf16.msra.mxu0 %v7200_v33  ;;  %368 = vmatprep.mubr.f32.mxu0 %v6845_v1  ;;  %v5562_v61 = vpack.c.bf16 %v4597_v60, %v4596_v59 }
 0x131   :  { %5549 = vmatprep.subr.bf16.mxu0 %v7204_v34 }
 0x132   :  { %5523 = vmatpush1.bf16.msra.mxu1 %v7208_v37 }
 0x133   :  { %5524 = vmatprep.subr.bf16.mxu1 %v6843_v0  ;;  %369 = vmatmul.mubr.f32.gmra.mrb[6].mxu0 %v235_v5 }
 0x134   :  { %5551 = vmatpush1.bf16.msra.mxu0 %v7208_v37  ;;  %374 = vmatprep.mubr.f32.mxu0 %v6845_v1 }
 0x135   :  { %589 = vmatmul.mubr.f32.vlgmr.msra.gmra.mrb[2].mxu1 %v6845_v1  ;;  %5565 = vmatprep.subr.bf16.mxu0 %v7176_v13 }
 0x136   :  { %5018 = vmatprep.mubr.msk.f32.mxu1 %vm6844_vm0, %v6845_v1  ;;  %5526 = vmatpush3.bf16.msra.mxu1 %v5525_v63 }
 0x137   :  { %5527 = vmatprep.subr.bf16.mxu1 %v6843_v0  ;;  %375 = vmatmul.mubr.f32.gmra.mrb[8].mxu0 %v236_v9 }
 0x138   :  { %380 = vmatprep.mubr.f32.mxu0 %v6845_v1 }
 0x13a   :  { %5529 = vmatpush3.bf16.msra.mxu1 %v5528_v4 }
 0x13b   :  { %5530 = vmatprep.subr.bf16.mxu1 %v6843_v0  ;;  %381 = vmatmul.mubr.f32.gmra.mrb[10].mxu0 %v237_v14 }
 0x13c   :  { %386 = vmatprep.mubr.f32.mxu0 %v6845_v1 }
 0x13e   :  { %5532 = vmatpush3.bf16.msra.mxu1 %v5531_v8 }
 0x13f   :  { %5533 = vmatprep.subr.bf16.mxu1 %v6843_v0  ;;  %387 = vmatmul.mubr.f32.gmra.mrb[12].mxu0 %v238_v15 }
 0x140   :  { %392 = vmatprep.mubr.f32.mxu0 %v6845_v1 }
 0x142   :  { %5535 = vmatpush3.bf16.msra.mxu1 %v5534_v12 }
 0x143   :  { %5552 = vmatprep.subr.bf16.mxu1 %v6843_v0  ;;  %393 = vmatmul.mubr.f32.gmra.mrb[14].mxu0 %v239_v16 }
 0x144   :  { %398 = vmatprep.mubr.f32.mxu0 %v6845_v1 }
 0x147   :  { %399 = vmatmul.mubr.f32.gmra.mrb[16].mxu0 %v240_v17 }
 0x148   :  { %404 = vmatprep.mubr.f32.mxu0 %v6845_v1 }
 0x14b   :  { %405 = vmatmul.mubr.f32.gmra.mrb[18].mxu0 %v241_v18 }
 0x14c   :  { %767 = vmatprep.mubr.f32.mxu0 %v6845_v1 }
 0x1fa   :  { %v352_v40 = vpop.f32.mrb[0].mxu0 }
 0x1fb   :  { %v354_v41 = vpop.f32.mrb[1].mxu0  ;;  %v353_v47 = vadd.f32 %v352_v40, %v7226_v45 }
 0x1fc   :  { %v355_v48 = vadd.f32 %v354_v41, %v7229_v46 }
 0x208   :  { %v590_v49 = vpop.f32.mrb[2].mxu1 }
 0x209   :  { %v595_v50 = vadd.f32 %v590_v49, %v353_v47  ;;  %v592_v51 = vpop.f32.mrb[3].mxu1 }
 0x20a   :  { %v596_v52 = vadd.f32 %v592_v51, %v355_v48  ;;  %v4591_v51 = vld [vmem:[%s8030_s6 + $0x48] sm:$0xff] }
 0x20b   :  { %v4584_v53 = vmul.f32 -1.442695, %v595_v50  ;;  %v4590_v50 = vld [vmem:[%s8030_s6 + $0x40] sm:$0xff] }
 0x20c   :  { %v4585_v19 = vmul.f32 -1.442695, %v596_v52 }
 0x20d   :  { %6283 = vpow2.f32 %v4584_v53  ;;  %v5553_v53 = vpack.c.bf16 %v4591_v51, %v4590_v50 }
 0x20e   :  { %6285 = vtanh.f32 %v596_v52  ;;  %v4592_v52 = vld [vmem:[%s8030_s6 + $0x50] sm:$0xff] }
 0x217   :  { %v6284_v54 = vpop.eup %6283 }
 0x218   :  { %v603_v55 = vadd.f32 1.0, %v6284_v54  ;;  %v6286_v56 = vpop.eup %6285  ;;  %v4593_v54 = vld [vmem:[%s8030_s6 + $0x58] sm:$0xff] }
 0x21a   :  { %6287 = vrcp.f32 %v603_v55  ;;  %v5556_v55 = vpack.c.bf16 %v4593_v54, %v4592_v52 }
 0x21b   :  { %6289 = vpow2.f32 %v4585_v19 }
 0x224   :  { %v6288_v57 = vpop.eup %6287 }
 0x225   :  { %v611_v58 = vmul.f32 %v6288_v57, %v6286_v56  ;;  %v6290_v22 = vpop.eup %6289  ;;  %v610_v24 = vmul.f32 0.0, %v6288_v57  ;;  %v4594_v56 = vld [vmem:[%s8030_s6 + $0x60] sm:$0xff]  ;;  %v4595_v57 = vld [vmem:[%s8030_s6 + $0x68] sm:$0xff] }
 0x226   :  { %v604_v23 = vadd.f32 1.0, %v6290_v22 }
 0x227   :  { %613 = vrot.lane.b32.xlu0 %v611_v58, %s6846_s9  ;;  %v5559_v58 = vpack.c.bf16 %v4595_v57, %v4594_v56 }
 0x228   :  { %6291 = vrcp.f32 %v604_v23  ;;  %v4602_v23 = vld [vmem:[%s8030_s6 + $0x80] sm:$0xff] }
 0x232   :  { %v6292_v29 = vpop.eup %6291 }
 0x299   :  { %v614_v25 = vpop.permute.xlu0 %613 }
 0x29a   :  { %v616_v26 = vadd.f32 %v614_v25, %v610_v24  ;;  %v4603_v24 = vld [vmem:[%s8030_s6 + $0x88] sm:$0xff]  ;;  %v4604_v25 = vld [vmem:[%s8030_s6 + $0x90] sm:$0xff] }
 0x29c   :  { %6293 = vtanh.f32 %v616_v26 }
 0x2a6   :  { %v6294_v30 = vpop.eup %6293 }
 0x2a7   :  { %v618_v31 = vmul.f32 %v6294_v30, %v6292_v29  ;;  %v4605_v29 = vld [vmem:[%s8030_s6 + $0x98] sm:$0xff] }
 0x2a8   :  { %v5584_v30 = vpack.c.bf16 %v4605_v29, %v4604_v25 }
 0x2a9   :  { %628 = vrot.lane.b32.xlu0 %v618_v31, %s6846_s9  ;;  %v4606_v31 = vld [vmem:[%s8030_s6 + $0xa0] sm:$0xff] }
 0x31b   :  { %v629_v32 = vpop.permute.xlu0 %628 }
 0x31c   :  { %5019 = vmatmul.mubr.msk.f32.vlgmr.msra.gmra.mrb[0].mxu1 %vm520_vm1, %v629_v32  ;;  %4587 = vmatmul.mubr.msk.f32.vlgmr.msra.gmra.mrb[2].mxu0 %vm520_vm1, %v629_v32  ;;  %v4607_v32 = vld [vmem:[%s8030_s6 + $0xa8] sm:$0xff] }
 0x31d   :  { %5567 = vmatpush1.bf16.msra.mxu0 %v7181_v20  ;;  %5037 = vmatprep.mubr.msk.f32.mxu1 %vm6844_vm0, %v6845_v1 }
 0x31e   :  { %5569 = vmatprep.subr.bf16.mxu0 %v7184_v21  ;;  %947 = vmatprep.mubr.f32.mxu0 %v6845_v1 }
 0x31f   :  { %5554 = vmatpush3.bf16.msra.mxu1 %v5553_v53 }
 0x320   :  { %5555 = vmatprep.subr.bf16.mxu1 %v6843_v0 }
 0x321   :  { %5571 = vmatpush1.bf16.msra.mxu0 %v7190_v27 }
 0x322   :  { %5573 = vmatprep.subr.bf16.mxu0 %v7194_v28 }
 0x323   :  { %5557 = vmatpush3.bf16.msra.mxu1 %v5556_v55 }
 0x324   :  { %5558 = vmatprep.subr.bf16.mxu1 %v6843_v0 }
 0x325   :  { %5575 = vmatpush1.bf16.msra.mxu0 %v7200_v33 }
 0x326   :  { %5577 = vmatprep.subr.bf16.mxu0 %v7204_v34 }
 0x327   :  { %5560 = vmatpush3.bf16.msra.mxu1 %v5559_v58 }
 0x328   :  { %5561 = vmatprep.subr.bf16.mxu1 %v6843_v0 }
 0x329   :  { %5579 = vmatpush1.bf16.msra.mxu0 %v7208_v37 }
 0x32a   :  { %5593 = vmatprep.subr.bf16.mxu0 %v7176_v13 }
 0x32b   :  { %5563 = vmatpush3.bf16.msra.mxu1 %v5562_v61 }
 0x32c   :  { %5580 = vmatprep.subr.bf16.mxu1 %v6843_v0 }
 0x3ef   :  { %v769_v35 = vpop.f32.mrb[2].mxu0 }
 0x3f0   :  { %v6184_v36 = vadd.f32 %v769_v35, %v7226_v45  ;;  %v771_v38 = vpop.f32.mrb[3].mxu0  ;;  %v5587_v35 = vpack.c.bf16 %v4607_v32, %v4606_v31 }
 0x3f1   :  { %v6185_v40 = vadd.f32 %v771_v38, %v7229_v46  ;;  %v4609_v38 = vld [vmem:[%s8030_s6 + $0xb8] sm:$0xff] }
 0x3f2   :  { %v4588_v39 = vmul.f32 -1.442695, %v6184_v36  ;;  %v4608_v36 = vld [vmem:[%s8030_s6 + $0xb0] sm:$0xff] }
 0x3f3   :  { %v4589_v62 = vmul.f32 -1.442695, %v6185_v40 }
 0x3f4   :  { %6295 = vpow2.f32 %v4588_v39  ;;  %v5590_v39 = vpack.c.bf16 %v4609_v38, %v4608_v36 }
 0x3f5   :  { %6297 = vtanh.f32 %v6185_v40 }
 0x3fe   :  { %v6296_v41 = vpop.eup %6295 }
 0x3ff   :  { %v782_v43 = vadd.f32 1.0, %v6296_v41  ;;  %v6298_v47 = vpop.eup %6297 }
 0x401   :  { %6299 = vrcp.f32 %v782_v43 }
 0x402   :  { %6301 = vpow2.f32 %v4589_v62 }
 0x40b   :  { %v6300_v48 = vpop.eup %6299 }
 0x40c   :  { %v790_v49 = vmul.f32 %v6300_v48, %v6298_v47  ;;  %v6302_v63 = vpop.eup %6301  ;;  %v789_v3 = vmul.f32 %v6300_v48, %v616_v26  ;;  %v5581_v26 = vpack.c.bf16 %v4603_v24, %v4602_v23 }
 0x40d   :  { %v783_v2 = vadd.f32 1.0, %v6302_v63 }
 0x40e   :  { %792 = vrot.lane.b32.xlu1 %v790_v49, %s6846_s9 }
 0x40f   :  { %6303 = vrcp.f32 %v783_v2  ;;  %v4614_v2 = vld [vmem:[%s8030_s6 + $0xc0] sm:$0xff] }
 0x419   :  { %v6304_v6 = vpop.eup %6303 }
 0x480   :  { %v793_v4 = vpop.permute.xlu1 %792 }
 0x481   :  { %v795_v5 = vadd.f32 %v793_v4, %v789_v3  ;;  %v4615_v3 = vld [vmem:[%s8030_s6 + $0xc8] sm:$0xff]  ;;  %v4616_v4 = vld [vmem:[%s8030_s6 + $0xd0] sm:$0xff] }
 0x483   :  { %6305 = vtanh.f32 %v795_v5 }
 0x48d   :  { %v6306_v7 = vpop.eup %6305 }
 0x48e   :  { %v797_v8 = vmul.f32 %v6306_v7, %v6304_v6  ;;  %v4617_v6 = vld [vmem:[%s8030_s6 + $0xd8] sm:$0xff] }
 0x48f   :  { %v5612_v7 = vpack.c.bf16 %v4617_v6, %v4616_v4 }
 0x490   :  { %808 = vrot.lane.b32.xlu1 %v797_v8, %s6846_s9  ;;  %v4618_v8 = vld [vmem:[%s8030_s6 + $0xe0] sm:$0xff] }
 0x502   :  { %v809_v9 = vpop.permute.xlu1 %808 }
 0x503   :  { %5038 = vmatmul.mubr.msk.f32.vlgmr.msra.gmra.mrb[0].mxu1 %vm520_vm1, %v809_v9  ;;  %4599 = vmatmul.mubr.msk.f32.vlgmr.msra.gmra.mrb[4].mxu0 %vm520_vm1, %v809_v9  ;;  %v4619_v9 = vld [vmem:[%s8030_s6 + $0xe8] sm:$0xff] }
 0x504   :  { %5595 = vmatpush1.bf16.msra.mxu0 %v7181_v20  ;;  %5056 = vmatprep.mubr.msk.f32.mxu1 %vm6844_vm0, %v6845_v1 }
 0x505   :  { %5597 = vmatprep.subr.bf16.mxu0 %v7184_v21  ;;  %1127 = vmatprep.mubr.f32.mxu0 %v6845_v1 }
 0x506   :  { %5582 = vmatpush3.bf16.msra.mxu1 %v5581_v26 }
 0x507   :  { %5583 = vmatprep.subr.bf16.mxu1 %v6843_v0 }
 0x508   :  { %5599 = vmatpush1.bf16.msra.mxu0 %v7190_v27 }
 0x509   :  { %5601 = vmatprep.subr.bf16.mxu0 %v7194_v28 }
 0x50a   :  { %5585 = vmatpush3.bf16.msra.mxu1 %v5584_v30 }
 0x50b   :  { %5586 = vmatprep.subr.bf16.mxu1 %v6843_v0 }
 0x50c   :  { %5603 = vmatpush1.bf16.msra.mxu0 %v7200_v33 }
 0x50d   :  { %5605 = vmatprep.subr.bf16.mxu0 %v7204_v34 }
 0x50e   :  { %5588 = vmatpush3.bf16.msra.mxu1 %v5587_v35 }
 0x50f   :  { %5589 = vmatprep.subr.bf16.mxu1 %v6843_v0 }
 0x510   :  { %5607 = vmatpush1.bf16.msra.mxu0 %v7208_v37 }
 0x511   :  { %5621 = vmatprep.subr.bf16.mxu0 %v7176_v13 }
 0x512   :  { %5591 = vmatpush3.bf16.msra.mxu1 %v5590_v39 }
 0x513   :  { %5608 = vmatprep.subr.bf16.mxu1 %v6843_v0 }
 0x5d6   :  { %v949_v10 = vpop.f32.mrb[4].mxu0 }
 0x5d7   :  { %v6186_v11 = vadd.f32 %v949_v10, %v7226_v45  ;;  %v951_v12 = vpop.f32.mrb[5].mxu0  ;;  %v5615_v10 = vpack.c.bf16 %v4619_v9, %v4618_v8 }
 0x5d8   :  { %v6187_v15 = vadd.f32 %v951_v12, %v7229_v46  ;;  %v4621_v12 = vld [vmem:[%s8030_s6 + $0xf8] sm:$0xff] }
 0x5d9   :  { %v4600_v14 = vmul.f32 -1.442695, %v6186_v11  ;;  %v4620_v11 = vld [vmem:[%s8030_s6 + $0xf0] sm:$0xff] }
 0x5da   :  { %v4601_v40 = vmul.f32 -1.442695, %v6187_v15 }
 0x5db   :  { %6307 = vpow2.f32 %v4600_v14  ;;  %v5618_v14 = vpack.c.bf16 %v4621_v12, %v4620_v11 }
 0x5dc   :  { %6309 = vtanh.f32 %v6187_v15 }
 0x5e5   :  { %v6308_v16 = vpop.eup %6307 }
 0x5e6   :  { %v962_v17 = vadd.f32 1.0, %v6308_v16  ;;  %v6310_v18 = vpop.eup %6309 }
 0x5e8   :  { %6311 = vrcp.f32 %v962_v17 }
 0x5e9   :  { %6313 = vpow2.f32 %v4601_v40 }
 0x5f2   :  { %v6312_v19 = vpop.eup %6311 }
 0x5f3   :  { %v970_v22 = vmul.f32 %v6312_v19, %v6310_v18  ;;  %v6314_v41 = vpop.eup %6313  ;;  %v969_v47 = vmul.f32 %v6312_v19, %v795_v5  ;;  %v5609_v5 = vpack.c.bf16 %v4615_v3, %v4614_v2 }
 0x5f4   :  { %v963_v43 = vadd.f32 1.0, %v6314_v41 }
 0x5f5   :  { %972 = vrot.lane.b32.xlu0 %v970_v22, %s6846_s9 }
 0x5f6   :  { %6315 = vrcp.f32 %v963_v43  ;;  %v4626_v43 = vld [vmem:[%s8030_s6 + $0x100] sm:$0xff] }
 0x600   :  { %v6316_v50 = vpop.eup %6315 }
 0x667   :  { %v973_v48 = vpop.permute.xlu0 %972 }
 0x668   :  { %v975_v49 = vadd.f32 %v973_v48, %v969_v47  ;;  %v4627_v47 = vld [vmem:[%s8030_s6 + $0x108] sm:$0xff]  ;;  %v4628_v48 = vld [vmem:[%s8030_s6 + $0x110] sm:$0xff] }
 0x66a   :  { %6317 = vtanh.f32 %v975_v49 }
 0x674   :  { %v6318_v51 = vpop.eup %6317 }
 0x675   :  { %v977_v52 = vmul.f32 %v6318_v51, %v6316_v50  ;;  %v4629_v50 = vld [vmem:[%s8030_s6 + $0x118] sm:$0xff] }
 0x676   :  { %v5640_v51 = vpack.c.bf16 %v4629_v50, %v4628_v48 }
 0x677   :  { %988 = vrot.lane.b32.xlu1 %v977_v52, %s6846_s9  ;;  %v4630_v52 = vld [vmem:[%s8030_s6 + $0x120] sm:$0xff] }
 0x6e9   :  { %v989_v53 = vpop.permute.xlu1 %988 }
 0x6ea   :  { %5057 = vmatmul.mubr.msk.f32.vlgmr.msra.gmra.mrb[0].mxu1 %vm520_vm1, %v989_v53  ;;  %4611 = vmatmul.mubr.msk.f32.vlgmr.msra.gmra.mrb[6].mxu0 %vm520_vm1, %v989_v53  ;;  %v4631_v53 = vld [vmem:[%s8030_s6 + $0x128] sm:$0xff] }
 0x6eb   :  { %5623 = vmatpush1.bf16.msra.mxu0 %v7181_v20  ;;  %5075 = vmatprep.mubr.msk.f32.mxu1 %vm6844_vm0, %v6845_v1 }
 0x6ec   :  { %5625 = vmatprep.subr.bf16.mxu0 %v7184_v21  ;;  %1307 = vmatprep.mubr.f32.mxu0 %v6845_v1 }
 0x6ed   :  { %5610 = vmatpush3.bf16.msra.mxu1 %v5609_v5 }
 0x6ee   :  { %5611 = vmatprep.subr.bf16.mxu1 %v6843_v0 }
 0x6ef   :  { %5627 = vmatpush1.bf16.msra.mxu0 %v7190_v27 }
 0x6f0   :  { %5629 = vmatprep.subr.bf16.mxu0 %v7194_v28 }
 0x6f1   :  { %5613 = vmatpush3.bf16.msra.mxu1 %v5612_v7 }
 0x6f2   :  { %5614 = vmatprep.subr.bf16.mxu1 %v6843_v0 }
 0x6f3   :  { %5631 = vmatpush1.bf16.msra.mxu0 %v7200_v33 }
 0x6f4   :  { %5633 = vmatprep.subr.bf16.mxu0 %v7204_v34 }
 0x6f5   :  { %5616 = vmatpush3.bf16.msra.mxu1 %v5615_v10 }
 0x6f6   :  { %5617 = vmatprep.subr.bf16.mxu1 %v6843_v0 }
 0x6f7   :  { %5635 = vmatpush1.bf16.msra.mxu0 %v7208_v37 }
 0x6f8   :  { %5649 = vmatprep.subr.bf16.mxu0 %v7176_v13 }
 0x6f9   :  { %5619 = vmatpush3.bf16.msra.mxu1 %v5618_v14 }
 0x6fa   :  { %5636 = vmatprep.subr.bf16.mxu1 %v6843_v0 }
 0x7bd   :  { %v1129_v54 = vpop.f32.mrb[6].mxu0 }
 0x7be   :  { %v6188_v55 = vadd.f32 %v1129_v54, %v7226_v45  ;;  %v1131_v56 = vpop.f32.mrb[7].mxu0  ;;  %v5643_v54 = vpack.c.bf16 %v4631_v53, %v4630_v52 }
 0x7bf   :  { %v6189_v58 = vadd.f32 %v1131_v56, %v7229_v46  ;;  %v4633_v56 = vld [vmem:[%s8030_s6 + $0x138] sm:$0xff] }
 0x7c0   :  { %v4612_v57 = vmul.f32 -1.442695, %v6188_v55  ;;  %v4632_v55 = vld [vmem:[%s8030_s6 + $0x130] sm:$0xff] }
 0x7c1   :  { %v4613_v15 = vmul.f32 -1.442695, %v6189_v58 }
 0x7c2   :  { %6319 = vpow2.f32 %v4612_v57  ;;  %v5646_v57 = vpack.c.bf16 %v4633_v56, %v4632_v55 }
 0x7c3   :  { %6321 = vtanh.f32 %v6189_v58 }
 0x7cc   :  { %v6320_v59 = vpop.eup %6319 }
 0x7cd   :  { %v1142_v60 = vadd.f32 1.0, %v6320_v59  ;;  %v6322_v61 = vpop.eup %6321 }
 0x7cf   :  { %6323 = vrcp.f32 %v1142_v60 }
 0x7d0   :  { %6325 = vpow2.f32 %v4613_v15 }
 0x7d9   :  { %v6324_v62 = vpop.eup %6323 }
 0x7da   :  { %v1150_v63 = vmul.f32 %v6324_v62, %v6322_v61  ;;  %v6326_v16 = vpop.eup %6325  ;;  %v1149_v18 = vmul.f32 %v6324_v62, %v975_v49  ;;  %v5637_v49 = vpack.c.bf16 %v4627_v47, %v4626_v43 }
 0x7db   :  { %v1143_v17 = vadd.f32 1.0, %v6326_v16 }
 0x7dc   :  { %1152 = vrot.lane.b32.xlu0 %v1150_v63, %s6846_s9 }
 0x7dd   :  { %6327 = vrcp.f32 %v1143_v17  ;;  %v4638_v17 = vld [vmem:[%s8030_s6 + $0x140] sm:$0xff] }
 0x7e7   :  { %v6328_v23 = vpop.eup %6327 }
 0x84e   :  { %v1153_v19 = vpop.permute.xlu0 %1152 }
 0x84f   :  { %v1155_v22 = vadd.f32 %v1153_v19, %v1149_v18  ;;  %v4639_v18 = vld [vmem:[%s8030_s6 + $0x148] sm:$0xff]  ;;  %v4640_v19 = vld [vmem:[%s8030_s6 + $0x150] sm:$0xff] }
 0x851   :  { %6329 = vtanh.f32 %v1155_v22 }
 0x85b   :  { %v6330_v24 = vpop.eup %6329 }
 0x85c   :  { %v1157_v25 = vmul.f32 %v6330_v24, %v6328_v23  ;;  %v4641_v23 = vld [vmem:[%s8030_s6 + $0x158] sm:$0xff] }
 0x85d   :  { %v5668_v24 = vpack.c.bf16 %v4641_v23, %v4640_v19 }
 0x85e   :  { %1168 = vrot.lane.b32.xlu1 %v1157_v25, %s6846_s9  ;;  %v4642_v25 = vld [vmem:[%s8030_s6 + $0x160] sm:$0xff] }
 0x8d0   :  { %v1169_v26 = vpop.permute.xlu1 %1168 }
 0x8d1   :  { %5076 = vmatmul.mubr.msk.f32.vlgmr.msra.gmra.mrb[0].mxu1 %vm520_vm1, %v1169_v26  ;;  %4623 = vmatmul.mubr.msk.f32.vlgmr.msra.gmra.mrb[8].mxu0 %vm520_vm1, %v1169_v26  ;;  %v4643_v26 = vld [vmem:[%s8030_s6 + $0x168] sm:$0xff] }
 0x8d2   :  { %5651 = vmatpush1.bf16.msra.mxu0 %v7181_v20  ;;  %5094 = vmatprep.mubr.msk.f32.mxu1 %vm6844_vm0, %v6845_v1 }
 0x8d3   :  { %5653 = vmatprep.subr.bf16.mxu0 %v7184_v21  ;;  %1487 = vmatprep.mubr.f32.mxu0 %v6845_v1 }
 0x8d4   :  { %5638 = vmatpush3.bf16.msra.mxu1 %v5637_v49 }
 0x8d5   :  { %5639 = vmatprep.subr.bf16.mxu1 %v6843_v0 }
 0x8d6   :  { %5655 = vmatpush1.bf16.msra.mxu0 %v7190_v27 }
 0x8d7   :  { %5657 = vmatprep.subr.bf16.mxu0 %v7194_v28 }
 0x8d8   :  { %5641 = vmatpush3.bf16.msra.mxu1 %v5640_v51 }
 0x8d9   :  { %5642 = vmatprep.subr.bf16.mxu1 %v6843_v0 }
 0x8da   :  { %5659 = vmatpush1.bf16.msra.mxu0 %v7200_v33 }
 0x8db   :  { %5661 = vmatprep.subr.bf16.mxu0 %v7204_v34 }
 0x8dc   :  { %5644 = vmatpush3.bf16.msra.mxu1 %v5643_v54 }
 0x8dd   :  { %5645 = vmatprep.subr.bf16.mxu1 %v6843_v0 }
 0x8de   :  { %5663 = vmatpush1.bf16.msra.mxu0 %v7208_v37 }
 0x8df   :  { %5677 = vmatprep.subr.bf16.mxu0 %v7176_v13 }
 0x8e0   :  { %5647 = vmatpush3.bf16.msra.mxu1 %v5646_v57 }
 0x8e1   :  { %5664 = vmatprep.subr.bf16.mxu1 %v6843_v0 }
 0x9a4   :  { %v1309_v29 = vpop.f32.mrb[8].mxu0 }
 0x9a5   :  { %v6190_v30 = vadd.f32 %v1309_v29, %v7226_v45  ;;  %v1311_v31 = vpop.f32.mrb[9].mxu0  ;;  %v5671_v29 = vpack.c.bf16 %v4643_v26, %v4642_v25 }
 0x9a6   :  { %v6191_v35 = vadd.f32 %v1311_v31, %v7229_v46  ;;  %v4645_v31 = vld [vmem:[%s8030_s6 + $0x178] sm:$0xff] }
 0x9a7   :  { %v4624_v32 = vmul.f32 -1.442695, %v6190_v30  ;;  %v4644_v30 = vld [vmem:[%s8030_s6 + $0x170] sm:$0xff] }
 0x9a8   :  { %v4625_v58 = vmul.f32 -1.442695, %v6191_v35 }
 0x9a9   :  { %6331 = vpow2.f32 %v4624_v32  ;;  %v5674_v32 = vpack.c.bf16 %v4645_v31, %v4644_v30 }
 0x9aa   :  { %6333 = vtanh.f32 %v6191_v35 }
 0x9b3   :  { %v6332_v36 = vpop.eup %6331 }
 0x9b4   :  { %v1322_v38 = vadd.f32 1.0, %v6332_v36  ;;  %v6334_v39 = vpop.eup %6333 }
 0x9b6   :  { %6335 = vrcp.f32 %v1322_v38 }
 0x9b7   :  { %6337 = vpow2.f32 %v4625_v58 }
 0x9c0   :  { %v6336_v40 = vpop.eup %6335 }
 0x9c1   :  { %v1330_v41 = vmul.f32 %v6336_v40, %v6334_v39  ;;  %v6338_v59 = vpop.eup %6337  ;;  %v1329_v61 = vmul.f32 %v6336_v40, %v1155_v22  ;;  %v5665_v22 = vpack.c.bf16 %v4639_v18, %v4638_v17 }
 0x9c2   :  { %v1323_v60 = vadd.f32 1.0, %v6338_v59 }
 0x9c3   :  { %1332 = vrot.lane.b32.xlu0 %v1330_v41, %s6846_s9 }
 0x9c4   :  { %6339 = vrcp.f32 %v1323_v60  ;;  %v4650_v60 = vld [vmem:[%s8030_s6 + $0x180] sm:$0xff] }
 0x9ce   :  { %v6340_v2 = vpop.eup %6339 }
 0xa35   :  { %v1333_v62 = vpop.permute.xlu0 %1332 }
 0xa36   :  { %v1335_v63 = vadd.f32 %v1333_v62, %v1329_v61  ;;  %v4651_v61 = vld [vmem:[%s8030_s6 + $0x188] sm:$0xff]  ;;  %v4652_v62 = vld [vmem:[%s8030_s6 + $0x190] sm:$0xff] }
 0xa38   :  { %6341 = vtanh.f32 %v1335_v63 }
 0xa42   :  { %v6342_v3 = vpop.eup %6341 }
 0xa43   :  { %v1337_v4 = vmul.f32 %v6342_v3, %v6340_v2  ;;  %v4653_v2 = vld [vmem:[%s8030_s6 + $0x198] sm:$0xff] }
 0xa44   :  { %v5696_v3 = vpack.c.bf16 %v4653_v2, %v4652_v62 }
 0xa45   :  { %1348 = vrot.lane.b32.xlu1 %v1337_v4, %s6846_s9  ;;  %v4654_v4 = vld [vmem:[%s8030_s6 + $0x1a0] sm:$0xff] }
 0xab7   :  { %v1349_v5 = vpop.permute.xlu1 %1348 }
 0xab8   :  { %5095 = vmatmul.mubr.msk.f32.vlgmr.msra.gmra.mrb[0].mxu1 %vm520_vm1, %v1349_v5  ;;  %4635 = vmatmul.mubr.msk.f32.vlgmr.msra.gmra.mrb[10].mxu0 %vm520_vm1, %v1349_v5  ;;  %v4655_v5 = vld [vmem:[%s8030_s6 + $0x1a8] sm:$0xff] }
 0xab9   :  { %5679 = vmatpush1.bf16.msra.mxu0 %v7181_v20  ;;  %5113 = vmatprep.mubr.msk.f32.mxu1 %vm6844_vm0, %v6845_v1 }
 0xaba   :  { %5681 = vmatprep.subr.bf16.mxu0 %v7184_v21  ;;  %1667 = vmatprep.mubr.f32.mxu0 %v6845_v1 }
 0xabb   :  { %5666 = vmatpush3.bf16.msra.mxu1 %v5665_v22 }
 0xabc   :  { %5667 = vmatprep.subr.bf16.mxu1 %v6843_v0 }
 0xabd   :  { %5683 = vmatpush1.bf16.msra.mxu0 %v7190_v27 }
 0xabe   :  { %5685 = vmatprep.subr.bf16.mxu0 %v7194_v28 }
 0xabf   :  { %5669 = vmatpush3.bf16.msra.mxu1 %v5668_v24 }
 0xac0   :  { %5670 = vmatprep.subr.bf16.mxu1 %v6843_v0 }
 0xac1   :  { %5687 = vmatpush1.bf16.msra.mxu0 %v7200_v33 }
 0xac2   :  { %5689 = vmatprep.subr.bf16.mxu0 %v7204_v34 }
 0xac3   :  { %5672 = vmatpush3.bf16.msra.mxu1 %v5671_v29 }
 0xac4   :  { %5673 = vmatprep.subr.bf16.mxu1 %v6843_v0 }
 0xac5   :  { %5691 = vmatpush1.bf16.msra.mxu0 %v7208_v37 }
 0xac6   :  { %5705 = vmatprep.subr.bf16.mxu0 %v7176_v13 }
 0xac7   :  { %5675 = vmatpush3.bf16.msra.mxu1 %v5674_v32 }
 0xac8   :  { %5692 = vmatprep.subr.bf16.mxu1 %v6843_v0 }
 0xb8b   :  { %v1489_v6 = vpop.f32.mrb[10].mxu0 }
 0xb8c   :  { %v6192_v7 = vadd.f32 %v1489_v6, %v7226_v45  ;;  %v1491_v8 = vpop.f32.mrb[11].mxu0  ;;  %v5699_v6 = vpack.c.bf16 %v4655_v5, %v4654_v4 }
 0xb8d   :  { %v6193_v10 = vadd.f32 %v1491_v8, %v7229_v46  ;;  %v4657_v8 = vld [vmem:[%s8030_s6 + $0x1b8] sm:$0xff] }
 0xb8e   :  { %v4636_v9 = vmul.f32 -1.442695, %v6192_v7  ;;  %v4656_v7 = vld [vmem:[%s8030_s6 + $0x1b0] sm:$0xff] }
 0xb8f   :  { %v4637_v35 = vmul.f32 -1.442695, %v6193_v10 }
 0xb90   :  { %6343 = vpow2.f32 %v4636_v9  ;;  %v5702_v9 = vpack.c.bf16 %v4657_v8, %v4656_v7  ;;  %v4677_v8 = vld [vmem:[%s8030_s6 + $0x218] sm:$0xff] }
 0xb91   :  { %6345 = vtanh.f32 %v6193_v10 }
 0xb9a   :  { %v6344_v11 = vpop.eup %6343 }
 0xb9b   :  { %v1502_v12 = vadd.f32 1.0, %v6344_v11  ;;  %v6346_v14 = vpop.eup %6345 }
 0xb9d   :  { %6347 = vrcp.f32 %v1502_v12 }
 0xb9e   :  { %6349 = vpow2.f32 %v4637_v35 }
 0xba7   :  { %v6348_v15 = vpop.eup %6347 }
 0xba8   :  { %v1510_v16 = vmul.f32 %v6348_v15, %v6346_v14  ;;  %v6350_v36 = vpop.eup %6349  ;;  %v1509_v39 = vmul.f32 %v6348_v15, %v1335_v63  ;;  %v5693_v63 = vpack.c.bf16 %v4651_v61, %v4650_v60 }
 0xba9   :  { %v1503_v38 = vadd.f32 1.0, %v6350_v36 }
 0xbaa   :  { %1512 = vrot.lane.b32.xlu0 %v1510_v16, %s6846_s9 }
 0xbab   :  { %6351 = vrcp.f32 %v1503_v38  ;;  %v4663_v38 = vld [vmem:[%s8030_s6 + $0x1c8] sm:$0xff] }
 0xbb5   :  { %v6352_v43 = vpop.eup %6351 }
 0xc1c   :  { %v1513_v40 = vpop.permute.xlu0 %1512 }
 0xc1d   :  { %v1515_v41 = vadd.f32 %v1513_v40, %v1509_v39  ;;  %v4664_v39 = vld [vmem:[%s8030_s6 + $0x1d0] sm:$0xff] }
 0xc1f   :  { %6353 = vtanh.f32 %v1515_v41 }
 0xc29   :  { %v6354_v47 = vpop.eup %6353 }
 0xc2a   :  { %v1517_v48 = vmul.f32 %v6354_v47, %v6352_v43  ;;  %v4666_v47 = vld [vmem:[%s8030_s6 + $0x1e0] sm:$0xff] }
 0xc2c   :  { %1528 = vrot.lane.b32.xlu1 %v1517_v48, %s6846_s9  ;;  %v4667_v48 = vld [vmem:[%s8030_s6 + $0x1e8] sm:$0xff] }
 0xc9e   :  { %v1529_v49 = vpop.permute.xlu1 %1528 }
 0xc9f   :  { %5114 = vmatmul.mubr.msk.f32.vlgmr.msra.gmra.mrb[0].mxu1 %vm520_vm1, %v1529_v49  ;;  %4647 = vmatmul.mubr.msk.f32.vlgmr.msra.gmra.mrb[12].mxu0 %vm520_vm1, %v1529_v49  ;;  %v5727_v49 = vpack.c.bf16 %v4667_v48, %v4666_v47  ;;  %v4686_v47 = vld [vmem:[%s8030_s6 + $0x240] sm:$0xff] }
 0xca0   :  { %5707 = vmatpush1.bf16.msra.mxu0 %v7181_v20  ;;  %5132 = vmatprep.mubr.msk.f32.mxu1 %vm6844_vm0, %v6845_v1 }
 0xca1   :  { %5709 = vmatprep.subr.bf16.mxu0 %v7184_v21  ;;  %1847 = vmatprep.mubr.f32.mxu0 %v6845_v1 }
 0xca2   :  { %5694 = vmatpush3.bf16.msra.mxu1 %v5693_v63 }
 0xca3   :  { %5695 = vmatprep.subr.bf16.mxu1 %v6843_v0 }
 0xca4   :  { %5711 = vmatpush1.bf16.msra.mxu0 %v7190_v27 }
 0xca5   :  { %5713 = vmatprep.subr.bf16.mxu0 %v7194_v28 }
 0xca6   :  { %5697 = vmatpush3.bf16.msra.mxu1 %v5696_v3 }
 0xca7   :  { %5698 = vmatprep.subr.bf16.mxu1 %v6843_v0 }
 0xca8   :  { %5715 = vmatpush1.bf16.msra.mxu0 %v7200_v33 }
 0xca9   :  { %5717 = vmatprep.subr.bf16.mxu0 %v7204_v34 }
 0xcaa   :  { %5700 = vmatpush3.bf16.msra.mxu1 %v5699_v6  ;;  %v4676_v6 = vld [vmem:[%s8030_s6 + $0x210] sm:$0xff] }
 0xcab   :  { %5701 = vmatprep.subr.bf16.mxu1 %v6843_v0 }
 0xcac   :  { %5719 = vmatpush1.bf16.msra.mxu0 %v7208_v37 }
 0xcad   :  { %5733 = vmatprep.subr.bf16.mxu0 %v7176_v13 }
 0xcae   :  { %5703 = vmatpush3.bf16.msra.mxu1 %v5702_v9  ;;  %v5752_v9 = vpack.c.bf16 %v4677_v8, %v4676_v6  ;;  %v2328_v6 = vld [vmem:[#allocation9 + $0x20] sm:$0xff] }
 0xcaf   :  { %5720 = vmatprep.subr.bf16.mxu1 %v6843_v0 }
 0xd72   :  { %v1669_v50 = vpop.f32.mrb[12].mxu0 }
 0xd73   :  { %v6194_v51 = vadd.f32 %v1669_v50, %v7226_v45  ;;  %v1671_v52 = vpop.f32.mrb[13].mxu0  ;;  %v4668_v50 = vld [vmem:[%s8030_s6 + $0x1f0] sm:$0xff] }
 0xd74   :  { %v6195_v54 = vadd.f32 %v1671_v52, %v7229_v46 }
 0xd75   :  { %v4648_v53 = vmul.f32 -1.442695, %v6194_v51  ;;  %v4669_v51 = vld [vmem:[%s8030_s6 + $0x1f8] sm:$0xff] }
 0xd76   :  { %v4649_v10 = vmul.f32 -1.442695, %v6195_v54  ;;  %v5730_v52 = vpack.c.bf16 %v4669_v51, %v4668_v50  ;;  %v4690_v51 = vld [vmem:[%s8030_s6 + $0x260] sm:$0xff] }
 0xd77   :  { %6355 = vpow2.f32 %v4648_v53 }
 0xd78   :  { %6357 = vtanh.f32 %v6195_v54 }
 0xd81   :  { %v6356_v55 = vpop.eup %6355 }
 0xd82   :  { %v1682_v56 = vadd.f32 1.0, %v6356_v55  ;;  %v6358_v57 = vpop.eup %6357 }
 0xd84   :  { %6359 = vrcp.f32 %v1682_v56 }
 0xd85   :  { %6361 = vpow2.f32 %v4649_v10  ;;  %v4678_v10 = vld [vmem:[%s8030_s6 + $0x220] sm:$0xff] }
 0xd8e   :  { %v6360_v58 = vpop.eup %6359 }
 0xd8f   :  { %v1690_v59 = vmul.f32 %v6360_v58, %v6358_v57  ;;  %v6362_v11 = vpop.eup %6361  ;;  %v1689_v14 = vmul.f32 %v6360_v58, %v1515_v41  ;;  %v4665_v41 = vld [vmem:[%s8030_s6 + $0x1d8] sm:$0xff] }
 0xd90   :  { %v1683_v12 = vadd.f32 1.0, %v6362_v11  ;;  %v5724_v43 = vpack.c.bf16 %v4665_v41, %v4664_v39  ;;  %v4679_v11 = vld [vmem:[%s8030_s6 + $0x228] sm:$0xff] }
 0xd91   :  { %1692 = vrot.lane.b32.xlu0 %v1690_v59, %s6846_s9 }
 0xd92   :  { %6363 = vrcp.f32 %v1683_v12  ;;  %v5755_v12 = vpack.c.bf16 %v4679_v11, %v4678_v10  ;;  %v2335_v10 = vld [vmem:[#allocation9 + $0x58] sm:$0xff] }
 0xd9c   :  { %v6364_v17 = vpop.eup %6363 }
 0xe03   :  { %v1693_v15 = vpop.permute.xlu0 %1692 }
 0xe04   :  { %v1695_v16 = vadd.f32 %v1693_v15, %v1689_v14  ;;  %v4680_v14 = vld [vmem:[%s8030_s6 + $0x230] sm:$0xff]  ;;  %v4681_v15 = vld [vmem:[%s8030_s6 + $0x238] sm:$0xff] }
 0xe06   :  { %6365 = vtanh.f32 %v1695_v16 }
 0xe10   :  { %v6366_v18 = vpop.eup %6365 }
 0xe11   :  { %v1697_v19 = vmul.f32 %v6366_v18, %v6364_v17 }
 0xe13   :  { %1708 = vrot.lane.b32.xlu1 %v1697_v19, %s6846_s9 }
 0xe85   :  { %v1709_v22 = vpop.permute.xlu1 %1708 }
 0xe86   :  { %5133 = vmatmul.mubr.msk.f32.vlgmr.msra.gmra.mrb[0].mxu1 %vm520_vm1, %v1709_v22  ;;  %4659 = vmatmul.mubr.msk.f32.vlgmr.msra.gmra.mrb[14].mxu0 %vm520_vm1, %v1709_v22 }
 0xe87   :  { %5735 = vmatpush1.bf16.msra.mxu0 %v7181_v20  ;;  %5151 = vmatprep.mubr.msk.f32.mxu1 %vm6844_vm0, %v6845_v1 }
 0xe88   :  { %5737 = vmatprep.subr.bf16.mxu0 %v7184_v21  ;;  %2027 = vmatprep.mubr.f32.mxu0 %v6845_v1 }
 0xe8b   :  { %5739 = vmatpush1.bf16.msra.mxu0 %v7190_v27 }
 0xe8c   :  { %5741 = vmatprep.subr.bf16.mxu0 %v7194_v28 }
 0xe8f   :  { %5743 = vmatpush1.bf16.msra.mxu0 %v7200_v33 }
 0xe90   :  { %5745 = vmatprep.subr.bf16.mxu0 %v7204_v34 }
 0xe93   :  { %5747 = vmatpush1.bf16.msra.mxu0 %v7208_v37 }
 0xe94   :  { %5761 = vmatprep.subr.bf16.mxu0 %v7176_v13  ;;  %v4662_v13 = vld [vmem:[%s8030_s6 + $0x1c0] sm:$0xff] }
 0xe95   :  { %v5721_v40 = vpack.c.bf16 %v4663_v38, %v4662_v13 }
 0xe97   :  { %5722 = vmatpush3.bf16.msra.mxu1 %v5721_v40 }
 0xe98   :  { %5723 = vmatprep.subr.bf16.mxu1 %v6843_v0 }
 0xe9b   :  { %5725 = vmatpush3.bf16.msra.mxu1 %v5724_v43 }
 0xe9c   :  { %5726 = vmatprep.subr.bf16.mxu1 %v6843_v0 }
 0xe9f   :  { %5728 = vmatpush3.bf16.msra.mxu1 %v5727_v49  ;;  %v4689_v49 = vld [vmem:[%s8030_s6 + $0x258] sm:$0xff] }
 0xea0   :  { %5729 = vmatprep.subr.bf16.mxu1 %v6843_v0 }
 0xea3   :  { %5731 = vmatpush3.bf16.msra.mxu1 %v5730_v52  ;;  %v4691_v52 = vld [vmem:[%s8030_s6 + $0x268] sm:$0xff] }
 0xea4   :  { %5748 = vmatprep.subr.bf16.mxu1 %v6843_v0 }
 0xf59   :  { %v1849_v23 = vpop.f32.mrb[14].mxu0 }
 0xf5a   :  { %v6196_v24 = vadd.f32 %v1849_v23, %v7226_v45  ;;  %v1851_v25 = vpop.f32.mrb[15].mxu0 }
 0xf5b   :  { %v6197_v29 = vadd.f32 %v1851_v25, %v7229_v46 }
 0xf5c   :  { %v4660_v26 = vmul.f32 -1.442695, %v6196_v24 }
 0xf5d   :  { %v4661_v53 = vmul.f32 -1.442695, %v6197_v29 }
 0xf5e   :  { %6367 = vpow2.f32 %v4660_v26 }
 0xf5f   :  { %6369 = vtanh.f32 %v6197_v29 }
 0xf68   :  { %v6368_v30 = vpop.eup %6367 }
 0xf69   :  { %v1862_v31 = vadd.f32 1.0, %v6368_v30  ;;  %v6370_v32 = vpop.eup %6369 }
 0xf6b   :  { %6371 = vrcp.f32 %v1862_v31 }
 0xf6c   :  { %6373 = vpow2.f32 %v4661_v53  ;;  %v5783_v53 = vpack.c.bf16 %v4691_v52, %v4690_v51  ;;  %v2352_v52 = vld [vmem:[#allocation9 + $0xe0] sm:$0xff] }
 0xf75   :  { %v6372_v35 = vpop.eup %6371 }
 0xf76   :  { %v1870_v36 = vmul.f32 %v6372_v35, %v6370_v32  ;;  %v6374_v54 = vpop.eup %6373  ;;  %v1869_v56 = vmul.f32 %v6372_v35, %v1695_v16  ;;  %v5758_v16 = vpack.c.bf16 %v4681_v15, %v4680_v14  ;;  %v2332_v14 = vld [vmem:[#allocation9 + $0x40] sm:$0xff]  ;;  %v2334_v15 = vld [vmem:[#allocation9 + $0x50] sm:$0xff] }
 0xf77   :  { %v1863_v55 = vadd.f32 1.0, %v6374_v54  ;;  %v4692_v54 = vld [vmem:[%s8030_s6 + $0x270] sm:$0xff] }
 0xf78   :  { %1872 = vrot.lane.b32.xlu0 %v1870_v36, %s6846_s9 }
 0xf79   :  { %6375 = vrcp.f32 %v1863_v55  ;;  %v4693_v55 = vld [vmem:[%s8030_s6 + $0x278] sm:$0xff] }
 0xf83   :  { %v6376_v59 = vpop.eup %6375 }
 0xfea   :  { %v1873_v57 = vpop.permute.xlu0 %1872 }
 0xfeb   :  { %v1875_v58 = vadd.f32 %v1873_v57, %v1869_v56  ;;  %v5786_v56 = vpack.c.bf16 %v4693_v55, %v4692_v54  ;;  %v2444_v55 = vld [vmem:[#allocation12] sm:$0xff] }
 0xfed   :  { %6377 = vtanh.f32 %v1875_v58 }
 0xff7   :  { %v6378_v60 = vpop.eup %6377 }
 0xff8   :  { %v1877_v61 = vmul.f32 %v6378_v60, %v6376_v59 }
 0xffa   :  { %1888 = vrot.lane.b32.xlu1 %v1877_v61, %s6846_s9 }
0x106c   :  { %v1889_v62 = vpop.permute.xlu1 %1888 }
0x106d   :  { %5152 = vmatmul.mubr.msk.f32.vlgmr.msra.gmra.mrb[0].mxu1 %vm520_vm1, %v1889_v62  ;;  %4671 = vmatmul.mubr.msk.f32.vlgmr.msra.gmra.mrb[16].mxu0 %vm520_vm1, %v1889_v62 }
0x106e   :  { %5763 = vmatpush1.bf16.msra.mxu0 %v7181_v20  ;;  %5170 = vmatprep.mubr.msk.f32.mxu1 %vm6844_vm0, %v6845_v1 }
0x106f   :  { %5765 = vmatprep.subr.bf16.mxu0 %v7184_v21  ;;  %2207 = vmatprep.mubr.f32.mxu0 %v6845_v1 }
0x1072   :  { %5767 = vmatpush1.bf16.msra.mxu0 %v7190_v27 }
0x1073   :  { %5769 = vmatprep.subr.bf16.mxu0 %v7194_v28 }
0x1076   :  { %5771 = vmatpush1.bf16.msra.mxu0 %v7200_v33 }
0x1077   :  { %5773 = vmatprep.subr.bf16.mxu0 %v7204_v34  ;;  %v4674_v34 = vld [vmem:[%s8030_s6 + $0x200] sm:$0xff] }
0x107a   :  { %5775 = vmatpush1.bf16.msra.mxu0 %v7208_v37  ;;  %v4675_v37 = vld [vmem:[%s8030_s6 + $0x208] sm:$0xff] }
0x107b   :  { %5820 = vmatprep.subr.bf16.mxu0 %v6843_v0  ;;  %v5749_v7 = vpack.c.bf16 %v4675_v37, %v4674_v34 }
0x107d   :  { %5750 = vmatpush3.bf16.msra.mxu1 %v5749_v7  ;;  %v2330_v7 = vld [vmem:[#allocation9 + $0x30] sm:$0xff] }
0x107e   :  { %5751 = vmatprep.subr.bf16.mxu1 %v6843_v0  ;;  %v5794_v11 = vpack.c.bf16 %v2330_v7, %v2328_v6  ;;  %v2454_v6 = vld [vmem:[#allocation12 + $0x50] sm:$0xff]  ;;  %v2455_v7 = vld [vmem:[#allocation12 + $0x58] sm:$0xff] }
0x1081   :  { %5753 = vmatpush3.bf16.msra.mxu1 %v5752_v9  ;;  %v2333_v9 = vld [vmem:[#allocation9 + $0x48] sm:$0xff] }
0x1082   :  { %5754 = vmatprep.subr.bf16.mxu1 %v6843_v0 }
0x1085   :  { %5756 = vmatpush3.bf16.msra.mxu1 %v5755_v12  ;;  %v5796_v12 = vpack.c.bf16 %v2335_v10, %v2333_v9  ;;  %v2456_v9 = vld [vmem:[#allocation12 + $0x60] sm:$0xff]  ;;  %v2457_v10 = vld [vmem:[#allocation12 + $0x68] sm:$0xff] }
0x1086   :  { %5757 = vmatprep.subr.bf16.mxu1 %v6843_v0 }
0x1089   :  { %5759 = vmatpush3.bf16.msra.mxu1 %v5758_v16  ;;  %v2337_v16 = vld [vmem:[#allocation9 + $0x68] sm:$0xff] }
0x108a   :  { %5776 = vmatprep.subr.bf16.mxu1 %v6843_v0 }
0x1140   :  { %v2029_v20 = vpop.f32.mrb[16].mxu0 }
0x1141   :  { %v6198_v63 = vadd.f32 %v2029_v20, %v7226_v45  ;;  %v2031_v2 = vpop.f32.mrb[17].mxu0  ;;  %v2325_v20 = vld [vmem:[#allocation9 + $0x8] sm:$0xff] }
0x1142   :  { %v6199_v21 = vadd.f32 %v2031_v2, %v7229_v46 }
0x1143   :  { %v4672_v3 = vmul.f32 -1.442695, %v6198_v63  ;;  %v2327_v63 = vld [vmem:[#allocation9 + $0x18] sm:$0xff] }
0x1144   :  { %v4673_v17 = vmul.f32 -1.442695, %v6199_v21  ;;  %v5788_v2 = vpack.c.bf16 %v2327_v63, %v2325_v20  ;;  %v4583_v63 = vld [vmem:[%s8032_s8] ss:$0 sm:$0xff] }
0x1145   :  { %6379 = vpow2.f32 %v4672_v3 }
0x1146   :  { %6381 = vtanh.f32 %v6199_v21 }
0x114f   :  { %v6380_v4 = vpop.eup %6379 }
0x1150   :  { %v2042_v27 = vadd.f32 1.0, %v6380_v4  ;;  %v6382_v28 = vpop.eup %6381 }
0x1152   :  { %6383 = vrcp.f32 %v2042_v27  ;;  %v2324_v27 = vld [vmem:[#allocation9] sm:$0xff] }
0x1153   :  { %6385 = vpow2.f32 %v4673_v17  ;;  %v2339_v17 = vld [vmem:[#allocation9 + $0x78] sm:$0xff] }
0x115c   :  { %v6384_v33 = vpop.eup %6383 }
0x115d   :  { %v2050_v5 = vmul.f32 %v6384_v33, %v6382_v28  ;;  %v6386_v18 = vpop.eup %6385  ;;  %v2049_v22 = vmul.f32 %v6384_v33, %v1875_v58  ;;  %v2326_v28 = vld [vmem:[#allocation9 + $0x10] sm:$0xff]  ;;  %v2329_v33 = vld [vmem:[#allocation9 + $0x28] sm:$0xff] }
0x115e   :  { %v2043_v19 = vadd.f32 1.0, %v6386_v18  ;;  %v5790_v34 = vpack.c.bf16 %v2326_v28, %v2324_v27  ;;  %v5798_v18 = vpack.c.bf16 %v2334_v15, %v2332_v14  ;;  %v2450_v27 = vld [vmem:[#allocation12 + $0x30] sm:$0xff]  ;;  %v2451_v28 = vld [vmem:[#allocation12 + $0x38] sm:$0xff] }
0x115f   :  { %2052 = vrot.lane.b32.xlu0 %v2050_v5, %s6846_s9  ;;  %v2331_v5 = vld [vmem:[#allocation9 + $0x38] sm:$0xff] }
0x1160   :  { %6387 = vrcp.f32 %v2043_v19  ;;  %v5792_v37 = vpack.c.bf16 %v2331_v5, %v2329_v33  ;;  %v5800_v19 = vpack.c.bf16 %v2339_v17, %v2337_v16  ;;  %v5830_v33 = vpack.c.bf16 %v2451_v28, %v2450_v27  ;;  %v2452_v5 = vld [vmem:[#allocation12 + $0x40] sm:$0xff]  ;;  %v2459_v14 = vld [vmem:[#allocation12 + $0x78] sm:$0xff]  ;;  %v2539_v16 = vld [vmem:[#allocation15 + $0x8] sm:$0xff] }
0x1161   :  { %v2541_v17 = vld [vmem:[#allocation15 + $0x18] sm:$0xff] }
0x116a   :  { %v6388_v25 = vpop.eup %6387 }
0x11d1   :  { %v2053_v23 = vpop.permute.xlu0 %2052 }
0x11d2   :  { %v2055_v24 = vadd.f32 %v2053_v23, %v2049_v22  ;;  %v2336_v22 = vld [vmem:[#allocation9 + $0x60] sm:$0xff]  ;;  %v2338_v23 = vld [vmem:[#allocation9 + $0x70] sm:$0xff] }
0x11d4   :  { %6389 = vtanh.f32 %v2055_v24 }
0x11de   :  { %v6390_v26 = vpop.eup %6389 }
0x11df   :  { %v2057_v29 = vmul.f32 %v6390_v26, %v6388_v25  ;;  %v2343_v25 = vld [vmem:[#allocation9 + $0x98] sm:$0xff]  ;;  %v5802_v26 = vpack.c.bf16 %v2338_v23, %v2336_v22  ;;  %v2543_v23 = vld [vmem:[#allocation15 + $0x28] sm:$0xff] }
0x11e0   :  { %v2540_v22 = vld [vmem:[#allocation15 + $0x10] sm:$0xff] }
0x11e1   :  { %2068 = vrot.lane.b32.xlu1 %v2057_v29, %s6846_s9 }
0x1253   :  { %v2069_v30 = vpop.permute.xlu1 %2068 }
0x1254   :  { %5171 = vmatmul.mubr.msk.f32.vlgmr.msra.gmra.mrb[0].mxu1 %vm520_vm1, %v2069_v30  ;;  %4683 = vmatmul.mubr.msk.f32.vlgmr.msra.gmra.mrb[18].mxu0 %vm520_vm1, %v2069_v30  ;;  %v2340_v30 = vld [vmem:[#allocation9 + $0x80] sm:$0xff] }
0x1255   :  { %5189 = vmatprep.mubr.msk.f32.mxu1 %vm6844_vm0, %v6845_v1  ;;  %5224 = vmatprep.mubr.msk.f32.mxu0 %vm6844_vm0, %v6845_v1 }
0x1327   :  { %v2209_v31 = vpop.f32.mrb[18].mxu0 }
0x1328   :  { %v6200_v32 = vadd.f32 %v2209_v31, %v7226_v45  ;;  %v2211_v35 = vpop.f32.mrb[19].mxu0  ;;  %v4687_v45 = vld [vmem:[%s8030_s6 + $0x248] sm:$0xff]  ;;  %v2342_v31 = vld [vmem:[#allocation9 + $0x90] sm:$0xff] }
0x1329   :  { %v6201_v13 = vadd.f32 %v2211_v35, %v7229_v46  ;;  %v4688_v46 = vld [vmem:[%s8030_s6 + $0x250] sm:$0xff]  ;;  %v5777_v48 = vpack.c.bf16 %v4687_v45, %v4686_v47  ;;  %v2347_v35 = vld [vmem:[#allocation9 + $0xb8] sm:$0xff]  ;;  %v2348_v45 = vld [vmem:[#allocation9 + $0xc0] sm:$0xff] }
0x132a   :  { %v4684_v36 = vmul.f32 -1.442695, %v6200_v32  ;;  %v5780_v50 = vpack.c.bf16 %v4689_v49, %v4688_v46  ;;  %v2345_v32 = vld [vmem:[#allocation9 + $0xa8] sm:$0xff]  ;;  %v2350_v46 = vld [vmem:[#allocation9 + $0xd0] sm:$0xff] }
0x132b   :  { %5778 = vmatpush3.bf16.msra.mxu1 %v5777_v48  ;;  %v4685_v57 = vmul.f32 -1.442695, %v6201_v13  ;;  %v5814_v48 = vpack.c.bf16 %v2350_v46, %v2348_v45  ;;  %v2353_v49 = vld [vmem:[#allocation9 + $0xe8] sm:$0xff]  ;;  %v2552_v45 = vld [vmem:[#allocation15 + $0x70] sm:$0xff] }
0x132c   :  { %6391 = vpow2.f32 %v4684_v36  ;;  %5779 = vmatprep.subr.bf16.mxu1 %v6843_v0  ;;  %v5806_v36 = vpack.c.bf16 %v2342_v31, %v2340_v30  ;;  %v2544_v30 = vld [vmem:[#allocation15 + $0x30] sm:$0xff]  ;;  %v2547_v31 = vld [vmem:[#allocation15 + $0x48] sm:$0xff] }
0x132d   :  { %6393 = vtanh.f32 %v6201_v13  ;;  %v5808_v13 = vpack.c.bf16 %v2347_v35, %v2345_v32  ;;  %v2549_v32 = vld [vmem:[#allocation15 + $0x58] sm:$0xff]  ;;  %v2555_v46 = vld [vmem:[#allocation15 + $0x88] sm:$0xff] }
0x132f   :  { %5781 = vmatpush3.bf16.msra.mxu1 %v5780_v50  ;;  %v2355_v50 = vld [vmem:[#allocation9 + $0xf8] sm:$0xff] }
0x1330   :  { %5782 = vmatprep.subr.bf16.mxu1 %v6843_v0  ;;  %v5816_v51 = vpack.c.bf16 %v2355_v50, %v2353_v49 }
0x1333   :  { %5784 = vmatpush3.bf16.msra.mxu1 %v5783_v53  ;;  %v2354_v53 = vld [vmem:[#allocation9 + $0xf0] sm:$0xff] }
0x1334   :  { %5785 = vmatprep.subr.bf16.mxu1 %v6843_v0  ;;  %v5818_v54 = vpack.c.bf16 %v2354_v53, %v2352_v52  ;;  %v2556_v52 = vld [vmem:[#allocation15 + $0x90] sm:$0xff]  ;;  %v2559_v53 = vld [vmem:[#allocation15 + $0xa8] sm:$0xff] }
0x1336   :  { %v6392_v38 = vpop.eup %6391 }
0x1337   :  { %v2222_v39 = vadd.f32 1.0, %v6392_v38  ;;  %v6394_v40 = vpop.eup %6393  ;;  %5787 = vmatpush3.bf16.msra.mxu1 %v5786_v56  ;;  %v2344_v38 = vld [vmem:[#allocation9 + $0xa0] sm:$0xff]  ;;  %v2445_v56 = vld [vmem:[#allocation12 + $0x8] sm:$0xff] }
0x1338   :  { %5789 = vmatprep.subr.bf16.mxu1 %v5788_v2 }
0x1339   :  { %6395 = vrcp.f32 %v2222_v39  ;;  %v2346_v39 = vld [vmem:[#allocation9 + $0xb0] sm:$0xff] }
0x133a   :  { %6397 = vpow2.f32 %v4685_v57  ;;  %v2446_v57 = vld [vmem:[#allocation12 + $0x10] sm:$0xff] }
0x1343   :  { %v6396_v41 = vpop.eup %6395 }
0x1344   :  { %v2230_v43 = vmul.f32 %v6396_v41, %v6394_v40  ;;  %v6398_v58 = vpop.eup %6397  ;;  %v2229_v60 = vmul.f32 %v6396_v41, %v2055_v24  ;;  %v2341_v24 = vld [vmem:[#allocation9 + $0x88] sm:$0xff]  ;;  %v2351_v41 = vld [vmem:[#allocation9 + $0xd8] sm:$0xff] }
0x1345   :  { %v2223_v59 = vadd.f32 1.0, %v6398_v58  ;;  %v5804_v29 = vpack.c.bf16 %v2343_v25, %v2341_v24  ;;  %v2349_v40 = vld [vmem:[#allocation9 + $0xc8] sm:$0xff]  ;;  %v5821_v58 = vpack.c.bf16 %v2445_v56, %v2444_v55  ;;  %v2545_v24 = vld [vmem:[#allocation15 + $0x38] sm:$0xff] }
0x1346   :  { %2232 = vrot.lane.b32.xlu0 %v2230_v43, %s6846_s9  ;;  %v5810_v43 = vpack.c.bf16 %v2346_v39, %v2344_v38  ;;  %v5812_v47 = vpack.c.bf16 %v2351_v41, %v2349_v40  ;;  %v2548_v38 = vld [vmem:[#allocation15 + $0x50] sm:$0xff]  ;;  %v2551_v39 = vld [vmem:[#allocation15 + $0x68] sm:$0xff]  ;;  %v2553_v40 = vld [vmem:[#allocation15 + $0x78] sm:$0xff] }
0x1347   :  { %6399 = vrcp.f32 %v2223_v59  ;;  %v2447_v59 = vld [vmem:[#allocation12 + $0x18] sm:$0xff]  ;;  %5822 = vmatpush3.bf16.msra.mxu0 %v5821_v58 }
0x1348   :  { %5823 = vmatprep.subr.bf16.mxu0 %v6843_v0  ;;  %v2560_v58 = vld [vmem:[#allocation15 + $0xb0] sm:$0xff] }
0x1351   :  { %v6400_v3 = vpop.eup %6399 }
0x13b8   :  { %v2233_v61 = vpop.permute.xlu0 %2232 }
0x13b9   :  { %v2235_v62 = vadd.f32 %v2233_v61, %v2229_v60  ;;  %v5824_v60 = vpack.c.bf16 %v2447_v59, %v2446_v57  ;;  %v2448_v61 = vld [vmem:[#allocation12 + $0x20] sm:$0xff]  ;;  %v2563_v59 = vld [vmem:[#allocation15 + $0xc8] sm:$0xff] }
0x13ba   :  { %v2558_v57 = vld [vmem:[#allocation15 + $0xa0] sm:$0xff] }
0x13bb   :  { %6401 = vtanh.f32 %v2235_v62  ;;  %v2449_v62 = vld [vmem:[#allocation12 + $0x28] sm:$0xff]  ;;  %5825 = vmatpush3.bf16.msra.mxu0 %v5824_v60  ;;  %v2565_v60 = vld [vmem:[#allocation15 + $0xd8] sm:$0xff] }
0x13bc   :  { %v5827_v20 = vpack.c.bf16 %v2449_v62, %v2448_v61  ;;  %5826 = vmatprep.subr.bf16.mxu0 %v6843_v0  ;;  %v5866_v61 = vpack.c.bf16 %v2560_v58, %v2558_v57  ;;  %v5868_v62 = vpack.c.bf16 %v2565_v60, %v2563_v59 }
0x13bf   :  { %5828 = vmatpush3.bf16.msra.mxu0 %v5827_v20  ;;  %v2562_v20 = vld [vmem:[#allocation15 + $0xc0] sm:$0xff] }
0x13c0   :  { %5829 = vmatprep.subr.bf16.mxu0 %v6843_v0 }
0x13c3   :  { %5831 = vmatpush3.bf16.msra.mxu0 %v5830_v33 }
0x13c4   :  { %5832 = vmatprep.subr.bf16.mxu0 %v6843_v0 }
0x13c5   :  { %v6402_v21 = vpop.eup %6401 }
0x13c6   :  { %v2237_v4 = vmul.f32 %v6402_v21, %v6400_v3 }
0x13c8   :  { %2248 = vrot.lane.b32.xlu1 %v2237_v4, %s6846_s9 }
0x143a   :  { %v2249_v8 = vpop.permute.xlu1 %2248 }
0x143b   :  { %5190 = vmatmul.mubr.msk.f32.vlgmr.msra.gmra.mrb[0].mxu1 %vm520_vm1, %v2249_v8  ;;  %v5836_v8 = vpack.c.bf16 %v2455_v7, %v2454_v6 }
0x143c   :  { %5791 = vmatpush1.bf16.msra.mxu1 %v5790_v34  ;;  %2432 = vmatprep.mubr.f32.mxu1 %v6845_v1  ;;  %v2453_v34 = vld [vmem:[#allocation12 + $0x48] sm:$0xff] }
0x143d   :  { %5793 = vmatprep.subr.bf16.mxu1 %v5792_v37  ;;  %v5833_v37 = vpack.c.bf16 %v2453_v34, %v2452_v5 }
0x143f   :  { %5834 = vmatpush3.bf16.msra.mxu0 %v5833_v37  ;;  %v2441_v37 = vld [vmem:[%s8069_s16] sm:$0xff] }
0x1440   :  { %5795 = vmatpush1.bf16.msra.mxu1 %v5794_v11  ;;  %5835 = vmatprep.subr.bf16.mxu0 %v6843_v0  ;;  %v5839_v11 = vpack.c.bf16 %v2457_v10, %v2456_v9  ;;  %v2567_v9 = vld [vmem:[#allocation15 + $0xe8] sm:$0xff]  ;;  %v2569_v10 = vld [vmem:[#allocation15 + $0xf8] sm:$0xff] }
0x1441   :  { %5797 = vmatprep.subr.bf16.mxu1 %v5796_v12  ;;  %v2458_v12 = vld [vmem:[#allocation12 + $0x70] sm:$0xff] }
0x1442   :  { %v5842_v15 = vpack.c.bf16 %v2459_v14, %v2458_v12  ;;  %v2566_v12 = vld [vmem:[#allocation15 + $0xe0] sm:$0xff]  ;;  %v2568_v14 = vld [vmem:[#allocation15 + $0xf0] sm:$0xff] }
0x1443   :  { %5837 = vmatpush3.bf16.msra.mxu0 %v5836_v8 }
0x1444   :  { %5799 = vmatpush1.bf16.msra.mxu1 %v5798_v18  ;;  %5838 = vmatprep.subr.bf16.mxu0 %v6843_v0  ;;  %v2538_v18 = vld [vmem:[#allocation15] sm:$0xff] }
0x1445   :  { %5801 = vmatprep.subr.bf16.mxu1 %v5800_v19  ;;  %v5844_v19 = vpack.c.bf16 %v2541_v17, %v2539_v16  ;;  %v5846_v25 = vpack.c.bf16 %v2540_v22, %v2538_v18  ;;  %v2747_v16 = vld [vmem:[%s8038_s14 + $0x8] sm:$0xff]  ;;  %v2749_v17 = vld [vmem:[%s8038_s14 + $0x18] sm:$0xff]  ;;  %v2746_v22 = vld [vmem:[%s8038_s14] sm:$0xff] }
0x1446   :  { %v7729_v18 = vpack.c.bf16 %v2749_v17, %v2747_v16  ;;  %v2664_v16 = vld [vmem:[#allocation19 + $0x58] sm:$0xff] }
0x1447   :  { %5840 = vmatpush3.bf16.msra.mxu0 %v5839_v11  ;;  %v5872_v11 = vpack.c.bf16 %v2569_v10, %v2567_v9  ;;  %v2660_v9 = vld [vmem:[#allocation19 + $0x38] sm:$0xff] }
0x1448   :  { %5803 = vmatpush1.bf16.msra.mxu1 %v5802_v26  ;;  %5841 = vmatprep.subr.bf16.mxu0 %v6843_v0  ;;  %v5848_v26 = vpack.c.bf16 %v2545_v24, %v2543_v23  ;;  %v2748_v23 = vld [vmem:[%s8038_s14 + $0x10] sm:$0xff] }
0x1449   :  { %5805 = vmatprep.subr.bf16.mxu1 %v5804_v29  ;;  %v2542_v29 = vld [vmem:[#allocation15 + $0x20] sm:$0xff] }
0x144a   :  { %v5850_v35 = vpack.c.bf16 %v2544_v30, %v2542_v29 }
0x144b   :  { %5843 = vmatpush3.bf16.msra.mxu0 %v5842_v15  ;;  %v5874_v15 = vpack.c.bf16 %v2568_v14, %v2566_v12  ;;  %v2662_v12 = vld [vmem:[#allocation19 + $0x48] sm:$0xff] }
0x144c   :  { %5807 = vmatpush1.bf16.msra.mxu1 %v5806_v36  ;;  %5876 = vmatprep.subr.bf16.mxu0 %v6843_v0  ;;  %v5852_v36 = vpack.c.bf16 %v2549_v32, %v2547_v31  ;;  %v7744_v31 = vpack.c.bf16 %v2748_v23, %v2746_v22  ;;  %v2666_v22 = vld [vmem:[#allocation19 + $0x68] sm:$0xff] }
0x144d   :  { %5809 = vmatprep.subr.bf16.mxu1 %v5808_v13  ;;  %v2546_v13 = vld [vmem:[#allocation15 + $0x40] sm:$0xff] }
0x144e   :  { %v5854_v41 = vpack.c.bf16 %v2548_v38, %v2546_v13  ;;  %v2752_v13 = vld [vmem:[%s8038_s14 + $0x30] sm:$0xff]  ;;  %v2755_v38 = vld [vmem:[%s8038_s14 + $0x48] sm:$0xff] }
0x1450   :  { %5811 = vmatpush1.bf16.msra.mxu1 %v5810_v43  ;;  %v5856_v43 = vpack.c.bf16 %v2553_v40, %v2551_v39  ;;  %v2757_v39 = vld [vmem:[%s8038_s14 + $0x58] sm:$0xff] }
0x1451   :  { %5813 = vmatprep.subr.bf16.mxu1 %v5812_v47  ;;  %v2550_v47 = vld [vmem:[#allocation15 + $0x60] sm:$0xff] }
0x1452   :  { %v5858_v49 = vpack.c.bf16 %v2552_v45, %v2550_v47  ;;  %v2756_v47 = vld [vmem:[%s8038_s14 + $0x50] sm:$0xff]  ;;  %v2759_v45 = vld [vmem:[%s8038_s14 + $0x68] sm:$0xff] }
0x1454   :  { %5815 = vmatpush1.bf16.msra.mxu1 %v5814_v48  ;;  %v2557_v48 = vld [vmem:[#allocation15 + $0x98] sm:$0xff] }
0x1455   :  { %5817 = vmatprep.subr.bf16.mxu1 %v5816_v51  ;;  %v5860_v50 = vpack.c.bf16 %v2557_v48, %v2555_v46  ;;  %v2554_v51 = vld [vmem:[#allocation15 + $0x80] sm:$0xff]  ;;  %v2761_v46 = vld [vmem:[%s8038_s14 + $0x78] sm:$0xff] }
0x1456   :  { %v5862_v55 = vpack.c.bf16 %v2556_v52, %v2554_v51  ;;  %v2760_v51 = vld [vmem:[%s8038_s14 + $0x70] sm:$0xff] }
0x1458   :  { %5819 = vmatpush1.bf16.msra.mxu1 %v5818_v54  ;;  %v2561_v54 = vld [vmem:[#allocation15 + $0xb8] sm:$0xff] }
0x1459   :  { %5845 = vmatprep.subr.bf16.mxu1 %v5844_v19  ;;  %v5864_v56 = vpack.c.bf16 %v2561_v54, %v2559_v53  ;;  %v4695_v19 = vld [vmem:[#allocation13] ss:$0 sm:$0xff] }
0x150e   :  { %v2318_v2 = vpop.f32.mrb[0].mxu1 }
0x150f   :  { %v6202_v3 = vadd.f32 %v4583_v63, %v2318_v2  ;;  %v5191_v21 = vpop.f32.mrb[1].mxu1  ;;  %v2564_v63 = vld [vmem:[#allocation15 + $0xd0] sm:$0xff] }
0x1510   :  { %v5870_v2 = vpack.c.bf16 %v2564_v63, %v2562_v20 }
0x1511   :  { %v2323_v4 = vmax.f32 %v6202_v3, 0.0  ;;  %v2356_v3 = vld [vmem:[#allocation10] sm:$0x3] }
0x1512   :  { %v2361_v21 = vrot.slane %v2356_v3, %v7221_v42 }
0x1513   :  { %2433 = vmatmul.mubr.f32.vlgmr.msra.gmra.mrb[4].mxu1 %v2323_v4  ;;  %v2365_v4 = vrot.slane %v2356_v3, %v7223_v44 }
0x1514   :  { %2646 = vmatprep.mubr.f32.mxu1 %v6845_v1  ;;  %5847 = vmatpush1.bf16.msra.mxu1 %v5846_v25  ;;  %v2751_v25 = vld [vmem:[%s8038_s14 + $0x28] sm:$0xff] }
0x1515   :  { %5849 = vmatprep.subr.bf16.mxu1 %v5848_v26  ;;  %v2753_v26 = vld [vmem:[%s8038_s14 + $0x38] sm:$0xff] }
0x1518   :  { %5851 = vmatpush1.bf16.msra.mxu1 %v5850_v35  ;;  %v7746_v35 = vpack.c.bf16 %v2753_v26, %v2751_v25  ;;  %v2668_v25 = vld [vmem:[#allocation19 + $0x78] sm:$0xff] }
0x1519   :  { %5853 = vmatprep.subr.bf16.mxu1 %v5852_v36  ;;  %v2750_v36 = vld [vmem:[%s8038_s14 + $0x20] sm:$0xff] }
0x151a   :  { %v7761_v40 = vpack.c.bf16 %v2752_v13, %v2750_v36  ;;  %v2859_v36 = vld [vmem:[#allocation18 + $0x10] sm:$0xff]  ;;  %v2860_v13 = vld [vmem:[#allocation18 + $0x18] sm:$0xff] }
0x151c   :  { %5855 = vmatpush1.bf16.msra.mxu1 %v5854_v41  ;;  %v7765_v41 = vpack.c.bf16 %v2757_v39, %v2755_v38  ;;  %v6525_v38 = vld [vmem:[%s8067_s17] sm:$0xff]  ;;  %v5920_v39 = vpack.c.bf16 %v2860_v13, %v2859_v36 }
0x151d   :  { %5857 = vmatprep.subr.bf16.mxu1 %v5856_v43  ;;  %v2754_v43 = vld [vmem:[%s8038_s14 + $0x40] sm:$0xff] }
0x151e   :  { %v7780_v48 = vpack.c.bf16 %v2756_v47, %v2754_v43  ;;  %v2861_v43 = vld [vmem:[#allocation18 + $0x20] sm:$0xff]  ;;  %v2862_v47 = vld [vmem:[#allocation18 + $0x28] sm:$0xff] }
0x1520   :  { %5859 = vmatpush1.bf16.msra.mxu1 %v5858_v49  ;;  %v7783_v49 = vpack.c.bf16 %v2761_v46, %v2759_v45  ;;  %v5923_v45 = vpack.c.bf16 %v2862_v47, %v2861_v43  ;;  %v2863_v46 = vld [vmem:[#allocation18 + $0x30] sm:$0xff] }
0x1521   :  { %5861 = vmatprep.subr.bf16.mxu1 %v5860_v50  ;;  %v2758_v50 = vld [vmem:[%s8038_s14 + $0x60] sm:$0xff] }
0x1522   :  { %v7792_v52 = vpack.c.bf16 %v2760_v51, %v2758_v50  ;;  %v2864_v50 = vld [vmem:[#allocation18 + $0x38] sm:$0xff] }
0x1523   :  { %v5926_v51 = vpack.c.bf16 %v2864_v50, %v2863_v46 }
0x1524   :  { %5863 = vmatpush1.bf16.msra.mxu1 %v5862_v55  ;;  %v2570_v55 = vld [vmem:[#allocation16] sm:$0x3] }
0x1525   :  { %5865 = vmatprep.subr.bf16.mxu1 %v5864_v56  ;;  %v2575_v56 = vrot.slane %v2570_v55, %v7221_v42 }
0x1528   :  { %5867 = vmatpush1.bf16.msra.mxu1 %v5866_v61 }
0x1529   :  { %5869 = vmatprep.subr.bf16.mxu1 %v5868_v62  ;;  %v2579_v62 = vrot.slane %v2570_v55, %v7223_v44  ;;  %v2655_v44 = vld [vmem:[#allocation19 + $0x10] sm:$0xff] }
0x152c   :  { %5871 = vmatpush1.bf16.msra.mxu1 %v5870_v2 }
0x152d   :  { %5873 = vmatprep.subr.bf16.mxu1 %v5872_v11  ;;  %v2661_v11 = vld [vmem:[#allocation19 + $0x40] sm:$0xff] }
0x152e   :  { %v5889_v14 = vpack.c.bf16 %v2662_v12, %v2661_v11  ;;  %v3042_v11 = vld [vmem:[#allocation18 + $0x68] sm:$0xff] }
0x1530   :  { %5875 = vmatpush1.bf16.msra.mxu1 %v5874_v15  ;;  %v2663_v15 = vld [vmem:[#allocation19 + $0x50] sm:$0xff] }
0x1531   :  { %5901 = vmatprep.subr.bf16.mxu1 %v7729_v18  ;;  %v5892_v17 = vpack.c.bf16 %v2664_v16, %v2663_v15  ;;  %v3044_v15 = vld [vmem:[#allocation18 + $0x78] sm:$0xff] }
0x15e6   :  { %v2434_v27 = vpop.f32.mrb[4].mxu1 }
0x15e7   :  { %v2435_v28 = vadd.f32 %v2434_v27, %v2361_v21  ;;  %v2436_v33 = vpop.f32.mrb[5].mxu1  ;;  %v2653_v27 = vld [vmem:[#allocation19] sm:$0xff] }
0x15e8   :  { %v2437_v5 = vadd.f32 %v2436_v33, %v2365_v4 }
0x15e9   :  { %4562 = vst [vmem:[%s8044_s20] sm:$0xff] %v2435_v28 }
0x15ea   :  { %v2439_v34 = vmul.f32 1.442695, %v2437_v5  ;;  %4563 = vst [vmem:[%s8045_s21] sm:$0xff] %v2437_v5  ;;  %v2656_v5 = vld [vmem:[#allocation19 + $0x18] sm:$0xff] }
0x15ec   :  { %6403 = vpow2.f32 %v2439_v34  ;;  %v5880_v34 = vpack.c.bf16 %v2656_v5, %v2655_v44 }
0x15f6   :  { %v6404_v6 = vpop.eup %6403 }
0x15f7   :  { %v2442_v7 = vmul.f32 %v6404_v6, %v2441_v37  ;;  %v2657_v37 = vld [vmem:[#allocation19 + $0x20] sm:$0xff]  ;;  %v2658_v6 = vld [vmem:[#allocation19 + $0x28] sm:$0xff] }
0x15f9   :  { %v2443_v8 = vadd.f32 %v2442_v7, %v2435_v28  ;;  %v2654_v28 = vld [vmem:[#allocation19 + $0x8] sm:$0xff]  ;;  %v5883_v7 = vpack.c.bf16 %v2658_v6, %v2657_v37  ;;  %v3039_v6 = vld [vmem:[#allocation18 + $0x50] sm:$0xff] }
0x15fa   :  { %v5877_v33 = vpack.c.bf16 %v2654_v28, %v2653_v27  ;;  %v3038_v37 = vld [vmem:[#allocation18 + $0x48] sm:$0xff] }
0x15fb   :  { %5225 = vmatmul.mubr.f32.vlgmr.msra.gmra.mrb[20].mxu0 %v2443_v8  ;;  %v2659_v8 = vld [vmem:[#allocation19 + $0x30] sm:$0xff] }
0x15fc   :  { %5259 = vmatprep.mubr.msk.f32.mxu0 %vm6844_vm0, %v6845_v1  ;;  %5878 = vmatpush3.bf16.msra.mxu0 %v5877_v33  ;;  %v5886_v10 = vpack.c.bf16 %v2660_v9, %v2659_v8  ;;  %v3040_v8 = vld [vmem:[#allocation18 + $0x58] sm:$0xff] }
0x15fd   :  { %5879 = vmatprep.subr.bf16.mxu0 %v6843_v0  ;;  %v5948_v9 = vpack.c.bf16 %v3040_v8, %v3039_v6 }
0x1600   :  { %5881 = vmatpush3.bf16.msra.mxu0 %v5880_v34  ;;  %v3037_v34 = vld [vmem:[#allocation18 + $0x40] sm:$0xff] }
0x1601   :  { %5882 = vmatprep.subr.bf16.mxu0 %v6843_v0 }
0x1604   :  { %5884 = vmatpush3.bf16.msra.mxu0 %v5883_v7  ;;  %v5945_v7 = vpack.c.bf16 %v3038_v37, %v3037_v34 }
0x1605   :  { %5885 = vmatprep.subr.bf16.mxu0 %v6843_v0 }
0x1608   :  { %5887 = vmatpush3.bf16.msra.mxu0 %v5886_v10  ;;  %v3041_v10 = vld [vmem:[#allocation18 + $0x60] sm:$0xff] }
0x1609   :  { %5888 = vmatprep.subr.bf16.mxu0 %v6843_v0  ;;  %v5951_v12 = vpack.c.bf16 %v3042_v11, %v3041_v10 }
0x160c   :  { %5890 = vmatpush3.bf16.msra.mxu0 %v5889_v14  ;;  %v3043_v14 = vld [vmem:[#allocation18 + $0x70] sm:$0xff] }
0x160d   :  { %5891 = vmatprep.subr.bf16.mxu0 %v6843_v0  ;;  %v5954_v16 = vpack.c.bf16 %v3044_v15, %v3043_v14 }
0x1610   :  { %5893 = vmatpush3.bf16.msra.mxu0 %v5892_v17 }
0x1611   :  { %5894 = vmatprep.subr.bf16.mxu0 %v6843_v0 }
0x16ce   :  { %v2533_v24 = vpop.f32.mrb[20].mxu0 }
0x16cf   :  { %v2534_v29 = vadd.f32 %v4695_v19, %v2533_v24  ;;  %v5226_v30 = vpop.f32.mrb[21].mxu0  ;;  %v2665_v19 = vld [vmem:[#allocation19 + $0x60] sm:$0xff]  ;;  %v2667_v24 = vld [vmem:[#allocation19 + $0x70] sm:$0xff] }
0x16d0   :  { %v5895_v23 = vpack.c.bf16 %v2666_v22, %v2665_v19  ;;  %v5898_v26 = vpack.c.bf16 %v2668_v25, %v2667_v24  ;;  %v2858_v30 = vld [vmem:[#allocation18 + $0x8] sm:$0xff] }
0x16d1   :  { %v2537_v32 = vmax.f32 %v2534_v29, 0.0  ;;  %v2857_v29 = vld [vmem:[#allocation18] sm:$0xff] }
0x16d2   :  { %5896 = vmatpush3.bf16.msra.mxu0 %v5895_v23 }
0x16d3   :  { %2647 = vmatmul.mubr.f32.vlgmr.msra.gmra.mrb[6].mxu1 %v2537_v32  ;;  %5897 = vmatprep.subr.bf16.mxu0 %v6843_v0  ;;  %v5917_v32 = vpack.c.bf16 %v2858_v30, %v2857_v29 }
0x16d4   :  { %5903 = vmatpush1.bf16.msra.mxu1 %v7744_v31  ;;  %2826 = vmatprep.mubr.f32.mxu1 %v6845_v1 }
0x16d5   :  { %5905 = vmatprep.subr.bf16.mxu1 %v7746_v35 }
0x16d6   :  { %5899 = vmatpush3.bf16.msra.mxu0 %v5898_v26 }
0x16d7   :  { %5916 = vmatprep.subr.bf16.mxu0 %v6843_v0 }
0x16d8   :  { %5907 = vmatpush1.bf16.msra.mxu1 %v7761_v40 }
0x16d9   :  { %5909 = vmatprep.subr.bf16.mxu1 %v7765_v41  ;;  %5260 = vmatmul.mubr.f32.vlgmr.msra.gmra.mrb[22].mxu0 %v6525_v38 }
0x16da   :  { %5918 = vmatpush3.bf16.msra.mxu0 %v5917_v32  ;;  %5278 = vmatprep.mubr.msk.f32.mxu0 %vm6844_vm0, %v6845_v1 }
0x16db   :  { %5919 = vmatprep.subr.bf16.mxu0 %v6843_v0 }
0x16dc   :  { %5911 = vmatpush1.bf16.msra.mxu1 %v7780_v48 }
0x16dd   :  { %5913 = vmatprep.subr.bf16.mxu1 %v7783_v49 }
0x16de   :  { %5921 = vmatpush3.bf16.msra.mxu0 %v5920_v39 }
0x16df   :  { %5922 = vmatprep.subr.bf16.mxu0 %v6843_v0 }
0x16e0   :  { %5915 = vmatpush1.bf16.msra.mxu1 %v7792_v52 }
0x16e1   :  { %5929 = vmatprep.subr.bf16.mxu1 %v7729_v18 }
0x16e2   :  { %5924 = vmatpush3.bf16.msra.mxu0 %v5923_v45 }
0x16e3   :  { %2827 = vmatmul.mubr.f32.vlgmr.msra.gmra.mrb[8].mxu1 %v6845_v1  ;;  %5925 = vmatprep.subr.bf16.mxu0 %v6843_v0 }
0x16e4   :  { %5931 = vmatpush1.bf16.msra.mxu1 %v7744_v31  ;;  %3005 = vmatprep.mubr.f32.mxu1 %v6845_v1 }
0x16e5   :  { %5933 = vmatprep.subr.bf16.mxu1 %v7746_v35 }
0x16e6   :  { %5927 = vmatpush3.bf16.msra.mxu0 %v5926_v51 }
0x16e7   :  { %5944 = vmatprep.subr.bf16.mxu0 %v6843_v0 }
0x16e8   :  { %5935 = vmatpush1.bf16.msra.mxu1 %v7761_v40 }
0x16e9   :  { %5937 = vmatprep.subr.bf16.mxu1 %v7765_v41 }
0x16ec   :  { %5939 = vmatpush1.bf16.msra.mxu1 %v7780_v48 }
0x16ed   :  { %5941 = vmatprep.subr.bf16.mxu1 %v7783_v49 }
0x16f0   :  { %5943 = vmatpush1.bf16.msra.mxu1 %v7792_v52 }
0x16f1   :  { %5957 = vmatprep.subr.bf16.mxu1 %v7729_v18 }
0x17a6   :  { %v2648_v53 = vpop.f32.mrb[6].mxu1 }
0x17a7   :  { %v2650_v54 = vpop.f32.mrb[7].mxu1  ;;  %v7808_v57 = vadd.f32 %v2648_v53, %v2575_v56 }
0x17a8   :  { %v7812_v20 = vadd.f32 %v2650_v54, %v2579_v62 }
0x17b6   :  { %v2828_v58 = vpop.f32.mrb[8].mxu1 }
0x17b7   :  { %v2833_v59 = vadd.f32 %v2828_v58, %v7808_v57  ;;  %v2830_v60 = vpop.f32.mrb[9].mxu1 }
0x17b8   :  { %v7815_v63 = vadd.f32 %v2830_v60, %v7812_v20 }
0x17b9   :  { %v4697_v61 = vmul.f32 -1.442695, %v2833_v59 }
0x17ba   :  { %v4698_v53 = vmul.f32 -1.442695, %v7815_v63 }
0x17bb   :  { %6405 = vpow2.f32 %v4697_v61 }
0x17bc   :  { %6407 = vtanh.f32 %v7815_v63 }
0x17c5   :  { %v6406_v2 = vpop.eup %6405 }
0x17c6   :  { %v2841_v3 = vadd.f32 1.0, %v6406_v2  ;;  %v6408_v42 = vpop.eup %6407 }
0x17c8   :  { %6409 = vrcp.f32 %v2841_v3 }
0x17c9   :  { %6411 = vpow2.f32 %v4698_v53  ;;  %v3217_v53 = vld [vmem:[#allocation18 + $0x80] sm:$0xff] }
0x17d2   :  { %v7818_v21 = vpop.eup %6409 }
0x17d3   :  { %v2849_v4 = vmul.f32 %v7818_v21, %v6408_v42  ;;  %v6412_v54 = vpop.eup %6411  ;;  %v2848_v56 = vmul.f32 0.0, %v7818_v21 }
0x17d4   :  { %v2842_v55 = vadd.f32 1.0, %v6412_v54  ;;  %v3218_v54 = vld [vmem:[#allocation18 + $0x88] sm:$0xff] }
0x17d5   :  { %2851 = vrot.lane.b32.xlu0 %v2849_v4, %s6846_s9 }
0x17d6   :  { %6413 = vrcp.f32 %v2842_v55  ;;  %v3219_v55 = vld [vmem:[#allocation18 + $0x90] sm:$0xff] }
0x17e0   :  { %v6414_v60 = vpop.eup %6413 }
0x1847   :  { %v2852_v58 = vpop.permute.xlu0 %2851 }
0x1848   :  { %v2854_v59 = vadd.f32 %v2852_v58, %v2848_v56  ;;  %v5973_v56 = vpack.c.bf16 %v3218_v54, %v3217_v53  ;;  %v3220_v58 = vld [vmem:[#allocation18 + $0x98] sm:$0xff] }
0x184a   :  { %6415 = vtanh.f32 %v2854_v59 }
0x1854   :  { %v6416_v61 = vpop.eup %6415 }
0x1855   :  { %v2856_v62 = vmul.f32 %v6416_v61, %v6414_v60  ;;  %v3221_v60 = vld [vmem:[#allocation18 + $0xa0] sm:$0xff]  ;;  %v3222_v61 = vld [vmem:[#allocation18 + $0xa8] sm:$0xff] }
0x1857   :  { %2866 = vrot.lane.b32.xlu1 %v2856_v62, %s6846_s9  ;;  %v5979_v62 = vpack.c.bf16 %v3222_v61, %v3221_v60 }
0x18c9   :  { %v2867_v2 = vpop.permute.xlu1 %2866 }
0x18ca   :  { %5279 = vmatmul.mubr.msk.f32.vlgmr.msra.gmra.mrb[22].mxu0 %vm520_vm1, %v2867_v2  ;;  %4700 = vmatmul.mubr.msk.f32.vlgmr.msra.gmra.mrb[10].mxu1 %vm520_vm1, %v2867_v2  ;;  %v3223_v2 = vld [vmem:[#allocation18 + $0xb0] sm:$0xff] }
0x18cb   :  { %5959 = vmatpush1.bf16.msra.mxu1 %v7744_v31  ;;  %5297 = vmatprep.mubr.msk.f32.mxu0 %vm6844_vm0, %v6845_v1 }
0x18cc   :  { %5961 = vmatprep.subr.bf16.mxu1 %v7746_v35  ;;  %3185 = vmatprep.mubr.f32.mxu1 %v6845_v1 }
0x18cd   :  { %5946 = vmatpush3.bf16.msra.mxu0 %v5945_v7 }
0x18ce   :  { %5947 = vmatprep.subr.bf16.mxu0 %v6843_v0 }
0x18cf   :  { %5963 = vmatpush1.bf16.msra.mxu1 %v7761_v40 }
0x18d0   :  { %5965 = vmatprep.subr.bf16.mxu1 %v7765_v41 }
0x18d1   :  { %5949 = vmatpush3.bf16.msra.mxu0 %v5948_v9 }
0x18d2   :  { %5950 = vmatprep.subr.bf16.mxu0 %v6843_v0 }
0x18d3   :  { %5967 = vmatpush1.bf16.msra.mxu1 %v7780_v48 }
0x18d4   :  { %5969 = vmatprep.subr.bf16.mxu1 %v7783_v49 }
0x18d5   :  { %5952 = vmatpush3.bf16.msra.mxu0 %v5951_v12 }
0x18d6   :  { %5953 = vmatprep.subr.bf16.mxu0 %v6843_v0 }
0x18d7   :  { %5971 = vmatpush1.bf16.msra.mxu1 %v7792_v52 }
0x18d8   :  { %5985 = vmatprep.subr.bf16.mxu1 %v7729_v18 }
0x18d9   :  { %5955 = vmatpush3.bf16.msra.mxu0 %v5954_v16 }
0x18da   :  { %5972 = vmatprep.subr.bf16.mxu0 %v6843_v0 }
0x199d   :  { %v3007_v63 = vpop.f32.mrb[10].mxu1 }
0x199e   :  { %v3012_v3 = vadd.f32 %v3007_v63, %v7808_v57  ;;  %v3009_v42 = vpop.f32.mrb[11].mxu1  ;;  %v3224_v63 = vld [vmem:[#allocation18 + $0xb8] sm:$0xff] }
0x199f   :  { %v3013_v4 = vadd.f32 %v3009_v42, %v7812_v20 }
0x19a0   :  { %v4701_v21 = vmul.f32 -1.442695, %v3012_v3  ;;  %v5982_v3 = vpack.c.bf16 %v3224_v63, %v3223_v2 }
0x19a1   :  { %v4702_v17 = vmul.f32 -1.442695, %v3013_v4 }
0x19a2   :  { %6417 = vpow2.f32 %v4701_v21 }
0x19a3   :  { %6419 = vtanh.f32 %v3013_v4 }
0x19ac   :  { %v6418_v27 = vpop.eup %6417 }
0x19ad   :  { %v3020_v28 = vadd.f32 1.0, %v6418_v27  ;;  %v6420_v44 = vpop.eup %6419 }
0x19af   :  { %6421 = vrcp.f32 %v3020_v28 }
0x19b0   :  { %6423 = vpow2.f32 %v4702_v17  ;;  %v3397_v17 = vld [vmem:[#allocation18 + $0xc0] sm:$0xff] }
0x19b9   :  { %v6422_v33 = vpop.eup %6421 }
0x19ba   :  { %v3028_v5 = vmul.f32 %v6422_v33, %v6420_v44  ;;  %v6424_v19 = vpop.eup %6423  ;;  %v3027_v23 = vmul.f32 %v6422_v33, %v2854_v59  ;;  %v5976_v59 = vpack.c.bf16 %v3220_v58, %v3219_v55 }
0x19bb   :  { %v3021_v22 = vadd.f32 1.0, %v6424_v19  ;;  %v3398_v19 = vld [vmem:[#allocation18 + $0xc8] sm:$0xff] }
0x19bc   :  { %3030 = vrot.lane.b32.xlu0 %v3028_v5, %s6846_s9 }
0x19bd   :  { %6425 = vrcp.f32 %v3021_v22  ;;  %v3399_v22 = vld [vmem:[#allocation18 + $0xd0] sm:$0xff] }
0x19c7   :  { %v6426_v26 = vpop.eup %6425 }
0x1a2e   :  { %v3031_v24 = vpop.permute.xlu0 %3030 }
0x1a2f   :  { %v3033_v25 = vadd.f32 %v3031_v24, %v3027_v23  ;;  %v6001_v23 = vpack.c.bf16 %v3398_v19, %v3397_v17  ;;  %v3400_v24 = vld [vmem:[#allocation18 + $0xd8] sm:$0xff] }
0x1a31   :  { %6427 = vtanh.f32 %v3033_v25 }
0x1a3b   :  { %v6428_v29 = vpop.eup %6427 }
0x1a3c   :  { %v3035_v30 = vmul.f32 %v6428_v29, %v6426_v26  ;;  %v3401_v26 = vld [vmem:[#allocation18 + $0xe0] sm:$0xff]  ;;  %v3402_v29 = vld [vmem:[#allocation18 + $0xe8] sm:$0xff] }
0x1a3e   :  { %3046 = vrot.lane.b32.xlu1 %v3035_v30, %s6846_s9  ;;  %v6007_v30 = vpack.c.bf16 %v3402_v29, %v3401_v26 }
0x1ab0   :  { %v3047_v32 = vpop.permute.xlu1 %3046 }
0x1ab1   :  { %5298 = vmatmul.mubr.msk.f32.vlgmr.msra.gmra.mrb[22].mxu0 %vm520_vm1, %v3047_v32  ;;  %4704 = vmatmul.mubr.msk.f32.vlgmr.msra.gmra.mrb[12].mxu1 %vm520_vm1, %v3047_v32  ;;  %v3403_v32 = vld [vmem:[#allocation18 + $0xf0] sm:$0xff] }
0x1ab2   :  { %5987 = vmatpush1.bf16.msra.mxu1 %v7744_v31  ;;  %5316 = vmatprep.mubr.msk.f32.mxu0 %vm6844_vm0, %v6845_v1 }
0x1ab3   :  { %5989 = vmatprep.subr.bf16.mxu1 %v7746_v35  ;;  %3365 = vmatprep.mubr.f32.mxu1 %v6845_v1 }
0x1ab4   :  { %5974 = vmatpush3.bf16.msra.mxu0 %v5973_v56 }
0x1ab5   :  { %5975 = vmatprep.subr.bf16.mxu0 %v6843_v0 }
0x1ab6   :  { %5991 = vmatpush1.bf16.msra.mxu1 %v7761_v40 }
0x1ab7   :  { %5993 = vmatprep.subr.bf16.mxu1 %v7765_v41 }
0x1ab8   :  { %5977 = vmatpush3.bf16.msra.mxu0 %v5976_v59 }
0x1ab9   :  { %5978 = vmatprep.subr.bf16.mxu0 %v6843_v0 }
0x1aba   :  { %5995 = vmatpush1.bf16.msra.mxu1 %v7780_v48 }
0x1abb   :  { %5997 = vmatprep.subr.bf16.mxu1 %v7783_v49 }
0x1abc   :  { %5980 = vmatpush3.bf16.msra.mxu0 %v5979_v62 }
0x1abd   :  { %5981 = vmatprep.subr.bf16.mxu0 %v6843_v0 }
0x1abe   :  { %5999 = vmatpush1.bf16.msra.mxu1 %v7792_v52 }
0x1abf   :  { %6013 = vmatprep.subr.bf16.mxu1 %v7729_v18 }
0x1ac0   :  { %5983 = vmatpush3.bf16.msra.mxu0 %v5982_v3 }
0x1ac1   :  { %6000 = vmatprep.subr.bf16.mxu0 %v6843_v0 }
0x1b84   :  { %v3187_v36 = vpop.f32.mrb[12].mxu1 }
0x1b85   :  { %v3192_v13 = vadd.f32 %v3187_v36, %v7808_v57  ;;  %v3189_v38 = vpop.f32.mrb[13].mxu1  ;;  %v3404_v36 = vld [vmem:[#allocation18 + $0xf8] sm:$0xff] }
0x1b86   :  { %v3193_v43 = vadd.f32 %v3189_v38, %v7812_v20 }
0x1b87   :  { %v4705_v39 = vmul.f32 -1.442695, %v3192_v13  ;;  %v6010_v13 = vpack.c.bf16 %v3404_v36, %v3403_v32 }
0x1b88   :  { %v4706_v42 = vmul.f32 -1.442695, %v3193_v43 }
0x1b89   :  { %6429 = vpow2.f32 %v4705_v39 }
0x1b8a   :  { %6431 = vtanh.f32 %v3193_v43 }
0x1b93   :  { %v6430_v47 = vpop.eup %6429 }
0x1b94   :  { %v3200_v45 = vadd.f32 1.0, %v6430_v47  ;;  %v6432_v46 = vpop.eup %6431 }
0x1b96   :  { %6433 = vrcp.f32 %v3200_v45 }
0x1b97   :  { %6435 = vpow2.f32 %v4706_v42  ;;  %v3577_v42 = vld [vmem:[#allocation18 + $0x100] sm:$0xff] }
0x1ba0   :  { %v6434_v50 = vpop.eup %6433 }
0x1ba1   :  { %v3208_v51 = vmul.f32 %v6434_v50, %v6432_v46  ;;  %v6436_v21 = vpop.eup %6435  ;;  %v3207_v27 = vmul.f32 %v6434_v50, %v3033_v25  ;;  %v6004_v25 = vpack.c.bf16 %v3400_v24, %v3399_v22 }
0x1ba2   :  { %v3201_v4 = vadd.f32 1.0, %v6436_v21  ;;  %v3578_v21 = vld [vmem:[#allocation18 + $0x108] sm:$0xff] }
0x1ba3   :  { %3210 = vrot.lane.b32.xlu0 %v3208_v51, %s6846_s9 }
0x1ba4   :  { %6437 = vrcp.f32 %v3201_v4  ;;  %v3579_v4 = vld [vmem:[#allocation18 + $0x110] sm:$0xff] }
0x1bae   :  { %v6438_v33 = vpop.eup %6437 }
0x1c15   :  { %v3211_v28 = vpop.permute.xlu0 %3210 }
0x1c16   :  { %v3213_v44 = vadd.f32 %v3211_v28, %v3207_v27  ;;  %v6029_v27 = vpack.c.bf16 %v3578_v21, %v3577_v42  ;;  %v3580_v28 = vld [vmem:[#allocation18 + $0x118] sm:$0xff] }
0x1c18   :  { %6439 = vtanh.f32 %v3213_v44 }
0x1c22   :  { %v6440_v5 = vpop.eup %6439 }
0x1c23   :  { %v3215_v34 = vmul.f32 %v6440_v5, %v6438_v33  ;;  %v3581_v33 = vld [vmem:[#allocation18 + $0x120] sm:$0xff]  ;;  %v3582_v5 = vld [vmem:[#allocation18 + $0x128] sm:$0xff] }
0x1c25   :  { %3226 = vrot.lane.b32.xlu1 %v3215_v34, %s6846_s9  ;;  %v6035_v34 = vpack.c.bf16 %v3582_v5, %v3581_v33 }
0x1c97   :  { %v3227_v37 = vpop.permute.xlu1 %3226 }
0x1c98   :  { %5317 = vmatmul.mubr.msk.f32.vlgmr.msra.gmra.mrb[22].mxu0 %vm520_vm1, %v3227_v37  ;;  %4708 = vmatmul.mubr.msk.f32.vlgmr.msra.gmra.mrb[14].mxu1 %vm520_vm1, %v3227_v37  ;;  %v3583_v37 = vld [vmem:[#allocation18 + $0x130] sm:$0xff] }
0x1c99   :  { %6015 = vmatpush1.bf16.msra.mxu1 %v7744_v31  ;;  %5335 = vmatprep.mubr.msk.f32.mxu0 %vm6844_vm0, %v6845_v1 }
0x1c9a   :  { %6017 = vmatprep.subr.bf16.mxu1 %v7746_v35  ;;  %3545 = vmatprep.mubr.f32.mxu1 %v6845_v1 }
0x1c9b   :  { %6002 = vmatpush3.bf16.msra.mxu0 %v6001_v23 }
0x1c9c   :  { %6003 = vmatprep.subr.bf16.mxu0 %v6843_v0 }
0x1c9d   :  { %6019 = vmatpush1.bf16.msra.mxu1 %v7761_v40 }
0x1c9e   :  { %6021 = vmatprep.subr.bf16.mxu1 %v7765_v41 }
0x1c9f   :  { %6005 = vmatpush3.bf16.msra.mxu0 %v6004_v25 }
0x1ca0   :  { %6006 = vmatprep.subr.bf16.mxu0 %v6843_v0 }
0x1ca1   :  { %6023 = vmatpush1.bf16.msra.mxu1 %v7780_v48 }
0x1ca2   :  { %6025 = vmatprep.subr.bf16.mxu1 %v7783_v49 }
0x1ca3   :  { %6008 = vmatpush3.bf16.msra.mxu0 %v6007_v30 }
0x1ca4   :  { %6009 = vmatprep.subr.bf16.mxu0 %v6843_v0 }
0x1ca5   :  { %6027 = vmatpush1.bf16.msra.mxu1 %v7792_v52 }
0x1ca6   :  { %6041 = vmatprep.subr.bf16.mxu1 %v7729_v18 }
0x1ca7   :  { %6011 = vmatpush3.bf16.msra.mxu0 %v6010_v13 }
0x1ca8   :  { %6028 = vmatprep.subr.bf16.mxu0 %v6843_v0 }
0x1d6b   :  { %v3367_v6 = vpop.f32.mrb[14].mxu1 }
0x1d6c   :  { %v3372_v7 = vadd.f32 %v3367_v6, %v7808_v57  ;;  %v3369_v8 = vpop.f32.mrb[15].mxu1  ;;  %v3584_v6 = vld [vmem:[#allocation18 + $0x138] sm:$0xff] }
0x1d6d   :  { %v3373_v10 = vadd.f32 %v3369_v8, %v7812_v20 }
0x1d6e   :  { %v4709_v9 = vmul.f32 -1.442695, %v3372_v7  ;;  %v6038_v7 = vpack.c.bf16 %v3584_v6, %v3583_v37 }
0x1d6f   :  { %v4710_v38 = vmul.f32 -1.442695, %v3373_v10 }
0x1d70   :  { %6441 = vpow2.f32 %v4709_v9 }
0x1d71   :  { %6443 = vtanh.f32 %v3373_v10 }
0x1d7a   :  { %v6442_v11 = vpop.eup %6441 }
0x1d7b   :  { %v3380_v12 = vadd.f32 1.0, %v6442_v11  ;;  %v6444_v14 = vpop.eup %6443 }
0x1d7d   :  { %6445 = vrcp.f32 %v3380_v12 }
0x1d7e   :  { %6447 = vpow2.f32 %v4710_v38  ;;  %v3757_v38 = vld [vmem:[#allocation18 + $0x140] sm:$0xff] }
0x1d87   :  { %v6446_v15 = vpop.eup %6445 }
0x1d88   :  { %v3388_v16 = vmul.f32 %v6446_v15, %v6444_v14  ;;  %v6448_v39 = vpop.eup %6447  ;;  %v3387_v47 = vmul.f32 %v6446_v15, %v3213_v44  ;;  %v6032_v44 = vpack.c.bf16 %v3580_v28, %v3579_v4 }
0x1d89   :  { %v3381_v43 = vadd.f32 1.0, %v6448_v39  ;;  %v3758_v39 = vld [vmem:[#allocation18 + $0x148] sm:$0xff] }
0x1d8a   :  { %3390 = vrot.lane.b32.xlu0 %v3388_v16, %s6846_s9 }
0x1d8b   :  { %6449 = vrcp.f32 %v3381_v43  ;;  %v3759_v43 = vld [vmem:[#allocation18 + $0x150] sm:$0xff] }
0x1d95   :  { %v6450_v50 = vpop.eup %6449 }
0x1dfc   :  { %v3391_v45 = vpop.permute.xlu0 %3390 }
0x1dfd   :  { %v3393_v46 = vadd.f32 %v3391_v45, %v3387_v47  ;;  %v6057_v47 = vpack.c.bf16 %v3758_v39, %v3757_v38  ;;  %v3760_v45 = vld [vmem:[#allocation18 + $0x158] sm:$0xff] }
0x1dff   :  { %6451 = vtanh.f32 %v3393_v46 }
0x1e09   :  { %v6452_v51 = vpop.eup %6451 }
0x1e0a   :  { %v3395_v53 = vmul.f32 %v6452_v51, %v6450_v50  ;;  %v3761_v50 = vld [vmem:[#allocation18 + $0x160] sm:$0xff]  ;;  %v3762_v51 = vld [vmem:[#allocation18 + $0x168] sm:$0xff] }
0x1e0c   :  { %3406 = vrot.lane.b32.xlu1 %v3395_v53, %s6846_s9  ;;  %v6063_v53 = vpack.c.bf16 %v3762_v51, %v3761_v50 }
0x1e7e   :  { %v3407_v54 = vpop.permute.xlu1 %3406 }
0x1e7f   :  { %5336 = vmatmul.mubr.msk.f32.vlgmr.msra.gmra.mrb[22].mxu0 %vm520_vm1, %v3407_v54  ;;  %4712 = vmatmul.mubr.msk.f32.vlgmr.msra.gmra.mrb[16].mxu1 %vm520_vm1, %v3407_v54  ;;  %v3763_v54 = vld [vmem:[#allocation18 + $0x170] sm:$0xff] }
0x1e80   :  { %6043 = vmatpush1.bf16.msra.mxu1 %v7744_v31  ;;  %5354 = vmatprep.mubr.msk.f32.mxu0 %vm6844_vm0, %v6845_v1 }
0x1e81   :  { %6045 = vmatprep.subr.bf16.mxu1 %v7746_v35  ;;  %3725 = vmatprep.mubr.f32.mxu1 %v6845_v1 }
0x1e82   :  { %6030 = vmatpush3.bf16.msra.mxu0 %v6029_v27 }
0x1e83   :  { %6031 = vmatprep.subr.bf16.mxu0 %v6843_v0 }
0x1e84   :  { %6047 = vmatpush1.bf16.msra.mxu1 %v7761_v40 }
0x1e85   :  { %6049 = vmatprep.subr.bf16.mxu1 %v7765_v41 }
0x1e86   :  { %6033 = vmatpush3.bf16.msra.mxu0 %v6032_v44 }
0x1e87   :  { %6034 = vmatprep.subr.bf16.mxu0 %v6843_v0 }
0x1e88   :  { %6051 = vmatpush1.bf16.msra.mxu1 %v7780_v48 }
0x1e89   :  { %6053 = vmatprep.subr.bf16.mxu1 %v7783_v49 }
0x1e8a   :  { %6036 = vmatpush3.bf16.msra.mxu0 %v6035_v34 }
0x1e8b   :  { %6037 = vmatprep.subr.bf16.mxu0 %v6843_v0 }
0x1e8c   :  { %6055 = vmatpush1.bf16.msra.mxu1 %v7792_v52 }
0x1e8d   :  { %6069 = vmatprep.subr.bf16.mxu1 %v7729_v18 }
0x1e8e   :  { %6039 = vmatpush3.bf16.msra.mxu0 %v6038_v7 }
0x1e8f   :  { %6056 = vmatprep.subr.bf16.mxu0 %v6843_v0 }
0x1f52   :  { %v3547_v55 = vpop.f32.mrb[16].mxu1 }
0x1f53   :  { %v3552_v56 = vadd.f32 %v3547_v55, %v7808_v57  ;;  %v3549_v58 = vpop.f32.mrb[17].mxu1  ;;  %v3764_v55 = vld [vmem:[#allocation18 + $0x178] sm:$0xff] }
0x1f54   :  { %v3553_v60 = vadd.f32 %v3549_v58, %v7812_v20 }
0x1f55   :  { %v4713_v59 = vmul.f32 -1.442695, %v3552_v56  ;;  %v6066_v56 = vpack.c.bf16 %v3764_v55, %v3763_v54 }
0x1f56   :  { %v4714_v8 = vmul.f32 -1.442695, %v3553_v60 }
0x1f57   :  { %6453 = vpow2.f32 %v4713_v59 }
0x1f58   :  { %6455 = vtanh.f32 %v3553_v60 }
0x1f61   :  { %v6454_v61 = vpop.eup %6453 }
0x1f62   :  { %v3560_v62 = vadd.f32 1.0, %v6454_v61  ;;  %v6456_v2 = vpop.eup %6455 }
0x1f64   :  { %6457 = vrcp.f32 %v3560_v62 }
0x1f65   :  { %6459 = vpow2.f32 %v4714_v8  ;;  %v3937_v8 = vld [vmem:[#allocation18 + $0x180] sm:$0xff] }
0x1f6e   :  { %v6458_v63 = vpop.eup %6457 }
0x1f6f   :  { %v3568_v3 = vmul.f32 %v6458_v63, %v6456_v2  ;;  %v6460_v9 = vpop.eup %6459  ;;  %v3567_v11 = vmul.f32 %v6458_v63, %v3393_v46  ;;  %v6060_v46 = vpack.c.bf16 %v3760_v45, %v3759_v43 }
0x1f70   :  { %v3561_v10 = vadd.f32 1.0, %v6460_v9  ;;  %v3938_v9 = vld [vmem:[#allocation18 + $0x188] sm:$0xff] }
0x1f71   :  { %3570 = vrot.lane.b32.xlu0 %v3568_v3, %s6846_s9 }
0x1f72   :  { %6461 = vrcp.f32 %v3561_v10  ;;  %v3939_v10 = vld [vmem:[#allocation18 + $0x190] sm:$0xff] }
0x1f7c   :  { %v6462_v15 = vpop.eup %6461 }
0x1fe3   :  { %v3571_v12 = vpop.permute.xlu0 %3570 }
0x1fe4   :  { %v3573_v14 = vadd.f32 %v3571_v12, %v3567_v11  ;;  %v6085_v11 = vpack.c.bf16 %v3938_v9, %v3937_v8  ;;  %v3940_v12 = vld [vmem:[#allocation18 + $0x198] sm:$0xff] }
0x1fe6   :  { %6463 = vtanh.f32 %v3573_v14 }
0x1ff0   :  { %v6464_v16 = vpop.eup %6463 }
0x1ff1   :  { %v3575_v17 = vmul.f32 %v6464_v16, %v6462_v15  ;;  %v3941_v15 = vld [vmem:[#allocation18 + $0x1a0] sm:$0xff]  ;;  %v3942_v16 = vld [vmem:[#allocation18 + $0x1a8] sm:$0xff] }
0x1ff3   :  { %3586 = vrot.lane.b32.xlu1 %v3575_v17, %s6846_s9  ;;  %v6091_v17 = vpack.c.bf16 %v3942_v16, %v3941_v15 }
0x2065   :  { %v3587_v19 = vpop.permute.xlu1 %3586 }
0x2066   :  { %5355 = vmatmul.mubr.msk.f32.vlgmr.msra.gmra.mrb[22].mxu0 %vm520_vm1, %v3587_v19  ;;  %4716 = vmatmul.mubr.msk.f32.vlgmr.msra.gmra.mrb[18].mxu1 %vm520_vm1, %v3587_v19  ;;  %v3943_v19 = vld [vmem:[#allocation18 + $0x1b0] sm:$0xff] }
0x2067   :  { %6071 = vmatpush1.bf16.msra.mxu1 %v7744_v31  ;;  %5373 = vmatprep.mubr.msk.f32.mxu0 %vm6844_vm0, %v6845_v1 }
0x2068   :  { %6073 = vmatprep.subr.bf16.mxu1 %v7746_v35  ;;  %3905 = vmatprep.mubr.f32.mxu1 %v6845_v1 }
0x2069   :  { %6058 = vmatpush3.bf16.msra.mxu0 %v6057_v47 }
0x206a   :  { %6059 = vmatprep.subr.bf16.mxu0 %v6843_v0 }
0x206b   :  { %6075 = vmatpush1.bf16.msra.mxu1 %v7761_v40 }
0x206c   :  { %6077 = vmatprep.subr.bf16.mxu1 %v7765_v41 }
0x206d   :  { %6061 = vmatpush3.bf16.msra.mxu0 %v6060_v46 }
0x206e   :  { %6062 = vmatprep.subr.bf16.mxu0 %v6843_v0 }
0x206f   :  { %6079 = vmatpush1.bf16.msra.mxu1 %v7780_v48 }
0x2070   :  { %6081 = vmatprep.subr.bf16.mxu1 %v7783_v49 }
0x2071   :  { %6064 = vmatpush3.bf16.msra.mxu0 %v6063_v53 }
0x2072   :  { %6065 = vmatprep.subr.bf16.mxu0 %v6843_v0 }
0x2073   :  { %6083 = vmatpush1.bf16.msra.mxu1 %v7792_v52 }
0x2074   :  { %6097 = vmatprep.subr.bf16.mxu1 %v7729_v18 }
0x2075   :  { %6067 = vmatpush3.bf16.msra.mxu0 %v6066_v56 }
0x2076   :  { %6084 = vmatprep.subr.bf16.mxu0 %v6843_v0 }
0x2139   :  { %v3727_v22 = vpop.f32.mrb[18].mxu1 }
0x213a   :  { %v3732_v23 = vadd.f32 %v3727_v22, %v7808_v57  ;;  %v3729_v24 = vpop.f32.mrb[19].mxu1  ;;  %v3944_v22 = vld [vmem:[#allocation18 + $0x1b8] sm:$0xff] }
0x213b   :  { %v3733_v26 = vadd.f32 %v3729_v24, %v7812_v20 }
0x213c   :  { %v4717_v25 = vmul.f32 -1.442695, %v3732_v23  ;;  %v6094_v23 = vpack.c.bf16 %v3944_v22, %v3943_v19  ;;  %v4301_v22 = vld [vmem:[#allocation18 + $0x220] sm:$0xff] }
0x213d   :  { %v4718_v58 = vmul.f32 -1.442695, %v3733_v26 }
0x213e   :  { %6465 = vpow2.f32 %v4717_v25 }
0x213f   :  { %6467 = vtanh.f32 %v3733_v26 }
0x2148   :  { %v6466_v29 = vpop.eup %6465 }
0x2149   :  { %v3740_v30 = vadd.f32 1.0, %v6466_v29  ;;  %v6468_v32 = vpop.eup %6467 }
0x214b   :  { %6469 = vrcp.f32 %v3740_v30 }
0x214c   :  { %6471 = vpow2.f32 %v4718_v58  ;;  %v4117_v58 = vld [vmem:[#allocation18 + $0x1c0] sm:$0xff] }
0x2155   :  { %v6470_v36 = vpop.eup %6469 }
0x2156   :  { %v3748_v13 = vmul.f32 %v6470_v36, %v6468_v32  ;;  %v6472_v59 = vpop.eup %6471  ;;  %v3747_v61 = vmul.f32 %v6470_v36, %v3573_v14  ;;  %v6088_v14 = vpack.c.bf16 %v3940_v12, %v3939_v10 }
0x2157   :  { %v3741_v60 = vadd.f32 1.0, %v6472_v59  ;;  %v4118_v59 = vld [vmem:[#allocation18 + $0x1c8] sm:$0xff] }
0x2158   :  { %3750 = vrot.lane.b32.xlu0 %v3748_v13, %s6846_s9 }
0x2159   :  { %6473 = vrcp.f32 %v3741_v60  ;;  %v6113_v60 = vpack.c.bf16 %v4118_v59, %v4117_v58 }
0x2163   :  { %v6474_v63 = vpop.eup %6473 }
0x21ca   :  { %v3751_v62 = vpop.permute.xlu0 %3750 }
0x21cb   :  { %v3753_v2 = vadd.f32 %v3751_v62, %v3747_v61  ;;  %v4120_v61 = vld [vmem:[#allocation18 + $0x1d8] sm:$0xff] }
0x21cd   :  { %6475 = vtanh.f32 %v3753_v2 }
0x21d7   :  { %v6476_v3 = vpop.eup %6475 }
0x21d8   :  { %v3755_v42 = vmul.f32 %v6476_v3, %v6474_v63  ;;  %v4122_v63 = vld [vmem:[#allocation18 + $0x1e8] sm:$0xff] }
0x21da   :  { %3766 = vrot.lane.b32.xlu1 %v3755_v42, %s6846_s9  ;;  %v4123_v42 = vld [vmem:[#allocation18 + $0x1f0] sm:$0xff] }
0x224c   :  { %v3767_v21 = vpop.permute.xlu1 %3766 }
0x224d   :  { %5374 = vmatmul.mubr.msk.f32.vlgmr.msra.gmra.mrb[22].mxu0 %vm520_vm1, %v3767_v21  ;;  %4720 = vmatmul.mubr.msk.f32.vlgmr.msra.gmra.mrb[20].mxu1 %vm520_vm1, %v3767_v21  ;;  %v4124_v21 = vld [vmem:[#allocation18 + $0x1f8] sm:$0xff] }
0x224e   :  { %6099 = vmatpush1.bf16.msra.mxu1 %v7744_v31  ;;  %5392 = vmatprep.mubr.msk.f32.mxu0 %vm6844_vm0, %v6845_v1 }
0x224f   :  { %6101 = vmatprep.subr.bf16.mxu1 %v7746_v35  ;;  %4085 = vmatprep.mubr.f32.mxu1 %v6845_v1 }
0x2250   :  { %6086 = vmatpush3.bf16.msra.mxu0 %v6085_v11 }
0x2251   :  { %6087 = vmatprep.subr.bf16.mxu0 %v6843_v0 }
0x2252   :  { %6103 = vmatpush1.bf16.msra.mxu1 %v7761_v40 }
0x2253   :  { %6105 = vmatprep.subr.bf16.mxu1 %v7765_v41 }
0x2254   :  { %6089 = vmatpush3.bf16.msra.mxu0 %v6088_v14 }
0x2255   :  { %6090 = vmatprep.subr.bf16.mxu0 %v6843_v0 }
0x2256   :  { %6107 = vmatpush1.bf16.msra.mxu1 %v7780_v48 }
0x2257   :  { %6109 = vmatprep.subr.bf16.mxu1 %v7783_v49 }
0x2258   :  { %6092 = vmatpush3.bf16.msra.mxu0 %v6091_v17  ;;  %v4300_v17 = vld [vmem:[#allocation18 + $0x218] sm:$0xff] }
0x2259   :  { %6093 = vmatprep.subr.bf16.mxu0 %v6843_v0 }
0x225a   :  { %6111 = vmatpush1.bf16.msra.mxu1 %v7792_v52 }
0x225b   :  { %6125 = vmatprep.subr.bf16.mxu1 %v7729_v18 }
0x225c   :  { %6095 = vmatpush3.bf16.msra.mxu0 %v6094_v23  ;;  %v4302_v23 = vld [vmem:[#allocation18 + $0x228] sm:$0xff] }
0x225d   :  { %6112 = vmatprep.subr.bf16.mxu0 %v6843_v0 }
0x2320   :  { %v3907_v4 = vpop.f32.mrb[20].mxu1 }
0x2321   :  { %v3912_v27 = vadd.f32 %v3907_v4, %v7808_v57  ;;  %v3909_v28 = vpop.f32.mrb[21].mxu1  ;;  %v6122_v4 = vpack.c.bf16 %v4124_v21, %v4123_v42  ;;  %v4483_v21 = vld [vmem:[#allocation18 + $0x270] sm:$0xff] }
0x2322   :  { %v3913_v33 = vadd.f32 %v3909_v28, %v7812_v20 }
0x2323   :  { %v4721_v44 = vmul.f32 -1.442695, %v3912_v27 }
0x2324   :  { %v4722_v24 = vmul.f32 -1.442695, %v3913_v33 }
0x2325   :  { %6477 = vpow2.f32 %v4721_v44 }
0x2326   :  { %6479 = vtanh.f32 %v3913_v33 }
0x232f   :  { %v6478_v5 = vpop.eup %6477 }
0x2330   :  { %v3920_v34 = vadd.f32 1.0, %v6478_v5  ;;  %v6480_v37 = vpop.eup %6479 }
0x2332   :  { %6481 = vrcp.f32 %v3920_v34 }
0x2333   :  { %6483 = vpow2.f32 %v4722_v24  ;;  %v6147_v24 = vpack.c.bf16 %v4302_v23, %v4301_v22 }
0x233c   :  { %v6482_v6 = vpop.eup %6481 }
0x233d   :  { %v3928_v7 = vmul.f32 %v6482_v6, %v6480_v37  ;;  %v6484_v25 = vpop.eup %6483  ;;  %v3927_v29 = vmul.f32 %v6482_v6, %v3753_v2  ;;  %v4121_v2 = vld [vmem:[#allocation18 + $0x1e0] sm:$0xff] }
0x233e   :  { %v3921_v26 = vadd.f32 1.0, %v6484_v25  ;;  %v6119_v3 = vpack.c.bf16 %v4122_v63, %v4121_v2  ;;  %v4303_v25 = vld [vmem:[#allocation18 + $0x230] sm:$0xff]  ;;  %v4480_v63 = vld [vmem:[#allocation18 + $0x258] sm:$0xff] }
0x233f   :  { %3930 = vrot.lane.b32.xlu0 %v3928_v7, %s6846_s9 }
0x2340   :  { %6485 = vrcp.f32 %v3921_v26  ;;  %v4304_v26 = vld [vmem:[#allocation18 + $0x238] sm:$0xff] }
0x234a   :  { %v6486_v36 = vpop.eup %6485 }
0x23b1   :  { %v3931_v30 = vpop.permute.xlu0 %3930 }
0x23b2   :  { %v3933_v32 = vadd.f32 %v3931_v30, %v3927_v29  ;;  %v6150_v29 = vpack.c.bf16 %v4304_v26, %v4303_v25 }
0x23b4   :  { %6487 = vtanh.f32 %v3933_v32 }
0x23be   :  { %v6488_v13 = vpop.eup %6487 }
0x23bf   :  { %v3935_v38 = vmul.f32 %v6488_v13, %v6486_v36 }
0x23c1   :  { %3946 = vrot.lane.b32.xlu1 %v3935_v38, %s6846_s9 }
0x2433   :  { %v3947_v39 = vpop.permute.xlu1 %3946 }
0x2434   :  { %5393 = vmatmul.mubr.msk.f32.vlgmr.msra.gmra.mrb[22].mxu0 %vm520_vm1, %v3947_v39  ;;  %4724 = vmatmul.mubr.msk.f32.vlgmr.msra.gmra.mrb[22].mxu1 %vm520_vm1, %v3947_v39 }
0x2435   :  { %6127 = vmatpush1.bf16.msra.mxu1 %v7744_v31  ;;  %5411 = vmatprep.mubr.msk.f32.mxu0 %vm6844_vm0, %v6845_v1 }
0x2436   :  { %6129 = vmatprep.subr.bf16.mxu1 %v7746_v35  ;;  %4265 = vmatprep.mubr.f32.mxu1 %v6845_v1 }
0x2437   :  { %6114 = vmatpush3.bf16.msra.mxu0 %v6113_v60 }
0x2438   :  { %6115 = vmatprep.subr.bf16.mxu0 %v6843_v0 }
0x2439   :  { %6131 = vmatpush1.bf16.msra.mxu1 %v7761_v40 }
0x243a   :  { %6133 = vmatprep.subr.bf16.mxu1 %v7765_v41 }
0x243d   :  { %6135 = vmatpush1.bf16.msra.mxu1 %v7780_v48 }
0x243e   :  { %6137 = vmatprep.subr.bf16.mxu1 %v7783_v49 }
0x2441   :  { %6139 = vmatpush1.bf16.msra.mxu1 %v7792_v52 }
0x2442   :  { %6153 = vmatprep.subr.bf16.mxu1 %v7729_v18  ;;  %v4119_v18 = vld [vmem:[#allocation18 + $0x1d0] sm:$0xff] }
0x2443   :  { %v6116_v62 = vpack.c.bf16 %v4120_v61, %v4119_v18  ;;  %v4477_v61 = vld [vmem:[#allocation18 + $0x240] sm:$0xff] }
0x2445   :  { %6117 = vmatpush3.bf16.msra.mxu0 %v6116_v62  ;;  %v4478_v62 = vld [vmem:[#allocation18 + $0x248] sm:$0xff] }
0x2446   :  { %6118 = vmatprep.subr.bf16.mxu0 %v6843_v0  ;;  %v6169_v2 = vpack.c.bf16 %v4478_v62, %v4477_v61 }
0x2449   :  { %6120 = vmatpush3.bf16.msra.mxu0 %v6119_v3  ;;  %v4481_v3 = vld [vmem:[#allocation18 + $0x260] sm:$0xff] }
0x244a   :  { %6121 = vmatprep.subr.bf16.mxu0 %v6843_v0 }
0x244d   :  { %6123 = vmatpush3.bf16.msra.mxu0 %v6122_v4  ;;  %v4484_v4 = vld [vmem:[#allocation18 + $0x278] sm:$0xff] }
0x244e   :  { %6140 = vmatprep.subr.bf16.mxu0 %v6843_v0 }
0x2507   :  { %v4087_v43 = vpop.f32.mrb[22].mxu1 }
0x2508   :  { %v4092_v47 = vadd.f32 %v4087_v43, %v7808_v57  ;;  %v4089_v45 = vpop.f32.mrb[23].mxu1 }
0x2509   :  { %v4093_v50 = vadd.f32 %v4089_v45, %v7812_v20 }
0x250a   :  { %v4725_v46 = vmul.f32 -1.442695, %v4092_v47 }
0x250b   :  { %v4726_v27 = vmul.f32 -1.442695, %v4093_v50 }
0x250c   :  { %6489 = vpow2.f32 %v4725_v46 }
0x250d   :  { %6491 = vtanh.f32 %v4093_v50 }
0x2516   :  { %v6490_v51 = vpop.eup %6489 }
0x2517   :  { %v4100_v53 = vadd.f32 1.0, %v6490_v51  ;;  %v6492_v54 = vpop.eup %6491 }
0x2519   :  { %6493 = vrcp.f32 %v4100_v53 }
0x251a   :  { %6495 = vpow2.f32 %v4726_v27  ;;  %v6178_v27 = vpack.c.bf16 %v4484_v4, %v4483_v21 }
0x2523   :  { %v6494_v55 = vpop.eup %6493 }
0x2524   :  { %v4108_v56 = vmul.f32 %v6494_v55, %v6492_v54  ;;  %v6496_v28 = vpop.eup %6495  ;;  %v4107_v33 = vmul.f32 %v6494_v55, %v3933_v32 }
0x2525   :  { %v4101_v44 = vadd.f32 1.0, %v6496_v28 }
0x2526   :  { %4110 = vrot.lane.b32.xlu0 %v4108_v56, %s6846_s9 }
0x2527   :  { %6497 = vrcp.f32 %v4101_v44 }
0x2531   :  { %v6498_v37 = vpop.eup %6497 }
0x2598   :  { %v4111_v5 = vpop.permute.xlu0 %4110 }
0x2599   :  { %v4113_v34 = vadd.f32 %v4111_v5, %v4107_v33 }
0x259b   :  { %6499 = vtanh.f32 %v4113_v34 }
0x25a5   :  { %v6500_v6 = vpop.eup %6499 }
0x25a6   :  { %v4115_v7 = vmul.f32 %v6500_v6, %v6498_v37 }
0x25a8   :  { %4126 = vrot.lane.b32.xlu1 %v4115_v7, %s6846_s9 }
0x261a   :  { %v4127_v8 = vpop.permute.xlu1 %4126 }
0x261b   :  { %5412 = vmatmul.mubr.msk.f32.vlgmr.msra.gmra.mrb[22].mxu0 %vm520_vm1, %v4127_v8  ;;  %4728 = vmatmul.mubr.msk.f32.vlgmr.msra.gmra.mrb[24].mxu1 %vm520_vm1, %v4127_v8 }
0x261c   :  { %6155 = vmatpush1.bf16.msra.mxu1 %v7744_v31  ;;  %5430 = vmatprep.mubr.msk.f32.mxu0 %vm6844_vm0, %v6845_v1 }
0x261d   :  { %6157 = vmatprep.subr.bf16.mxu1 %v7746_v35  ;;  %4445 = vmatprep.mubr.f32.mxu1 %v6845_v1 }
0x2620   :  { %6159 = vmatpush1.bf16.msra.mxu1 %v7761_v40 }
0x2621   :  { %6161 = vmatprep.subr.bf16.mxu1 %v7765_v41 }
0x2624   :  { %6163 = vmatpush1.bf16.msra.mxu1 %v7780_v48  ;;  %v4297_v48 = vld [vmem:[#allocation18 + $0x200] sm:$0xff] }
0x2625   :  { %6165 = vmatprep.subr.bf16.mxu1 %v7783_v49  ;;  %v4298_v49 = vld [vmem:[#allocation18 + $0x208] sm:$0xff] }
0x2626   :  { %v6141_v16 = vpack.c.bf16 %v4298_v49, %v4297_v48 }
0x2628   :  { %6167 = vmatpush1.bf16.msra.mxu1 %v7792_v52  ;;  %v4299_v52 = vld [vmem:[#allocation18 + $0x210] sm:$0xff]  ;;  %6142 = vmatpush3.bf16.msra.mxu0 %v6141_v16 }
0x2629   :  { %v6144_v19 = vpack.c.bf16 %v4300_v17, %v4299_v52  ;;  %6143 = vmatprep.subr.bf16.mxu0 %v6843_v0 }
0x262c   :  { %6145 = vmatpush3.bf16.msra.mxu0 %v6144_v19 }
0x262d   :  { %6146 = vmatprep.subr.bf16.mxu0 %v6843_v0 }
0x2630   :  { %6148 = vmatpush3.bf16.msra.mxu0 %v6147_v24 }
0x2631   :  { %6149 = vmatprep.subr.bf16.mxu0 %v6843_v0 }
0x2634   :  { %6151 = vmatpush3.bf16.msra.mxu0 %v6150_v29 }
0x2635   :  { %6168 = vmatprep.subr.bf16.mxu0 %v6843_v0 }
0x26ee   :  { %v4267_v9 = vpop.f32.mrb[24].mxu1 }
0x26ef   :  { %v4272_v31 = vadd.f32 %v4267_v9, %v7808_v57  ;;  %v4269_v10 = vpop.f32.mrb[25].mxu1 }
0x26f0   :  { %v4273_v35 = vadd.f32 %v4269_v10, %v7812_v20 }
0x26f1   :  { %v4729_v11 = vmul.f32 -1.442695, %v4272_v31  ;;  %v4696_v31 = vld [vmem:[#allocation21] ss:$0 sm:$0xff] }
0x26f2   :  { %v4730_v30 = vmul.f32 -1.442695, %v4273_v35 }
0x26f3   :  { %6501 = vpow2.f32 %v4729_v11 }
0x26f4   :  { %6503 = vtanh.f32 %v4273_v35 }
0x26fd   :  { %v6502_v12 = vpop.eup %6501 }
0x26fe   :  { %v4280_v14 = vadd.f32 1.0, %v6502_v12  ;;  %v6504_v40 = vpop.eup %6503 }
0x2700   :  { %6505 = vrcp.f32 %v4280_v14 }
0x2701   :  { %6507 = vpow2.f32 %v4730_v30 }
0x270a   :  { %v6506_v41 = vpop.eup %6505 }
0x270b   :  { %v4288_v15 = vmul.f32 %v6506_v41, %v6504_v40  ;;  %v6508_v32 = vpop.eup %6507  ;;  %v4287_v13 = vmul.f32 %v6506_v41, %v4113_v34 }
0x270c   :  { %v4281_v36 = vadd.f32 1.0, %v6508_v32 }
0x270d   :  { %4290 = vrot.lane.b32.xlu0 %v4288_v15, %s6846_s9 }
0x270e   :  { %6509 = vrcp.f32 %v4281_v36 }
0x2718   :  { %v6510_v43 = vpop.eup %6509 }
0x277f   :  { %v4291_v38 = vpop.permute.xlu0 %4290 }
0x2780   :  { %v4293_v39 = vadd.f32 %v4291_v38, %v4287_v13 }
0x2782   :  { %6511 = vtanh.f32 %v4293_v39 }
0x278c   :  { %v6512_v47 = vpop.eup %6511 }
0x278d   :  { %v4295_v45 = vmul.f32 %v6512_v47, %v6510_v43 }
0x278f   :  { %4306 = vrot.lane.b32.xlu1 %v4295_v45, %s6846_s9 }
0x2801   :  { %v4307_v46 = vpop.permute.xlu1 %4306 }
0x2802   :  { %5431 = vmatmul.mubr.msk.f32.vlgmr.msra.gmra.mrb[22].mxu0 %vm520_vm1, %v4307_v46  ;;  %4732 = vmatmul.mubr.msk.f32.vlgmr.msra.gmra.mrb[26].mxu1 %vm520_vm1, %v4307_v46 }
0x2803   :  { %5449 = vmatprep.mubr.msk.f32.mxu0 %vm6844_vm0, %v6845_v1  ;;  %v4479_v1 = vld [vmem:[#allocation18 + $0x250] sm:$0xff]  ;;  %6170 = vmatpush3.bf16.msra.mxu0 %v6169_v2 }
0x2804   :  { %6171 = vmatprep.subr.bf16.mxu0 %v6843_v0 }
0x28d5   :  { %v4447_v50 = vpop.f32.mrb[26].mxu1 }
0x28d6   :  { %v4452_v51 = vadd.f32 %v4447_v50, %v7808_v57  ;;  %v4449_v53 = vpop.f32.mrb[27].mxu1  ;;  %v6172_v57 = vpack.c.bf16 %v4480_v63, %v4479_v1 }
0x28d7   :  { %v4453_v55 = vadd.f32 %v4449_v53, %v7812_v20  ;;  %v4482_v20 = vld [vmem:[#allocation18 + $0x268] sm:$0xff] }
0x28d8   :  { %v4733_v54 = vmul.f32 -1.442695, %v4452_v51  ;;  %6173 = vmatpush3.bf16.msra.mxu0 %v6172_v57  ;;  %v6175_v42 = vpack.c.bf16 %v4482_v20, %v4481_v3 }
0x28d9   :  { %6174 = vmatprep.subr.bf16.mxu0 %v6843_v0  ;;  %v4734_v28 = vmul.f32 -1.442695, %v4453_v55 }
0x28da   :  { %6513 = vpow2.f32 %v4733_v54 }
0x28db   :  { %6515 = vtanh.f32 %v4453_v55 }
0x28dc   :  { %6176 = vmatpush3.bf16.msra.mxu0 %v6175_v42 }
0x28dd   :  { %6177 = vmatprep.subr.bf16.mxu0 %v6843_v0 }
0x28e0   :  { %6179 = vmatpush3.bf16.msra.mxu0 %v6178_v27 }
0x28e4   :  { %v6514_v56 = vpop.eup %6513 }
0x28e5   :  { %v4460_v58 = vadd.f32 1.0, %v6514_v56  ;;  %v6516_v59 = vpop.eup %6515 }
0x28e7   :  { %6517 = vrcp.f32 %v4460_v58 }
0x28e8   :  { %6519 = vpow2.f32 %v4734_v28 }
0x28f1   :  { %v6518_v18 = vpop.eup %6517 }
0x28f2   :  { %v4468_v60 = vmul.f32 %v6518_v18, %v6516_v59  ;;  %v6520_v44 = vpop.eup %6519  ;;  %v4467_v5 = vmul.f32 %v6518_v18, %v4293_v39 }
0x28f3   :  { %v4461_v33 = vadd.f32 1.0, %v6520_v44 }
0x28f4   :  { %4470 = vrot.lane.b32.xlu0 %v4468_v60, %s6846_s9 }
0x28f5   :  { %6521 = vrcp.f32 %v4461_v33 }
0x28ff   :  { %v6522_v6 = vpop.eup %6521 }
0x2966   :  { %v4471_v34 = vpop.permute.xlu0 %4470 }
0x2967   :  { %v4473_v37 = vadd.f32 %v4471_v34, %v4467_v5 }
0x2969   :  { %6523 = vtanh.f32 %v4473_v37 }
0x2973   :  { %v6524_v7 = vpop.eup %6523 }
0x2974   :  { %v4475_v8 = vmul.f32 %v6524_v7, %v6522_v6 }
0x2976   :  { %4486 = vrot.lane.b32.xlu1 %v4475_v8, %s6846_s9 }
0x29e8   :  { %v4487_v9 = vpop.permute.xlu1 %4486 }
0x29e9   :  { %5450 = vmatmul.mubr.msk.f32.vlgmr.msra.gmra.mrb[22].mxu0 %vm520_vm1, %v4487_v9 }
0x2abc   :  { %v4556_v0 = vpop.f32.mrb[22].mxu0 }
0x2abd   :  { %v6203_v10 = vadd.f32 %v4696_v31, %v4556_v0  ;;  %v5451_v11 = vpop.f32.mrb[23].mxu0 }
0x2abf   :  { %4561 = vst [vmem:[%s8070_s3] sm:$0xff] %v6203_v10 }
0x2ac0   :  { %4576 = vsyncpa [#allocation3], 1 }
0x2ac1   :  { %4577 = vsyncpa [#allocation5], 1 }
0x2ac2   :  { %4578 = vsyncpa [#allocation8], 1 }
0x2ac3   :  { %4579 = vsyncpa [#allocation11], 1 }
0x2ac4   :  { %4580 = vsyncpa [#allocation14], 1 }
0x2ac5   :  { %4581 = vsyncpa [#allocation17], 1 }
0x2ac6   :  { %4582 = vsyncpa [#allocation20], 1 }

</bundles_post_ra>
